<compile_context>
chip_gen: v5e
topology: v5e:2x2
jax: 0.10.0
libtpu: 0.0.40
codegen_flags: <defaults>
</compile_context>

<pallas_src>
import functools
import numpy as np
import jax
import jax.numpy as jnp
from jax import lax
from jax.experimental import pallas as pl
from jax.experimental.pallas import tpu as pltpu

DTYPE = jnp.float32


# ----------------------------- Pallas kernels ------------------------------

def _expand(mat, sel):
    """Returns sel @ mat @ sel^T (rhs-transposed dot_general, no explicit transpose)."""
    t = jnp.dot(sel, mat, preferred_element_type=DTYPE)            # (n, D)
    return lax.dot_general(t, sel, (((1,), (1,)), ((), ())),
                           preferred_element_type=DTYPE)           # (n, n)


def _make_lanczos_kernel(d, D, k_steps, eps=1e-30):
    n = D * D

    def kernel(a_ref, q0_ref, q_out_ref, t_out_ref):
        # ---- selector matrices built from iota compares only (no int div/mod) ----
        p_idx = lax.broadcasted_iota(jnp.int32, (n, D), 0)          # p = 0..n-1
        i_idx = lax.broadcasted_iota(jnp.int32, (n, D), 1)          # i = 0..D-1
        lo = i_idx * D
        # e_exp[p, i] = (p // D == i)
        e_exp = jnp.logical_and(p_idx >= lo, p_idx < lo + D).astype(DTYPE)
        # e_rep[p, i] = (p % D == i)
        e_rep = jnp.zeros((n, D), DTYPE)
        for j in range(D):
            e_rep = e_rep + (p_idx == i_idx + j * D).astype(DTYPE)

        # ---- -Gong = -sum_a kron(A_a, A_a), kept entirely in VMEM/vregs ----
        # kron(A, A)[i*D+m, j*D+n] = A[i, j] * A[m, n]
        #                          = (Eexp A Eexp^T)[p, q] * (Erep A Erep^T)[p, q]
        mg = jnp.zeros((n, n), DTYPE)
        for a in range(d):
            Aa = a_ref[a]                                           # (D, D)
            mg = mg + _expand(Aa, e_exp) * _expand(Aa, e_rep)
        mg = -mg                                                    # minus_Gong

        # ---- k-step Lanczos, full (two-pass) Gram-Schmidt, fully unrolled ----
        q_out_ref[...] = jnp.zeros((k_steps, n), DTYPE)
        q = q0_ref[...]                                             # (1, n), unit norm
        q_out_ref[0:1, :] = q
        for i in range(1, k_steps):
            u = jnp.dot(q, mg, preferred_element_type=DTYPE)        # (1, n)
            Qk = q_out_ref[...]                                     # (k, n); unbuilt rows are 0
            c1 = lax.dot_general(u, Qk, (((1,), (1,)), ((), ())),
                                 preferred_element_type=DTYPE)      # (1, k)
            r = u - jnp.dot(c1, Qk, preferred_element_type=DTYPE)
            c2 = lax.dot_general(r, Qk, (((1,), (1,)), ((), ())),
                                 preferred_element_type=DTYPE)
            r = r - jnp.dot(c2, Qk, preferred_element_type=DTYPE)
            nrm2 = jnp.sum(r * r)
            # breakdown guard: invariant subspace reached -> emit a zero row instead of NaN
            inv = jnp.where(nrm2 > eps, lax.rsqrt(nrm2), jnp.zeros_like(nrm2))
            q = r * inv
            q_out_ref[i:i + 1, :] = q

        # ---- Rayleigh-Ritz matrix T = Q (-Gong) Q^T ----
        Qk = q_out_ref[...]
        QM = jnp.dot(Qk, mg, preferred_element_type=DTYPE)          # (k, n)
        t_out_ref[...] = lax.dot_general(QM, Qk, (((1,), (1,)), ((), ())),
                                         preferred_element_type=DTYPE)

    return kernel


def lanczos_fused(A, q0, k_steps):
    d, D, _ = A.shape
    n = D * D
    return pl.pallas_call(
        _make_lanczos_kernel(d, D, k_steps),
        out_shape=(jax.ShapeDtypeStruct((k_steps, n), DTYPE),
                   jax.ShapeDtypeStruct((k_steps, k_steps), DTYPE)),
        in_specs=[pl.BlockSpec(memory_space=pltpu.MemorySpace.VMEM),
                  pl.BlockSpec(memory_space=pltpu.MemorySpace.VMEM)],
        out_specs=(pl.BlockSpec(memory_space=pltpu.MemorySpace.VMEM),
                   pl.BlockSpec(memory_space=pltpu.MemorySpace.VMEM)),
    )(A, q0)


def _make_e0_kernel(d, D, k_steps):
    n = D * D

    def kernel(a_ref, h_ref, q_ref, e_ref, eig_ref, out_ref):
        # ---- hoist all SMEM scalar reads before any vector work ----
        hvals = [h_ref[idx] for idx in range(d ** 4)]
        ev = eig_ref[0]

        # ---- V = (e0_row @ Q) "reshaped" to (D, D) via selector matmuls ----
        qe = jnp.dot(e_ref[...], q_ref[...], preferred_element_type=DTYPE)   # (1, n)
        r_idx = lax.broadcasted_iota(jnp.int32, (D, n), 0)                   # row  0..D-1
        pr_idx = lax.broadcasted_iota(jnp.int32, (D, n), 1)                  # p    0..n-1
        lo = r_idx * D
        m1 = jnp.logical_and(pr_idx >= lo, pr_idx < lo + D).astype(DTYPE)    # (p//D == r)
        p2 = lax.broadcasted_iota(jnp.int32, (n, D), 0)
        m2 = lax.broadcasted_iota(jnp.int32, (n, D), 1)
        e_rep = jnp.zeros((n, D), DTYPE)
        for j in range(D):
            e_rep = e_rep + (p2 == m2 + j * D).astype(DTYPE)                 # (p%D == m)
        V = jnp.dot(m1 * qe, e_rep, preferred_element_type=DTYPE)            # V[i,m]=qe[i*D+m]
        # renormalize (Q is orthonormal only up to f32 Gram-Schmidt error)
        V = V * lax.rsqrt(jnp.maximum(jnp.sum(V * V), 1e-30))

        # ---- E0 numerator: sum_ab <T_ab, V (sum_cd h[abcd] T_cd) V^T>, ONE reduction ----
        Amats = [a_ref[a] for a in range(d)]
        T = [[jnp.dot(Amats[a], Amats[b], preferred_element_type=DTYPE)
              for b in range(d)] for a in range(d)]
        Z = jnp.zeros((D, D), DTYPE)
        for a in range(d):
            for b in range(d):
                R = jnp.zeros((D, D), DTYPE)
                for c in range(d):
                    for e in range(d):
                        R = R + hvals[((a * d + b) * d + c) * d + e] * T[c][e]
                VR = jnp.dot(V, R, preferred_element_type=DTYPE)
                W = lax.dot_general(VR, V, (((1,), (1,)), ((), ())),
                                    preferred_element_type=DTYPE)            # V R V^T
                Z = Z + T[a][b] * W
        total = jnp.sum(Z)
        out_ref[...] = jnp.full((1, 1), total / (ev * ev), dtype=out_ref.dtype)

    return kernel


def e0_contract(A, h_flat, Q, e_row, eigval):
    d, D, _ = A.shape
    k_steps = Q.shape[0]
    return pl.pallas_call(
        _make_e0_kernel(d, D, k_steps),
        out_shape=jax.ShapeDtypeStruct((1, 1), DTYPE),
        in_specs=[pl.BlockSpec(memory_space=pltpu.MemorySpace.VMEM),   # A (d, D, D)
                  pl.BlockSpec(memory_space=pltpu.MemorySpace.SMEM),   # h (d^4,)
                  pl.BlockSpec(memory_space=pltpu.MemorySpace.VMEM),   # Q (k, D^2)
                  pl.BlockSpec(memory_space=pltpu.MemorySpace.VMEM),   # e_row (1, k)
                  pl.BlockSpec(memory_space=pltpu.MemorySpace.SMEM)],  # eig (1,)
        out_specs=pl.BlockSpec(memory_space=pltpu.MemorySpace.VMEM),
    )(A, h_flat, Q, e_row, eigval)


# ------------------------------- glue / model ------------------------------

def build_h(g):
    """Nearest-neighbour TFIM Hamiltonian (TFIM.seth)."""
    h = np.zeros((2, 2, 2, 2), dtype=np.float64)
    h[0, 0, 0, 0] = h[1, 1, 1, 1] = -1.0
    h[0, 1, 0, 1] = h[1, 0, 1, 0] = 1.0
    for idx in [(1, 0, 0, 0), (0, 1, 0, 0), (1, 1, 0, 1), (0, 0, 0, 1),
                (0, 0, 1, 0), (1, 1, 1, 0), (0, 1, 1, 1), (1, 0, 1, 1)]:
        h[idx] = -g / 2.0
    return jnp.asarray(h, dtype=DTYPE)


def tfim_forward(A_param, h, q0, k):
    d, D, _ = A_param.shape
    # symmetrize A (as in the reference forward)
    A = 0.5 * (A_param + jnp.transpose(A_param, (0, 2, 1)))

    # fused kernel: Gong built in VMEM + k-step Lanczos of minus_Gong
    Q, T = lanczos_fused(A, q0, k)

    # TODO(synk): the k x k symmetric eigensolve of the Rayleigh-Ritz (Lanczos) matrix has
    # no Pallas equivalent; it stays in XLA (jnp.linalg.eigh).
    evals, evecs = jnp.linalg.eigh(T)
    eigval = evals[0]                          # smallest eigval of -Gong (= -lambda_max(Gong))
    e_row = evecs[:, 0][None, :]               # (1, k) Ritz coefficients of dominant vector

    E0 = e0_contract(A, h.reshape(-1), Q, e_row, eigval.reshape(1))
    return E0[0, 0]


if __name__ == "__main__":
    d, D, k, g = 2, 8, 16, 1.0
    key = jax.random.PRNGKey(0)
    kA, kq = jax.random.split(key)

    # deterministic "parameter": A = randn(d, D, D), symmetrized (TFIM.setparameters)
    A0 = jax.random.normal(kA, (d, D, D), dtype=DTYPE)
    A_param = 0.5 * (A0 + jnp.transpose(A0, (0, 2, 1)))
    h = build_h(g)

    # deterministic Lanczos start vector (reference uses torch.randn inside symeigLanczos)
    q0 = jax.random.normal(kq, (D * D,), dtype=DTYPE)
    q0 = (q0 / jnp.linalg.norm(q0)).reshape(1, D * D)

    fwd = jax.jit(functools.partial(tfim_forward, k=k))
    E0 = fwd(A_param, h, q0)
    jax.block_until_ready(E0)
    print("KERNEL_OK")
</pallas_src>

<mosaic_0001>
module attributes {stable_mosaic.version = 11 : i64} {
  func.func @kernel(%arg0: memref<2x8x8xf32, #tpu.memory_space<vmem>>, %arg1: memref<1x64xf32, #tpu.memory_space<vmem>>, %arg2: memref<16x64xf32, #tpu.memory_space<vmem>>, %arg3: memref<16x16xf32, #tpu.memory_space<vmem>>) attributes {dimension_semantics = [], scalar_prefetch = 0 : i64, scratch_operands = 0 : i64, tpu.core_type = #tpu.core_type<tc>} {
    %0 = tpu.iota {dimensions = array<i32: 0>} : vector<64x8xi32>
    %1 = tpu.iota {dimensions = array<i32: 1>} : vector<64x8xi32>
    %c8_i32 = arith.constant 8 : i32
    %2 = vector.broadcast %c8_i32 : i32 to vector<64x8xi32>
    %3 = arith.muli %1, %2 : vector<64x8xi32>
    %4 = arith.cmpi sge, %0, %3 : vector<64x8xi32>
    %c8_i32_0 = arith.constant 8 : i32
    %5 = vector.broadcast %c8_i32_0 : i32 to vector<64x8xi32>
    %6 = arith.addi %3, %5 : vector<64x8xi32>
    %7 = arith.cmpi slt, %0, %6 : vector<64x8xi32>
    %8 = arith.andi %4, %7 : vector<64x8xi1>
    %9 = arith.extui %8 : vector<64x8xi1> to vector<64x8xi32>
    %10 = arith.sitofp %9 : vector<64x8xi32> to vector<64x8xf32>
    %cst = arith.constant 0.000000e+00 : f32
    %11 = vector.broadcast %cst : f32 to vector<64x8xf32>
    %c0_i32 = arith.constant 0 : i32
    %12 = vector.broadcast %c0_i32 : i32 to vector<64x8xi32>
    %13 = arith.addi %1, %12 : vector<64x8xi32>
    %14 = arith.cmpi eq, %0, %13 : vector<64x8xi32>
    %15 = arith.extui %14 : vector<64x8xi1> to vector<64x8xi32>
    %16 = arith.sitofp %15 : vector<64x8xi32> to vector<64x8xf32>
    %17 = arith.addf %11, %16 : vector<64x8xf32>
    %c8_i32_1 = arith.constant 8 : i32
    %18 = vector.broadcast %c8_i32_1 : i32 to vector<64x8xi32>
    %19 = arith.addi %1, %18 : vector<64x8xi32>
    %20 = arith.cmpi eq, %0, %19 : vector<64x8xi32>
    %21 = arith.extui %20 : vector<64x8xi1> to vector<64x8xi32>
    %22 = arith.sitofp %21 : vector<64x8xi32> to vector<64x8xf32>
    %23 = arith.addf %17, %22 : vector<64x8xf32>
    %c16_i32 = arith.constant 16 : i32
    %24 = vector.broadcast %c16_i32 : i32 to vector<64x8xi32>
    %25 = arith.addi %1, %24 : vector<64x8xi32>
    %26 = arith.cmpi eq, %0, %25 : vector<64x8xi32>
    %27 = arith.extui %26 : vector<64x8xi1> to vector<64x8xi32>
    %28 = arith.sitofp %27 : vector<64x8xi32> to vector<64x8xf32>
    %29 = arith.addf %23, %28 : vector<64x8xf32>
    %c24_i32 = arith.constant 24 : i32
    %30 = vector.broadcast %c24_i32 : i32 to vector<64x8xi32>
    %31 = arith.addi %1, %30 : vector<64x8xi32>
    %32 = arith.cmpi eq, %0, %31 : vector<64x8xi32>
    %33 = arith.extui %32 : vector<64x8xi1> to vector<64x8xi32>
    %34 = arith.sitofp %33 : vector<64x8xi32> to vector<64x8xf32>
    %35 = arith.addf %29, %34 : vector<64x8xf32>
    %c32_i32 = arith.constant 32 : i32
    %36 = vector.broadcast %c32_i32 : i32 to vector<64x8xi32>
    %37 = arith.addi %1, %36 : vector<64x8xi32>
    %38 = arith.cmpi eq, %0, %37 : vector<64x8xi32>
    %39 = arith.extui %38 : vector<64x8xi1> to vector<64x8xi32>
    %40 = arith.sitofp %39 : vector<64x8xi32> to vector<64x8xf32>
    %41 = arith.addf %35, %40 : vector<64x8xf32>
    %c40_i32 = arith.constant 40 : i32
    %42 = vector.broadcast %c40_i32 : i32 to vector<64x8xi32>
    %43 = arith.addi %1, %42 : vector<64x8xi32>
    %44 = arith.cmpi eq, %0, %43 : vector<64x8xi32>
    %45 = arith.extui %44 : vector<64x8xi1> to vector<64x8xi32>
    %46 = arith.sitofp %45 : vector<64x8xi32> to vector<64x8xf32>
    %47 = arith.addf %41, %46 : vector<64x8xf32>
    %c48_i32 = arith.constant 48 : i32
    %48 = vector.broadcast %c48_i32 : i32 to vector<64x8xi32>
    %49 = arith.addi %1, %48 : vector<64x8xi32>
    %50 = arith.cmpi eq, %0, %49 : vector<64x8xi32>
    %51 = arith.extui %50 : vector<64x8xi1> to vector<64x8xi32>
    %52 = arith.sitofp %51 : vector<64x8xi32> to vector<64x8xf32>
    %53 = arith.addf %47, %52 : vector<64x8xf32>
    %c56_i32 = arith.constant 56 : i32
    %54 = vector.broadcast %c56_i32 : i32 to vector<64x8xi32>
    %55 = arith.addi %1, %54 : vector<64x8xi32>
    %56 = arith.cmpi eq, %0, %55 : vector<64x8xi32>
    %57 = arith.extui %56 : vector<64x8xi1> to vector<64x8xi32>
    %58 = arith.sitofp %57 : vector<64x8xi32> to vector<64x8xf32>
    %59 = arith.addf %53, %58 : vector<64x8xf32>
    %cst_2 = arith.constant 0.000000e+00 : f32
    %60 = vector.broadcast %cst_2 : f32 to vector<64x64xf32>
    %c0 = arith.constant 0 : index
    %c0_3 = arith.constant 0 : index
    %c0_4 = arith.constant 0 : index
    %61 = vector.load %arg0[%c0, %c0_3, %c0_4] : memref<2x8x8xf32, #tpu.memory_space<vmem>>, vector<1x8x8xf32>
    %62 = vector.shape_cast %61 : vector<1x8x8xf32> to vector<8x8xf32>
    %cst_5 = arith.constant dense<0.000000e+00> : vector<64x8xf32>
    %63 = tpu.matmul %10, %62, %cst_5 {dimension_numbers = #tpu.dot_dimension_numbers<[1], [0], [0], [1], [0, 0, 1, 1], [], []>} : vector<64x8xf32>, vector<8x8xf32>, vector<64x8xf32> -> vector<64x8xf32>
    %cst_6 = arith.constant dense<0.000000e+00> : vector<64x64xf32>
    %64 = tpu.matmul %63, %10, %cst_6 {dimension_numbers = #tpu.dot_dimension_numbers<[1], [1], [0], [0], [0, 0, 1, 0], [], []>} : vector<64x8xf32>, vector<64x8xf32>, vector<64x64xf32> -> vector<64x64xf32>
    %cst_7 = arith.constant dense<0.000000e+00> : vector<64x8xf32>
    %65 = tpu.matmul %59, %62, %cst_7 {dimension_numbers = #tpu.dot_dimension_numbers<[1], [0], [0], [1], [0, 0, 1, 1], [], []>} : vector<64x8xf32>, vector<8x8xf32>, vector<64x8xf32> -> vector<64x8xf32>
    %cst_8 = arith.constant dense<0.000000e+00> : vector<64x64xf32>
    %66 = tpu.matmul %65, %59, %cst_8 {dimension_numbers = #tpu.dot_dimension_numbers<[1], [1], [0], [0], [0, 0, 1, 0], [], []>} : vector<64x8xf32>, vector<64x8xf32>, vector<64x64xf32> -> vector<64x64xf32>
    %67 = arith.mulf %64, %66 : vector<64x64xf32>
    %68 = arith.addf %60, %67 : vector<64x64xf32>
    %c1 = arith.constant 1 : index
    %c0_9 = arith.constant 0 : index
    %c0_10 = arith.constant 0 : index
    %69 = vector.load %arg0[%c1, %c0_9, %c0_10] : memref<2x8x8xf32, #tpu.memory_space<vmem>>, vector<1x8x8xf32>
    %70 = vector.shape_cast %69 : vector<1x8x8xf32> to vector<8x8xf32>
    %cst_11 = arith.constant dense<0.000000e+00> : vector<64x8xf32>
    %71 = tpu.matmul %10, %70, %cst_11 {dimension_numbers = #tpu.dot_dimension_numbers<[1], [0], [0], [1], [0, 0, 1, 1], [], []>} : vector<64x8xf32>, vector<8x8xf32>, vector<64x8xf32> -> vector<64x8xf32>
    %cst_12 = arith.constant dense<0.000000e+00> : vector<64x64xf32>
    %72 = tpu.matmul %71, %10, %cst_12 {dimension_numbers = #tpu.dot_dimension_numbers<[1], [1], [0], [0], [0, 0, 1, 0], [], []>} : vector<64x8xf32>, vector<64x8xf32>, vector<64x64xf32> -> vector<64x64xf32>
    %cst_13 = arith.constant dense<0.000000e+00> : vector<64x8xf32>
    %73 = tpu.matmul %59, %70, %cst_13 {dimension_numbers = #tpu.dot_dimension_numbers<[1], [0], [0], [1], [0, 0, 1, 1], [], []>} : vector<64x8xf32>, vector<8x8xf32>, vector<64x8xf32> -> vector<64x8xf32>
    %cst_14 = arith.constant dense<0.000000e+00> : vector<64x64xf32>
    %74 = tpu.matmul %73, %59, %cst_14 {dimension_numbers = #tpu.dot_dimension_numbers<[1], [1], [0], [0], [0, 0, 1, 0], [], []>} : vector<64x8xf32>, vector<64x8xf32>, vector<64x64xf32> -> vector<64x64xf32>
    %75 = arith.mulf %72, %74 : vector<64x64xf32>
    %76 = arith.addf %68, %75 : vector<64x64xf32>
    %cst_15 = arith.constant 0.000000e+00 : f32
    %77 = vector.broadcast %cst_15 : f32 to vector<64x64xf32>
    %78 = arith.subf %77, %76 : vector<64x64xf32>
    %cst_16 = arith.constant 0.000000e+00 : f32
    %79 = vector.broadcast %cst_16 : f32 to vector<16x64xf32>
    %c0_17 = arith.constant 0 : index
    %c0_18 = arith.constant 0 : index
    %80 = vector.load %arg2[%c0_17, %c0_18] : memref<16x64xf32, #tpu.memory_space<vmem>>, vector<16x64xf32>
    tpu.vector_store %arg2[%c0_17, %c0_18], %79 {strides = array<i32>} : memref<16x64xf32, #tpu.memory_space<vmem>>, vector<16x64xf32>,
    %c0_19 = arith.constant 0 : index
    %c0_20 = arith.constant 0 : index
    %81 = vector.load %arg1[%c0_19, %c0_20] : memref<1x64xf32, #tpu.memory_space<vmem>>, vector<1x64xf32>
    %c0_21 = arith.constant 0 : index
    %c0_22 = arith.constant 0 : index
    %82 = vector.load %arg2[%c0_21, %c0_22] : memref<16x64xf32, #tpu.memory_space<vmem>>, vector<1x64xf32>
    tpu.vector_store %arg2[%c0_21, %c0_22], %81 {strides = array<i32>} : memref<16x64xf32, #tpu.memory_space<vmem>>, vector<1x64xf32>,
    %cst_23 = arith.constant dense<0.000000e+00> : vector<1x64xf32>
    %83 = tpu.matmul %81, %78, %cst_23 {dimension_numbers = #tpu.dot_dimension_numbers<[1], [0], [0], [1], [0, 0, 1, 1], [], []>} : vector<1x64xf32>, vector<64x64xf32>, vector<1x64xf32> -> vector<1x64xf32>
    %c0_24 = arith.constant 0 : index
    %c0_25 = arith.constant 0 : index
    %84 = vector.load %arg2[%c0_24, %c0_25] : memref<16x64xf32, #tpu.memory_space<vmem>>, vector<16x64xf32>
    %cst_26 = arith.constant dense<0.000000e+00> : vector<1x16xf32>
    %85 = tpu.matmul %83, %84, %cst_26 {dimension_numbers = #tpu.dot_dimension_numbers<[1], [1], [0], [0], [0, 0, 1, 0], [], []>} : vector<1x64xf32>, vector<16x64xf32>, vector<1x16xf32> -> vector<1x16xf32>
    %cst_27 = arith.constant dense<0.000000e+00> : vector<1x64xf32>
    %86 = tpu.matmul %85, %84, %cst_27 {dimension_numbers = #tpu.dot_dimension_numbers<[1], [0], [0], [1], [0, 0, 1, 1], [], []>} : vector<1x16xf32>, vector<16x64xf32>, vector<1x64xf32> -> vector<1x64xf32>
    %87 = arith.subf %83, %86 : vector<1x64xf32>
    %cst_28 = arith.constant dense<0.000000e+00> : vector<1x16xf32>
    %88 = tpu.matmul %87, %84, %cst_28 {dimension_numbers = #tpu.dot_dimension_numbers<[1], [1], [0], [0], [0, 0, 1, 0], [], []>} : vector<1x64xf32>, vector<16x64xf32>, vector<1x16xf32> -> vector<1x16xf32>
    %cst_29 = arith.constant dense<0.000000e+00> : vector<1x64xf32>
    %89 = tpu.matmul %88, %84, %cst_29 {dimension_numbers = #tpu.dot_dimension_numbers<[1], [0], [0], [1], [0, 0, 1, 1], [], []>} : vector<1x16xf32>, vector<16x64xf32>, vector<1x64xf32> -> vector<1x64xf32>
    %90 = arith.subf %87, %89 : vector<1x64xf32>
    %91 = arith.mulf %90, %90 : vector<1x64xf32>
    %92 = vector.shape_cast %91 : vector<1x64xf32> to vector<1x1x64xf32>
    %cst_30 = arith.constant dense<0.000000e+00> : vector<1xf32>
    %93 = vector.multi_reduction <add>, %92, %cst_30 [1, 2] : vector<1x1x64xf32> to vector<1xf32>
    %94 = vector.shape_cast %93 : vector<1xf32> to vector<1x1x1xf32>
    %95 = vector.extract %94[0, 0, 0] : f32 from vector<1x1x1xf32>
    %cst_31 = arith.constant 1.000000e-30 : f32
    %96 = arith.cmpf ogt, %95, %cst_31 : f32
    %97 = math.rsqrt %95 : f32
    %cst_32 = arith.constant 0.000000e+00 : f32
    %98 = arith.select %96, %97, %cst_32 : f32
    %99 = vector.broadcast %98 : f32 to vector<1x64xf32>
    %100 = arith.mulf %90, %99 : vector<1x64xf32>
    %c1_33 = arith.constant 1 : index
    %c0_34 = arith.constant 0 : index
    %101 = vector.load %arg2[%c1_33, %c0_34] : memref<16x64xf32, #tpu.memory_space<vmem>>, vector<1x64xf32>
    tpu.vector_store %arg2[%c1_33, %c0_34], %100 {strides = array<i32>} : memref<16x64xf32, #tpu.memory_space<vmem>>, vector<1x64xf32>,
    %cst_35 = arith.constant dense<0.000000e+00> : vector<1x64xf32>
    %102 = tpu.matmul %100, %78, %cst_35 {dimension_numbers = #tpu.dot_dimension_numbers<[1], [0], [0], [1], [0, 0, 1, 1], [], []>} : vector<1x64xf32>, vector<64x64xf32>, vector<1x64xf32> -> vector<1x64xf32>
    %c0_36 = arith.constant 0 : index
    %c0_37 = arith.constant 0 : index
    %103 = vector.load %arg2[%c0_36, %c0_37] : memref<16x64xf32, #tpu.memory_space<vmem>>, vector<16x64xf32>
    %cst_38 = arith.constant dense<0.000000e+00> : vector<1x16xf32>
    %104 = tpu.matmul %102, %103, %cst_38 {dimension_numbers = #tpu.dot_dimension_numbers<[1], [1], [0], [0], [0, 0, 1, 0], [], []>} : vector<1x64xf32>, vector<16x64xf32>, vector<1x16xf32> -> vector<1x16xf32>
    %cst_39 = arith.constant dense<0.000000e+00> : vector<1x64xf32>
    %105 = tpu.matmul %104, %103, %cst_39 {dimension_numbers = #tpu.dot_dimension_numbers<[1], [0], [0], [1], [0, 0, 1, 1], [], []>} : vector<1x16xf32>, vector<16x64xf32>, vector<1x64xf32> -> vector<1x64xf32>
    %106 = arith.subf %102, %105 : vector<1x64xf32>
    %cst_40 = arith.constant dense<0.000000e+00> : vector<1x16xf32>
    %107 = tpu.matmul %106, %103, %cst_40 {dimension_numbers = #tpu.dot_dimension_numbers<[1], [1], [0], [0], [0, 0, 1, 0], [], []>} : vector<1x64xf32>, vector<16x64xf32>, vector<1x16xf32> -> vector<1x16xf32>
    %cst_41 = arith.constant dense<0.000000e+00> : vector<1x64xf32>
    %108 = tpu.matmul %107, %103, %cst_41 {dimension_numbers = #tpu.dot_dimension_numbers<[1], [0], [0], [1], [0, 0, 1, 1], [], []>} : vector<1x16xf32>, vector<16x64xf32>, vector<1x64xf32> -> vector<1x64xf32>
    %109 = arith.subf %106, %108 : vector<1x64xf32>
    %110 = arith.mulf %109, %109 : vector<1x64xf32>
    %111 = vector.shape_cast %110 : vector<1x64xf32> to vector<1x1x64xf32>
    %cst_42 = arith.constant dense<0.000000e+00> : vector<1xf32>
    %112 = vector.multi_reduction <add>, %111, %cst_42 [1, 2] : vector<1x1x64xf32> to vector<1xf32>
    %113 = vector.shape_cast %112 : vector<1xf32> to vector<1x1x1xf32>
    %114 = vector.extract %113[0, 0, 0] : f32 from vector<1x1x1xf32>
    %cst_43 = arith.constant 1.000000e-30 : f32
    %115 = arith.cmpf ogt, %114, %cst_43 : f32
    %116 = math.rsqrt %114 : f32
    %cst_44 = arith.constant 0.000000e+00 : f32
    %117 = arith.select %115, %116, %cst_44 : f32
    %118 = vector.broadcast %117 : f32 to vector<1x64xf32>
    %119 = arith.mulf %109, %118 : vector<1x64xf32>
    %c2 = arith.constant 2 : index
    %c0_45 = arith.constant 0 : index
    %120 = vector.load %arg2[%c2, %c0_45] : memref<16x64xf32, #tpu.memory_space<vmem>>, vector<1x64xf32>
    tpu.vector_store %arg2[%c2, %c0_45], %119 {strides = array<i32>} : memref<16x64xf32, #tpu.memory_space<vmem>>, vector<1x64xf32>,
    %cst_46 = arith.constant dense<0.000000e+00> : vector<1x64xf32>
    %121 = tpu.matmul %119, %78, %cst_46 {dimension_numbers = #tpu.dot_dimension_numbers<[1], [0], [0], [1], [0, 0, 1, 1], [], []>} : vector<1x64xf32>, vector<64x64xf32>, vector<1x64xf32> -> vector<1x64xf32>
    %c0_47 = arith.constant 0 : index
    %c0_48 = arith.constant 0 : index
    %122 = vector.load %arg2[%c0_47, %c0_48] : memref<16x64xf32, #tpu.memory_space<vmem>>, vector<16x64xf32>
    %cst_49 = arith.constant dense<0.000000e+00> : vector<1x16xf32>
    %123 = tpu.matmul %121, %122, %cst_49 {dimension_numbers = #tpu.dot_dimension_numbers<[1], [1], [0], [0], [0, 0, 1, 0], [], []>} : vector<1x64xf32>, vector<16x64xf32>, vector<1x16xf32> -> vector<1x16xf32>
    %cst_50 = arith.constant dense<0.000000e+00> : vector<1x64xf32>
    %124 = tpu.matmul %123, %122, %cst_50 {dimension_numbers = #tpu.dot_dimension_numbers<[1], [0], [0], [1], [0, 0, 1, 1], [], []>} : vector<1x16xf32>, vector<16x64xf32>, vector<1x64xf32> -> vector<1x64xf32>
    %125 = arith.subf %121, %124 : vector<1x64xf32>
    %cst_51 = arith.constant dense<0.000000e+00> : vector<1x16xf32>
    %126 = tpu.matmul %125, %122, %cst_51 {dimension_numbers = #tpu.dot_dimension_numbers<[1], [1], [0], [0], [0, 0, 1, 0], [], []>} : vector<1x64xf32>, vector<16x64xf32>, vector<1x16xf32> -> vector<1x16xf32>
    %cst_52 = arith.constant dense<0.000000e+00> : vector<1x64xf32>
    %127 = tpu.matmul %126, %122, %cst_52 {dimension_numbers = #tpu.dot_dimension_numbers<[1], [0], [0], [1], [0, 0, 1, 1], [], []>} : vector<1x16xf32>, vector<16x64xf32>, vector<1x64xf32> -> vector<1x64xf32>
    %128 = arith.subf %125, %127 : vector<1x64xf32>
    %129 = arith.mulf %128, %128 : vector<1x64xf32>
    %130 = vector.shape_cast %129 : vector<1x64xf32> to vector<1x1x64xf32>
    %cst_53 = arith.constant dense<0.000000e+00> : vector<1xf32>
    %131 = vector.multi_reduction <add>, %130, %cst_53 [1, 2] : vector<1x1x64xf32> to vector<1xf32>
    %132 = vector.shape_cast %131 : vector<1xf32> to vector<1x1x1xf32>
    %133 = vector.extract %132[0, 0, 0] : f32 from vector<1x1x1xf32>
    %cst_54 = arith.constant 1.000000e-30 : f32
    %134 = arith.cmpf ogt, %133, %cst_54 : f32
    %135 = math.rsqrt %133 : f32
    %cst_55 = arith.constant 0.000000e+00 : f32
    %136 = arith.select %134, %135, %cst_55 : f32
    %137 = vector.broadcast %136 : f32 to vector<1x64xf32>
    %138 = arith.mulf %128, %137 : vector<1x64xf32>
    %c3 = arith.constant 3 : index
    %c0_56 = arith.constant 0 : index
    %139 = vector.load %arg2[%c3, %c0_56] : memref<16x64xf32, #tpu.memory_space<vmem>>, vector<1x64xf32>
    tpu.vector_store %arg2[%c3, %c0_56], %138 {strides = array<i32>} : memref<16x64xf32, #tpu.memory_space<vmem>>, vector<1x64xf32>,
    %cst_57 = arith.constant dense<0.000000e+00> : vector<1x64xf32>
    %140 = tpu.matmul %138, %78, %cst_57 {dimension_numbers = #tpu.dot_dimension_numbers<[1], [0], [0], [1], [0, 0, 1, 1], [], []>} : vector<1x64xf32>, vector<64x64xf32>, vector<1x64xf32> -> vector<1x64xf32>
    %c0_58 = arith.constant 0 : index
    %c0_59 = arith.constant 0 : index
    %141 = vector.load %arg2[%c0_58, %c0_59] : memref<16x64xf32, #tpu.memory_space<vmem>>, vector<16x64xf32>
    %cst_60 = arith.constant dense<0.000000e+00> : vector<1x16xf32>
    %142 = tpu.matmul %140, %141, %cst_60 {dimension_numbers = #tpu.dot_dimension_numbers<[1], [1], [0], [0], [0, 0, 1, 0], [], []>} : vector<1x64xf32>, vector<16x64xf32>, vector<1x16xf32> -> vector<1x16xf32>
    %cst_61 = arith.constant dense<0.000000e+00> : vector<1x64xf32>
    %143 = tpu.matmul %142, %141, %cst_61 {dimension_numbers = #tpu.dot_dimension_numbers<[1], [0], [0], [1], [0, 0, 1, 1], [], []>} : vector<1x16xf32>, vector<16x64xf32>, vector<1x64xf32> -> vector<1x64xf32>
    %144 = arith.subf %140, %143 : vector<1x64xf32>
    %cst_62 = arith.constant dense<0.000000e+00> : vector<1x16xf32>
    %145 = tpu.matmul %144, %141, %cst_62 {dimension_numbers = #tpu.dot_dimension_numbers<[1], [1], [0], [0], [0, 0, 1, 0], [], []>} : vector<1x64xf32>, vector<16x64xf32>, vector<1x16xf32> -> vector<1x16xf32>
    %cst_63 = arith.constant dense<0.000000e+00> : vector<1x64xf32>
    %146 = tpu.matmul %145, %141, %cst_63 {dimension_numbers = #tpu.dot_dimension_numbers<[1], [0], [0], [1], [0, 0, 1, 1], [], []>} : vector<1x16xf32>, vector<16x64xf32>, vector<1x64xf32> -> vector<1x64xf32>
    %147 = arith.subf %144, %146 : vector<1x64xf32>
    %148 = arith.mulf %147, %147 : vector<1x64xf32>
    %149 = vector.shape_cast %148 : vector<1x64xf32> to vector<1x1x64xf32>
    %cst_64 = arith.constant dense<0.000000e+00> : vector<1xf32>
    %150 = vector.multi_reduction <add>, %149, %cst_64 [1, 2] : vector<1x1x64xf32> to vector<1xf32>
    %151 = vector.shape_cast %150 : vector<1xf32> to vector<1x1x1xf32>
    %152 = vector.extract %151[0, 0, 0] : f32 from vector<1x1x1xf32>
    %cst_65 = arith.constant 1.000000e-30 : f32
    %153 = arith.cmpf ogt, %152, %cst_65 : f32
    %154 = math.rsqrt %152 : f32
    %cst_66 = arith.constant 0.000000e+00 : f32
    %155 = arith.select %153, %154, %cst_66 : f32
    %156 = vector.broadcast %155 : f32 to vector<1x64xf32>
    %157 = arith.mulf %147, %156 : vector<1x64xf32>
    %c4 = arith.constant 4 : index
    %c0_67 = arith.constant 0 : index
    %158 = vector.load %arg2[%c4, %c0_67] : memref<16x64xf32, #tpu.memory_space<vmem>>, vector<1x64xf32>
    tpu.vector_store %arg2[%c4, %c0_67], %157 {strides = array<i32>} : memref<16x64xf32, #tpu.memory_space<vmem>>, vector<1x64xf32>,
    %cst_68 = arith.constant dense<0.000000e+00> : vector<1x64xf32>
    %159 = tpu.matmul %157, %78, %cst_68 {dimension_numbers = #tpu.dot_dimension_numbers<[1], [0], [0], [1], [0, 0, 1, 1], [], []>} : vector<1x64xf32>, vector<64x64xf32>, vector<1x64xf32> -> vector<1x64xf32>
    %c0_69 = arith.constant 0 : index
    %c0_70 = arith.constant 0 : index
    %160 = vector.load %arg2[%c0_69, %c0_70] : memref<16x64xf32, #tpu.memory_space<vmem>>, vector<16x64xf32>
    %cst_71 = arith.constant dense<0.000000e+00> : vector<1x16xf32>
    %161 = tpu.matmul %159, %160, %cst_71 {dimension_numbers = #tpu.dot_dimension_numbers<[1], [1], [0], [0], [0, 0, 1, 0], [], []>} : vector<1x64xf32>, vector<16x64xf32>, vector<1x16xf32> -> vector<1x16xf32>
    %cst_72 = arith.constant dense<0.000000e+00> : vector<1x64xf32>
    %162 = tpu.matmul %161, %160, %cst_72 {dimension_numbers = #tpu.dot_dimension_numbers<[1], [0], [0], [1], [0, 0, 1, 1], [], []>} : vector<1x16xf32>, vector<16x64xf32>, vector<1x64xf32> -> vector<1x64xf32>
    %163 = arith.subf %159, %162 : vector<1x64xf32>
    %cst_73 = arith.constant dense<0.000000e+00> : vector<1x16xf32>
    %164 = tpu.matmul %163, %160, %cst_73 {dimension_numbers = #tpu.dot_dimension_numbers<[1], [1], [0], [0], [0, 0, 1, 0], [], []>} : vector<1x64xf32>, vector<16x64xf32>, vector<1x16xf32> -> vector<1x16xf32>
    %cst_74 = arith.constant dense<0.000000e+00> : vector<1x64xf32>
    %165 = tpu.matmul %164, %160, %cst_74 {dimension_numbers = #tpu.dot_dimension_numbers<[1], [0], [0], [1], [0, 0, 1, 1], [], []>} : vector<1x16xf32>, vector<16x64xf32>, vector<1x64xf32> -> vector<1x64xf32>
    %166 = arith.subf %163, %165 : vector<1x64xf32>
    %167 = arith.mulf %166, %166 : vector<1x64xf32>
    %168 = vector.shape_cast %167 : vector<1x64xf32> to vector<1x1x64xf32>
    %cst_75 = arith.constant dense<0.000000e+00> : vector<1xf32>
    %169 = vector.multi_reduction <add>, %168, %cst_75 [1, 2] : vector<1x1x64xf32> to vector<1xf32>
    %170 = vector.shape_cast %169 : vector<1xf32> to vector<1x1x1xf32>
    %171 = vector.extract %170[0, 0, 0] : f32 from vector<1x1x1xf32>
    %cst_76 = arith.constant 1.000000e-30 : f32
    %172 = arith.cmpf ogt, %171, %cst_76 : f32
    %173 = math.rsqrt %171 : f32
    %cst_77 = arith.constant 0.000000e+00 : f32
    %174 = arith.select %172, %173, %cst_77 : f32
    %175 = vector.broadcast %174 : f32 to vector<1x64xf32>
    %176 = arith.mulf %166, %175 : vector<1x64xf32>
    %c5 = arith.constant 5 : index
    %c0_78 = arith.constant 0 : index
    %177 = vector.load %arg2[%c5, %c0_78] : memref<16x64xf32, #tpu.memory_space<vmem>>, vector<1x64xf32>
    tpu.vector_store %arg2[%c5, %c0_78], %176 {strides = array<i32>} : memref<16x64xf32, #tpu.memory_space<vmem>>, vector<1x64xf32>,
    %cst_79 = arith.constant dense<0.000000e+00> : vector<1x64xf32>
    %178 = tpu.matmul %176, %78, %cst_79 {dimension_numbers = #tpu.dot_dimension_numbers<[1], [0], [0], [1], [0, 0, 1, 1], [], []>} : vector<1x64xf32>, vector<64x64xf32>, vector<1x64xf32> -> vector<1x64xf32>
    %c0_80 = arith.constant 0 : index
    %c0_81 = arith.constant 0 : index
    %179 = vector.load %arg2[%c0_80, %c0_81] : memref<16x64xf32, #tpu.memory_space<vmem>>, vector<16x64xf32>
    %cst_82 = arith.constant dense<0.000000e+00> : vector<1x16xf32>
    %180 = tpu.matmul %178, %179, %cst_82 {dimension_numbers = #tpu.dot_dimension_numbers<[1], [1], [0], [0], [0, 0, 1, 0], [], []>} : vector<1x64xf32>, vector<16x64xf32>, vector<1x16xf32> -> vector<1x16xf32>
    %cst_83 = arith.constant dense<0.000000e+00> : vector<1x64xf32>
    %181 = tpu.matmul %180, %179, %cst_83 {dimension_numbers = #tpu.dot_dimension_numbers<[1], [0], [0], [1], [0, 0, 1, 1], [], []>} : vector<1x16xf32>, vector<16x64xf32>, vector<1x64xf32> -> vector<1x64xf32>
    %182 = arith.subf %178, %181 : vector<1x64xf32>
    %cst_84 = arith.constant dense<0.000000e+00> : vector<1x16xf32>
    %183 = tpu.matmul %182, %179, %cst_84 {dimension_numbers = #tpu.dot_dimension_numbers<[1], [1], [0], [0], [0, 0, 1, 0], [], []>} : vector<1x64xf32>, vector<16x64xf32>, vector<1x16xf32> -> vector<1x16xf32>
    %cst_85 = arith.constant dense<0.000000e+00> : vector<1x64xf32>
    %184 = tpu.matmul %183, %179, %cst_85 {dimension_numbers = #tpu.dot_dimension_numbers<[1], [0], [0], [1], [0, 0, 1, 1], [], []>} : vector<1x16xf32>, vector<16x64xf32>, vector<1x64xf32> -> vector<1x64xf32>
    %185 = arith.subf %182, %184 : vector<1x64xf32>
    %186 = arith.mulf %185, %185 : vector<1x64xf32>
    %187 = vector.shape_cast %186 : vector<1x64xf32> to vector<1x1x64xf32>
    %cst_86 = arith.constant dense<0.000000e+00> : vector<1xf32>
    %188 = vector.multi_reduction <add>, %187, %cst_86 [1, 2] : vector<1x1x64xf32> to vector<1xf32>
    %189 = vector.shape_cast %188 : vector<1xf32> to vector<1x1x1xf32>
    %190 = vector.extract %189[0, 0, 0] : f32 from vector<1x1x1xf32>
    %cst_87 = arith.constant 1.000000e-30 : f32
    %191 = arith.cmpf ogt, %190, %cst_87 : f32
    %192 = math.rsqrt %190 : f32
    %cst_88 = arith.constant 0.000000e+00 : f32
    %193 = arith.select %191, %192, %cst_88 : f32
    %194 = vector.broadcast %193 : f32 to vector<1x64xf32>
    %195 = arith.mulf %185, %194 : vector<1x64xf32>
    %c6 = arith.constant 6 : index
    %c0_89 = arith.constant 0 : index
    %196 = vector.load %arg2[%c6, %c0_89] : memref<16x64xf32, #tpu.memory_space<vmem>>, vector<1x64xf32>
    tpu.vector_store %arg2[%c6, %c0_89], %195 {strides = array<i32>} : memref<16x64xf32, #tpu.memory_space<vmem>>, vector<1x64xf32>,
    %cst_90 = arith.constant dense<0.000000e+00> : vector<1x64xf32>
    %197 = tpu.matmul %195, %78, %cst_90 {dimension_numbers = #tpu.dot_dimension_numbers<[1], [0], [0], [1], [0, 0, 1, 1], [], []>} : vector<1x64xf32>, vector<64x64xf32>, vector<1x64xf32> -> vector<1x64xf32>
    %c0_91 = arith.constant 0 : index
    %c0_92 = arith.constant 0 : index
    %198 = vector.load %arg2[%c0_91, %c0_92] : memref<16x64xf32, #tpu.memory_space<vmem>>, vector<16x64xf32>
    %cst_93 = arith.constant dense<0.000000e+00> : vector<1x16xf32>
    %199 = tpu.matmul %197, %198, %cst_93 {dimension_numbers = #tpu.dot_dimension_numbers<[1], [1], [0], [0], [0, 0, 1, 0], [], []>} : vector<1x64xf32>, vector<16x64xf32>, vector<1x16xf32> -> vector<1x16xf32>
    %cst_94 = arith.constant dense<0.000000e+00> : vector<1x64xf32>
    %200 = tpu.matmul %199, %198, %cst_94 {dimension_numbers = #tpu.dot_dimension_numbers<[1], [0], [0], [1], [0, 0, 1, 1], [], []>} : vector<1x16xf32>, vector<16x64xf32>, vector<1x64xf32> -> vector<1x64xf32>
    %201 = arith.subf %197, %200 : vector<1x64xf32>
    %cst_95 = arith.constant dense<0.000000e+00> : vector<1x16xf32>
    %202 = tpu.matmul %201, %198, %cst_95 {dimension_numbers = #tpu.dot_dimension_numbers<[1], [1], [0], [0], [0, 0, 1, 0], [], []>} : vector<1x64xf32>, vector<16x64xf32>, vector<1x16xf32> -> vector<1x16xf32>
    %cst_96 = arith.constant dense<0.000000e+00> : vector<1x64xf32>
    %203 = tpu.matmul %202, %198, %cst_96 {dimension_numbers = #tpu.dot_dimension_numbers<[1], [0], [0], [1], [0, 0, 1, 1], [], []>} : vector<1x16xf32>, vector<16x64xf32>, vector<1x64xf32> -> vector<1x64xf32>
    %204 = arith.subf %201, %203 : vector<1x64xf32>
    %205 = arith.mulf %204, %204 : vector<1x64xf32>
    %206 = vector.shape_cast %205 : vector<1x64xf32> to vector<1x1x64xf32>
    %cst_97 = arith.constant dense<0.000000e+00> : vector<1xf32>
    %207 = vector.multi_reduction <add>, %206, %cst_97 [1, 2] : vector<1x1x64xf32> to vector<1xf32>
    %208 = vector.shape_cast %207 : vector<1xf32> to vector<1x1x1xf32>
    %209 = vector.extract %208[0, 0, 0] : f32 from vector<1x1x1xf32>
    %cst_98 = arith.constant 1.000000e-30 : f32
    %210 = arith.cmpf ogt, %209, %cst_98 : f32
    %211 = math.rsqrt %209 : f32
    %cst_99 = arith.constant 0.000000e+00 : f32
    %212 = arith.select %210, %211, %cst_99 : f32
    %213 = vector.broadcast %212 : f32 to vector<1x64xf32>
    %214 = arith.mulf %204, %213 : vector<1x64xf32>
    %c7 = arith.constant 7 : index
    %c0_100 = arith.constant 0 : index
    %215 = vector.load %arg2[%c7, %c0_100] : memref<16x64xf32, #tpu.memory_space<vmem>>, vector<1x64xf32>
    tpu.vector_store %arg2[%c7, %c0_100], %214 {strides = array<i32>} : memref<16x64xf32, #tpu.memory_space<vmem>>, vector<1x64xf32>,
    %cst_101 = arith.constant dense<0.000000e+00> : vector<1x64xf32>
    %216 = tpu.matmul %214, %78, %cst_101 {dimension_numbers = #tpu.dot_dimension_numbers<[1], [0], [0], [1], [0, 0, 1, 1], [], []>} : vector<1x64xf32>, vector<64x64xf32>, vector<1x64xf32> -> vector<1x64xf32>
    %c0_102 = arith.constant 0 : index
    %c0_103 = arith.constant 0 : index
    %217 = vector.load %arg2[%c0_102, %c0_103] : memref<16x64xf32, #tpu.memory_space<vmem>>, vector<16x64xf32>
    %cst_104 = arith.constant dense<0.000000e+00> : vector<1x16xf32>
    %218 = tpu.matmul %216, %217, %cst_104 {dimension_numbers = #tpu.dot_dimension_numbers<[1], [1], [0], [0], [0, 0, 1, 0], [], []>} : vector<1x64xf32>, vector<16x64xf32>, vector<1x16xf32> -> vector<1x16xf32>
    %cst_105 = arith.constant dense<0.000000e+00> : vector<1x64xf32>
    %219 = tpu.matmul %218, %217, %cst_105 {dimension_numbers = #tpu.dot_dimension_numbers<[1], [0], [0], [1], [0, 0, 1, 1], [], []>} : vector<1x16xf32>, vector<16x64xf32>, vector<1x64xf32> -> vector<1x64xf32>
    %220 = arith.subf %216, %219 : vector<1x64xf32>
    %cst_106 = arith.constant dense<0.000000e+00> : vector<1x16xf32>
    %221 = tpu.matmul %220, %217, %cst_106 {dimension_numbers = #tpu.dot_dimension_numbers<[1], [1], [0], [0], [0, 0, 1, 0], [], []>} : vector<1x64xf32>, vector<16x64xf32>, vector<1x16xf32> -> vector<1x16xf32>
    %cst_107 = arith.constant dense<0.000000e+00> : vector<1x64xf32>
    %222 = tpu.matmul %221, %217, %cst_107 {dimension_numbers = #tpu.dot_dimension_numbers<[1], [0], [0], [1], [0, 0, 1, 1], [], []>} : vector<1x16xf32>, vector<16x64xf32>, vector<1x64xf32> -> vector<1x64xf32>
    %223 = arith.subf %220, %222 : vector<1x64xf32>
    %224 = arith.mulf %223, %223 : vector<1x64xf32>
    %225 = vector.shape_cast %224 : vector<1x64xf32> to vector<1x1x64xf32>
    %cst_108 = arith.constant dense<0.000000e+00> : vector<1xf32>
    %226 = vector.multi_reduction <add>, %225, %cst_108 [1, 2] : vector<1x1x64xf32> to vector<1xf32>
    %227 = vector.shape_cast %226 : vector<1xf32> to vector<1x1x1xf32>
    %228 = vector.extract %227[0, 0, 0] : f32 from vector<1x1x1xf32>
    %cst_109 = arith.constant 1.000000e-30 : f32
    %229 = arith.cmpf ogt, %228, %cst_109 : f32
    %230 = math.rsqrt %228 : f32
    %cst_110 = arith.constant 0.000000e+00 : f32
    %231 = arith.select %229, %230, %cst_110 : f32
    %232 = vector.broadcast %231 : f32 to vector<1x64xf32>
    %233 = arith.mulf %223, %232 : vector<1x64xf32>
    %c8 = arith.constant 8 : index
    %c0_111 = arith.constant 0 : index
    %234 = vector.load %arg2[%c8, %c0_111] : memref<16x64xf32, #tpu.memory_space<vmem>>, vector<1x64xf32>
    tpu.vector_store %arg2[%c8, %c0_111], %233 {strides = array<i32>} : memref<16x64xf32, #tpu.memory_space<vmem>>, vector<1x64xf32>,
    %cst_112 = arith.constant dense<0.000000e+00> : vector<1x64xf32>
    %235 = tpu.matmul %233, %78, %cst_112 {dimension_numbers = #tpu.dot_dimension_numbers<[1], [0], [0], [1], [0, 0, 1, 1], [], []>} : vector<1x64xf32>, vector<64x64xf32>, vector<1x64xf32> -> vector<1x64xf32>
    %c0_113 = arith.constant 0 : index
    %c0_114 = arith.constant 0 : index
    %236 = vector.load %arg2[%c0_113, %c0_114] : memref<16x64xf32, #tpu.memory_space<vmem>>, vector<16x64xf32>
    %cst_115 = arith.constant dense<0.000000e+00> : vector<1x16xf32>
    %237 = tpu.matmul %235, %236, %cst_115 {dimension_numbers = #tpu.dot_dimension_numbers<[1], [1], [0], [0], [0, 0, 1, 0], [], []>} : vector<1x64xf32>, vector<16x64xf32>, vector<1x16xf32> -> vector<1x16xf32>
    %cst_116 = arith.constant dense<0.000000e+00> : vector<1x64xf32>
    %238 = tpu.matmul %237, %236, %cst_116 {dimension_numbers = #tpu.dot_dimension_numbers<[1], [0], [0], [1], [0, 0, 1, 1], [], []>} : vector<1x16xf32>, vector<16x64xf32>, vector<1x64xf32> -> vector<1x64xf32>
    %239 = arith.subf %235, %238 : vector<1x64xf32>
    %cst_117 = arith.constant dense<0.000000e+00> : vector<1x16xf32>
    %240 = tpu.matmul %239, %236, %cst_117 {dimension_numbers = #tpu.dot_dimension_numbers<[1], [1], [0], [0], [0, 0, 1, 0], [], []>} : vector<1x64xf32>, vector<16x64xf32>, vector<1x16xf32> -> vector<1x16xf32>
    %cst_118 = arith.constant dense<0.000000e+00> : vector<1x64xf32>
    %241 = tpu.matmul %240, %236, %cst_118 {dimension_numbers = #tpu.dot_dimension_numbers<[1], [0], [0], [1], [0, 0, 1, 1], [], []>} : vector<1x16xf32>, vector<16x64xf32>, vector<1x64xf32> -> vector<1x64xf32>
    %242 = arith.subf %239, %241 : vector<1x64xf32>
    %243 = arith.mulf %242, %242 : vector<1x64xf32>
    %244 = vector.shape_cast %243 : vector<1x64xf32> to vector<1x1x64xf32>
    %cst_119 = arith.constant dense<0.000000e+00> : vector<1xf32>
    %245 = vector.multi_reduction <add>, %244, %cst_119 [1, 2] : vector<1x1x64xf32> to vector<1xf32>
    %246 = vector.shape_cast %245 : vector<1xf32> to vector<1x1x1xf32>
    %247 = vector.extract %246[0, 0, 0] : f32 from vector<1x1x1xf32>
    %cst_120 = arith.constant 1.000000e-30 : f32
    %248 = arith.cmpf ogt, %247, %cst_120 : f32
    %249 = math.rsqrt %247 : f32
    %cst_121 = arith.constant 0.000000e+00 : f32
    %250 = arith.select %248, %249, %cst_121 : f32
    %251 = vector.broadcast %250 : f32 to vector<1x64xf32>
    %252 = arith.mulf %242, %251 : vector<1x64xf32>
    %c9 = arith.constant 9 : index
    %c0_122 = arith.constant 0 : index
    %253 = vector.load %arg2[%c9, %c0_122] : memref<16x64xf32, #tpu.memory_space<vmem>>, vector<1x64xf32>
    tpu.vector_store %arg2[%c9, %c0_122], %252 {strides = array<i32>} : memref<16x64xf32, #tpu.memory_space<vmem>>, vector<1x64xf32>,
    %cst_123 = arith.constant dense<0.000000e+00> : vector<1x64xf32>
    %254 = tpu.matmul %252, %78, %cst_123 {dimension_numbers = #tpu.dot_dimension_numbers<[1], [0], [0], [1], [0, 0, 1, 1], [], []>} : vector<1x64xf32>, vector<64x64xf32>, vector<1x64xf32> -> vector<1x64xf32>
    %c0_124 = arith.constant 0 : index
    %c0_125 = arith.constant 0 : index
    %255 = vector.load %arg2[%c0_124, %c0_125] : memref<16x64xf32, #tpu.memory_space<vmem>>, vector<16x64xf32>
    %cst_126 = arith.constant dense<0.000000e+00> : vector<1x16xf32>
    %256 = tpu.matmul %254, %255, %cst_126 {dimension_numbers = #tpu.dot_dimension_numbers<[1], [1], [0], [0], [0, 0, 1, 0], [], []>} : vector<1x64xf32>, vector<16x64xf32>, vector<1x16xf32> -> vector<1x16xf32>
    %cst_127 = arith.constant dense<0.000000e+00> : vector<1x64xf32>
    %257 = tpu.matmul %256, %255, %cst_127 {dimension_numbers = #tpu.dot_dimension_numbers<[1], [0], [0], [1], [0, 0, 1, 1], [], []>} : vector<1x16xf32>, vector<16x64xf32>, vector<1x64xf32> -> vector<1x64xf32>
    %258 = arith.subf %254, %257 : vector<1x64xf32>
    %cst_128 = arith.constant dense<0.000000e+00> : vector<1x16xf32>
    %259 = tpu.matmul %258, %255, %cst_128 {dimension_numbers = #tpu.dot_dimension_numbers<[1], [1], [0], [0], [0, 0, 1, 0], [], []>} : vector<1x64xf32>, vector<16x64xf32>, vector<1x16xf32> -> vector<1x16xf32>
    %cst_129 = arith.constant dense<0.000000e+00> : vector<1x64xf32>
    %260 = tpu.matmul %259, %255, %cst_129 {dimension_numbers = #tpu.dot_dimension_numbers<[1], [0], [0], [1], [0, 0, 1, 1], [], []>} : vector<1x16xf32>, vector<16x64xf32>, vector<1x64xf32> -> vector<1x64xf32>
    %261 = arith.subf %258, %260 : vector<1x64xf32>
    %262 = arith.mulf %261, %261 : vector<1x64xf32>
    %263 = vector.shape_cast %262 : vector<1x64xf32> to vector<1x1x64xf32>
    %cst_130 = arith.constant dense<0.000000e+00> : vector<1xf32>
    %264 = vector.multi_reduction <add>, %263, %cst_130 [1, 2] : vector<1x1x64xf32> to vector<1xf32>
    %265 = vector.shape_cast %264 : vector<1xf32> to vector<1x1x1xf32>
    %266 = vector.extract %265[0, 0, 0] : f32 from vector<1x1x1xf32>
    %cst_131 = arith.constant 1.000000e-30 : f32
    %267 = arith.cmpf ogt, %266, %cst_131 : f32
    %268 = math.rsqrt %266 : f32
    %cst_132 = arith.constant 0.000000e+00 : f32
    %269 = arith.select %267, %268, %cst_132 : f32
    %270 = vector.broadcast %269 : f32 to vector<1x64xf32>
    %271 = arith.mulf %261, %270 : vector<1x64xf32>
    %c10 = arith.constant 10 : index
    %c0_133 = arith.constant 0 : index
    %272 = vector.load %arg2[%c10, %c0_133] : memref<16x64xf32, #tpu.memory_space<vmem>>, vector<1x64xf32>
    tpu.vector_store %arg2[%c10, %c0_133], %271 {strides = array<i32>} : memref<16x64xf32, #tpu.memory_space<vmem>>, vector<1x64xf32>,
    %cst_134 = arith.constant dense<0.000000e+00> : vector<1x64xf32>
    %273 = tpu.matmul %271, %78, %cst_134 {dimension_numbers = #tpu.dot_dimension_numbers<[1], [0], [0], [1], [0, 0, 1, 1], [], []>} : vector<1x64xf32>, vector<64x64xf32>, vector<1x64xf32> -> vector<1x64xf32>
    %c0_135 = arith.constant 0 : index
    %c0_136 = arith.constant 0 : index
    %274 = vector.load %arg2[%c0_135, %c0_136] : memref<16x64xf32, #tpu.memory_space<vmem>>, vector<16x64xf32>
    %cst_137 = arith.constant dense<0.000000e+00> : vector<1x16xf32>
    %275 = tpu.matmul %273, %274, %cst_137 {dimension_numbers = #tpu.dot_dimension_numbers<[1], [1], [0], [0], [0, 0, 1, 0], [], []>} : vector<1x64xf32>, vector<16x64xf32>, vector<1x16xf32> -> vector<1x16xf32>
    %cst_138 = arith.constant dense<0.000000e+00> : vector<1x64xf32>
    %276 = tpu.matmul %275, %274, %cst_138 {dimension_numbers = #tpu.dot_dimension_numbers<[1], [0], [0], [1], [0, 0, 1, 1], [], []>} : vector<1x16xf32>, vector<16x64xf32>, vector<1x64xf32> -> vector<1x64xf32>
    %277 = arith.subf %273, %276 : vector<1x64xf32>
    %cst_139 = arith.constant dense<0.000000e+00> : vector<1x16xf32>
    %278 = tpu.matmul %277, %274, %cst_139 {dimension_numbers = #tpu.dot_dimension_numbers<[1], [1], [0], [0], [0, 0, 1, 0], [], []>} : vector<1x64xf32>, vector<16x64xf32>, vector<1x16xf32> -> vector<1x16xf32>
    %cst_140 = arith.constant dense<0.000000e+00> : vector<1x64xf32>
    %279 = tpu.matmul %278, %274, %cst_140 {dimension_numbers = #tpu.dot_dimension_numbers<[1], [0], [0], [1], [0, 0, 1, 1], [], []>} : vector<1x16xf32>, vector<16x64xf32>, vector<1x64xf32> -> vector<1x64xf32>
    %280 = arith.subf %277, %279 : vector<1x64xf32>
    %281 = arith.mulf %280, %280 : vector<1x64xf32>
    %282 = vector.shape_cast %281 : vector<1x64xf32> to vector<1x1x64xf32>
    %cst_141 = arith.constant dense<0.000000e+00> : vector<1xf32>
    %283 = vector.multi_reduction <add>, %282, %cst_141 [1, 2] : vector<1x1x64xf32> to vector<1xf32>
    %284 = vector.shape_cast %283 : vector<1xf32> to vector<1x1x1xf32>
    %285 = vector.extract %284[0, 0, 0] : f32 from vector<1x1x1xf32>
    %cst_142 = arith.constant 1.000000e-30 : f32
    %286 = arith.cmpf ogt, %285, %cst_142 : f32
    %287 = math.rsqrt %285 : f32
    %cst_143 = arith.constant 0.000000e+00 : f32
    %288 = arith.select %286, %287, %cst_143 : f32
    %289 = vector.broadcast %288 : f32 to vector<1x64xf32>
    %290 = arith.mulf %280, %289 : vector<1x64xf32>
    %c11 = arith.constant 11 : index
    %c0_144 = arith.constant 0 : index
    %291 = vector.load %arg2[%c11, %c0_144] : memref<16x64xf32, #tpu.memory_space<vmem>>, vector<1x64xf32>
    tpu.vector_store %arg2[%c11, %c0_144], %290 {strides = array<i32>} : memref<16x64xf32, #tpu.memory_space<vmem>>, vector<1x64xf32>,
    %cst_145 = arith.constant dense<0.000000e+00> : vector<1x64xf32>
    %292 = tpu.matmul %290, %78, %cst_145 {dimension_numbers = #tpu.dot_dimension_numbers<[1], [0], [0], [1], [0, 0, 1, 1], [], []>} : vector<1x64xf32>, vector<64x64xf32>, vector<1x64xf32> -> vector<1x64xf32>
    %c0_146 = arith.constant 0 : index
    %c0_147 = arith.constant 0 : index
    %293 = vector.load %arg2[%c0_146, %c0_147] : memref<16x64xf32, #tpu.memory_space<vmem>>, vector<16x64xf32>
    %cst_148 = arith.constant dense<0.000000e+00> : vector<1x16xf32>
    %294 = tpu.matmul %292, %293, %cst_148 {dimension_numbers = #tpu.dot_dimension_numbers<[1], [1], [0], [0], [0, 0, 1, 0], [], []>} : vector<1x64xf32>, vector<16x64xf32>, vector<1x16xf32> -> vector<1x16xf32>
    %cst_149 = arith.constant dense<0.000000e+00> : vector<1x64xf32>
    %295 = tpu.matmul %294, %293, %cst_149 {dimension_numbers = #tpu.dot_dimension_numbers<[1], [0], [0], [1], [0, 0, 1, 1], [], []>} : vector<1x16xf32>, vector<16x64xf32>, vector<1x64xf32> -> vector<1x64xf32>
    %296 = arith.subf %292, %295 : vector<1x64xf32>
    %cst_150 = arith.constant dense<0.000000e+00> : vector<1x16xf32>
    %297 = tpu.matmul %296, %293, %cst_150 {dimension_numbers = #tpu.dot_dimension_numbers<[1], [1], [0], [0], [0, 0, 1, 0], [], []>} : vector<1x64xf32>, vector<16x64xf32>, vector<1x16xf32> -> vector<1x16xf32>
    %cst_151 = arith.constant dense<0.000000e+00> : vector<1x64xf32>
    %298 = tpu.matmul %297, %293, %cst_151 {dimension_numbers = #tpu.dot_dimension_numbers<[1], [0], [0], [1], [0, 0, 1, 1], [], []>} : vector<1x16xf32>, vector<16x64xf32>, vector<1x64xf32> -> vector<1x64xf32>
    %299 = arith.subf %296, %298 : vector<1x64xf32>
    %300 = arith.mulf %299, %299 : vector<1x64xf32>
    %301 = vector.shape_cast %300 : vector<1x64xf32> to vector<1x1x64xf32>
    %cst_152 = arith.constant dense<0.000000e+00> : vector<1xf32>
    %302 = vector.multi_reduction <add>, %301, %cst_152 [1, 2] : vector<1x1x64xf32> to vector<1xf32>
    %303 = vector.shape_cast %302 : vector<1xf32> to vector<1x1x1xf32>
    %304 = vector.extract %303[0, 0, 0] : f32 from vector<1x1x1xf32>
    %cst_153 = arith.constant 1.000000e-30 : f32
    %305 = arith.cmpf ogt, %304, %cst_153 : f32
    %306 = math.rsqrt %304 : f32
    %cst_154 = arith.constant 0.000000e+00 : f32
    %307 = arith.select %305, %306, %cst_154 : f32
    %308 = vector.broadcast %307 : f32 to vector<1x64xf32>
    %309 = arith.mulf %299, %308 : vector<1x64xf32>
    %c12 = arith.constant 12 : index
    %c0_155 = arith.constant 0 : index
    %310 = vector.load %arg2[%c12, %c0_155] : memref<16x64xf32, #tpu.memory_space<vmem>>, vector<1x64xf32>
    tpu.vector_store %arg2[%c12, %c0_155], %309 {strides = array<i32>} : memref<16x64xf32, #tpu.memory_space<vmem>>, vector<1x64xf32>,
    %cst_156 = arith.constant dense<0.000000e+00> : vector<1x64xf32>
    %311 = tpu.matmul %309, %78, %cst_156 {dimension_numbers = #tpu.dot_dimension_numbers<[1], [0], [0], [1], [0, 0, 1, 1], [], []>} : vector<1x64xf32>, vector<64x64xf32>, vector<1x64xf32> -> vector<1x64xf32>
    %c0_157 = arith.constant 0 : index
    %c0_158 = arith.constant 0 : index
    %312 = vector.load %arg2[%c0_157, %c0_158] : memref<16x64xf32, #tpu.memory_space<vmem>>, vector<16x64xf32>
    %cst_159 = arith.constant dense<0.000000e+00> : vector<1x16xf32>
    %313 = tpu.matmul %311, %312, %cst_159 {dimension_numbers = #tpu.dot_dimension_numbers<[1], [1], [0], [0], [0, 0, 1, 0], [], []>} : vector<1x64xf32>, vector<16x64xf32>, vector<1x16xf32> -> vector<1x16xf32>
    %cst_160 = arith.constant dense<0.000000e+00> : vector<1x64xf32>
    %314 = tpu.matmul %313, %312, %cst_160 {dimension_numbers = #tpu.dot_dimension_numbers<[1], [0], [0], [1], [0, 0, 1, 1], [], []>} : vector<1x16xf32>, vector<16x64xf32>, vector<1x64xf32> -> vector<1x64xf32>
    %315 = arith.subf %311, %314 : vector<1x64xf32>
    %cst_161 = arith.constant dense<0.000000e+00> : vector<1x16xf32>
    %316 = tpu.matmul %315, %312, %cst_161 {dimension_numbers = #tpu.dot_dimension_numbers<[1], [1], [0], [0], [0, 0, 1, 0], [], []>} : vector<1x64xf32>, vector<16x64xf32>, vector<1x16xf32> -> vector<1x16xf32>
    %cst_162 = arith.constant dense<0.000000e+00> : vector<1x64xf32>
    %317 = tpu.matmul %316, %312, %cst_162 {dimension_numbers = #tpu.dot_dimension_numbers<[1], [0], [0], [1], [0, 0, 1, 1], [], []>} : vector<1x16xf32>, vector<16x64xf32>, vector<1x64xf32> -> vector<1x64xf32>
    %318 = arith.subf %315, %317 : vector<1x64xf32>
    %319 = arith.mulf %318, %318 : vector<1x64xf32>
    %320 = vector.shape_cast %319 : vector<1x64xf32> to vector<1x1x64xf32>
    %cst_163 = arith.constant dense<0.000000e+00> : vector<1xf32>
    %321 = vector.multi_reduction <add>, %320, %cst_163 [1, 2] : vector<1x1x64xf32> to vector<1xf32>
    %322 = vector.shape_cast %321 : vector<1xf32> to vector<1x1x1xf32>
    %323 = vector.extract %322[0, 0, 0] : f32 from vector<1x1x1xf32>
    %cst_164 = arith.constant 1.000000e-30 : f32
    %324 = arith.cmpf ogt, %323, %cst_164 : f32
    %325 = math.rsqrt %323 : f32
    %cst_165 = arith.constant 0.000000e+00 : f32
    %326 = arith.select %324, %325, %cst_165 : f32
    %327 = vector.broadcast %326 : f32 to vector<1x64xf32>
    %328 = arith.mulf %318, %327 : vector<1x64xf32>
    %c13 = arith.constant 13 : index
    %c0_166 = arith.constant 0 : index
    %329 = vector.load %arg2[%c13, %c0_166] : memref<16x64xf32, #tpu.memory_space<vmem>>, vector<1x64xf32>
    tpu.vector_store %arg2[%c13, %c0_166], %328 {strides = array<i32>} : memref<16x64xf32, #tpu.memory_space<vmem>>, vector<1x64xf32>,
    %cst_167 = arith.constant dense<0.000000e+00> : vector<1x64xf32>
    %330 = tpu.matmul %328, %78, %cst_167 {dimension_numbers = #tpu.dot_dimension_numbers<[1], [0], [0], [1], [0, 0, 1, 1], [], []>} : vector<1x64xf32>, vector<64x64xf32>, vector<1x64xf32> -> vector<1x64xf32>
    %c0_168 = arith.constant 0 : index
    %c0_169 = arith.constant 0 : index
    %331 = vector.load %arg2[%c0_168, %c0_169] : memref<16x64xf32, #tpu.memory_space<vmem>>, vector<16x64xf32>
    %cst_170 = arith.constant dense<0.000000e+00> : vector<1x16xf32>
    %332 = tpu.matmul %330, %331, %cst_170 {dimension_numbers = #tpu.dot_dimension_numbers<[1], [1], [0], [0], [0, 0, 1, 0], [], []>} : vector<1x64xf32>, vector<16x64xf32>, vector<1x16xf32> -> vector<1x16xf32>
    %cst_171 = arith.constant dense<0.000000e+00> : vector<1x64xf32>
    %333 = tpu.matmul %332, %331, %cst_171 {dimension_numbers = #tpu.dot_dimension_numbers<[1], [0], [0], [1], [0, 0, 1, 1], [], []>} : vector<1x16xf32>, vector<16x64xf32>, vector<1x64xf32> -> vector<1x64xf32>
    %334 = arith.subf %330, %333 : vector<1x64xf32>
    %cst_172 = arith.constant dense<0.000000e+00> : vector<1x16xf32>
    %335 = tpu.matmul %334, %331, %cst_172 {dimension_numbers = #tpu.dot_dimension_numbers<[1], [1], [0], [0], [0, 0, 1, 0], [], []>} : vector<1x64xf32>, vector<16x64xf32>, vector<1x16xf32> -> vector<1x16xf32>
    %cst_173 = arith.constant dense<0.000000e+00> : vector<1x64xf32>
    %336 = tpu.matmul %335, %331, %cst_173 {dimension_numbers = #tpu.dot_dimension_numbers<[1], [0], [0], [1], [0, 0, 1, 1], [], []>} : vector<1x16xf32>, vector<16x64xf32>, vector<1x64xf32> -> vector<1x64xf32>
    %337 = arith.subf %334, %336 : vector<1x64xf32>
    %338 = arith.mulf %337, %337 : vector<1x64xf32>
    %339 = vector.shape_cast %338 : vector<1x64xf32> to vector<1x1x64xf32>
    %cst_174 = arith.constant dense<0.000000e+00> : vector<1xf32>
    %340 = vector.multi_reduction <add>, %339, %cst_174 [1, 2] : vector<1x1x64xf32> to vector<1xf32>
    %341 = vector.shape_cast %340 : vector<1xf32> to vector<1x1x1xf32>
    %342 = vector.extract %341[0, 0, 0] : f32 from vector<1x1x1xf32>
    %cst_175 = arith.constant 1.000000e-30 : f32
    %343 = arith.cmpf ogt, %342, %cst_175 : f32
    %344 = math.rsqrt %342 : f32
    %cst_176 = arith.constant 0.000000e+00 : f32
    %345 = arith.select %343, %344, %cst_176 : f32
    %346 = vector.broadcast %345 : f32 to vector<1x64xf32>
    %347 = arith.mulf %337, %346 : vector<1x64xf32>
    %c14 = arith.constant 14 : index
    %c0_177 = arith.constant 0 : index
    %348 = vector.load %arg2[%c14, %c0_177] : memref<16x64xf32, #tpu.memory_space<vmem>>, vector<1x64xf32>
    tpu.vector_store %arg2[%c14, %c0_177], %347 {strides = array<i32>} : memref<16x64xf32, #tpu.memory_space<vmem>>, vector<1x64xf32>,
    %cst_178 = arith.constant dense<0.000000e+00> : vector<1x64xf32>
    %349 = tpu.matmul %347, %78, %cst_178 {dimension_numbers = #tpu.dot_dimension_numbers<[1], [0], [0], [1], [0, 0, 1, 1], [], []>} : vector<1x64xf32>, vector<64x64xf32>, vector<1x64xf32> -> vector<1x64xf32>
    %c0_179 = arith.constant 0 : index
    %c0_180 = arith.constant 0 : index
    %350 = vector.load %arg2[%c0_179, %c0_180] : memref<16x64xf32, #tpu.memory_space<vmem>>, vector<16x64xf32>
    %cst_181 = arith.constant dense<0.000000e+00> : vector<1x16xf32>
    %351 = tpu.matmul %349, %350, %cst_181 {dimension_numbers = #tpu.dot_dimension_numbers<[1], [1], [0], [0], [0, 0, 1, 0], [], []>} : vector<1x64xf32>, vector<16x64xf32>, vector<1x16xf32> -> vector<1x16xf32>
    %cst_182 = arith.constant dense<0.000000e+00> : vector<1x64xf32>
    %352 = tpu.matmul %351, %350, %cst_182 {dimension_numbers = #tpu.dot_dimension_numbers<[1], [0], [0], [1], [0, 0, 1, 1], [], []>} : vector<1x16xf32>, vector<16x64xf32>, vector<1x64xf32> -> vector<1x64xf32>
    %353 = arith.subf %349, %352 : vector<1x64xf32>
    %cst_183 = arith.constant dense<0.000000e+00> : vector<1x16xf32>
    %354 = tpu.matmul %353, %350, %cst_183 {dimension_numbers = #tpu.dot_dimension_numbers<[1], [1], [0], [0], [0, 0, 1, 0], [], []>} : vector<1x64xf32>, vector<16x64xf32>, vector<1x16xf32> -> vector<1x16xf32>
    %cst_184 = arith.constant dense<0.000000e+00> : vector<1x64xf32>
    %355 = tpu.matmul %354, %350, %cst_184 {dimension_numbers = #tpu.dot_dimension_numbers<[1], [0], [0], [1], [0, 0, 1, 1], [], []>} : vector<1x16xf32>, vector<16x64xf32>, vector<1x64xf32> -> vector<1x64xf32>
    %356 = arith.subf %353, %355 : vector<1x64xf32>
    %357 = arith.mulf %356, %356 : vector<1x64xf32>
    %358 = vector.shape_cast %357 : vector<1x64xf32> to vector<1x1x64xf32>
    %cst_185 = arith.constant dense<0.000000e+00> : vector<1xf32>
    %359 = vector.multi_reduction <add>, %358, %cst_185 [1, 2] : vector<1x1x64xf32> to vector<1xf32>
    %360 = vector.shape_cast %359 : vector<1xf32> to vector<1x1x1xf32>
    %361 = vector.extract %360[0, 0, 0] : f32 from vector<1x1x1xf32>
    %cst_186 = arith.constant 1.000000e-30 : f32
    %362 = arith.cmpf ogt, %361, %cst_186 : f32
    %363 = math.rsqrt %361 : f32
    %cst_187 = arith.constant 0.000000e+00 : f32
    %364 = arith.select %362, %363, %cst_187 : f32
    %365 = vector.broadcast %364 : f32 to vector<1x64xf32>
    %366 = arith.mulf %356, %365 : vector<1x64xf32>
    %c15 = arith.constant 15 : index
    %c0_188 = arith.constant 0 : index
    %367 = vector.load %arg2[%c15, %c0_188] : memref<16x64xf32, #tpu.memory_space<vmem>>, vector<1x64xf32>
    tpu.vector_store %arg2[%c15, %c0_188], %366 {strides = array<i32>} : memref<16x64xf32, #tpu.memory_space<vmem>>, vector<1x64xf32>,
    %c0_189 = arith.constant 0 : index
    %c0_190 = arith.constant 0 : index
    %368 = vector.load %arg2[%c0_189, %c0_190] : memref<16x64xf32, #tpu.memory_space<vmem>>, vector<16x64xf32>
    %cst_191 = arith.constant dense<0.000000e+00> : vector<16x64xf32>
    %369 = tpu.matmul %368, %78, %cst_191 {dimension_numbers = #tpu.dot_dimension_numbers<[1], [0], [0], [1], [0, 0, 1, 1], [], []>} : vector<16x64xf32>, vector<64x64xf32>, vector<16x64xf32> -> vector<16x64xf32>
    %cst_192 = arith.constant dense<0.000000e+00> : vector<16x16xf32>
    %370 = tpu.matmul %369, %368, %cst_192 {dimension_numbers = #tpu.dot_dimension_numbers<[1], [1], [0], [0], [0, 0, 1, 0], [], []>} : vector<16x64xf32>, vector<16x64xf32>, vector<16x16xf32> -> vector<16x16xf32>
    %c0_193 = arith.constant 0 : index
    %c0_194 = arith.constant 0 : index
    %371 = vector.load %arg3[%c0_193, %c0_194] : memref<16x16xf32, #tpu.memory_space<vmem>>, vector<16x16xf32>
    tpu.vector_store %arg3[%c0_193, %c0_194], %370 {strides = array<i32>} : memref<16x16xf32, #tpu.memory_space<vmem>>, vector<16x16xf32>,
    return
  }
}

module attributes {stable_mosaic.version = 11 : i64} {
  func.func @kernel(%arg0: memref<2x8x8xf32, #tpu.memory_space<vmem>>, %arg1: memref<16xf32, #tpu.memory_space<smem>>, %arg2: memref<16x64xf32, #tpu.memory_space<vmem>>, %arg3: memref<1x16xf32, #tpu.memory_space<vmem>>, %arg4: memref<1xf32, #tpu.memory_space<smem>>, %arg5: memref<1x1xf32, #tpu.memory_space<vmem>>) attributes {dimension_semantics = [], scalar_prefetch = 0 : i64, scratch_operands = 0 : i64, tpu.core_type = #tpu.core_type<tc>} {
    %c0 = arith.constant 0 : index
    %0 = memref.load %arg1[%c0] : memref<16xf32, #tpu.memory_space<smem>>
    %c1 = arith.constant 1 : index
    %1 = memref.load %arg1[%c1] : memref<16xf32, #tpu.memory_space<smem>>
    %c2 = arith.constant 2 : index
    %2 = memref.load %arg1[%c2] : memref<16xf32, #tpu.memory_space<smem>>
    %c3 = arith.constant 3 : index
    %3 = memref.load %arg1[%c3] : memref<16xf32, #tpu.memory_space<smem>>
    %c4 = arith.constant 4 : index
    %4 = memref.load %arg1[%c4] : memref<16xf32, #tpu.memory_space<smem>>
    %c5 = arith.constant 5 : index
    %5 = memref.load %arg1[%c5] : memref<16xf32, #tpu.memory_space<smem>>
    %c6 = arith.constant 6 : index
    %6 = memref.load %arg1[%c6] : memref<16xf32, #tpu.memory_space<smem>>
    %c7 = arith.constant 7 : index
    %7 = memref.load %arg1[%c7] : memref<16xf32, #tpu.memory_space<smem>>
    %c8 = arith.constant 8 : index
    %8 = memref.load %arg1[%c8] : memref<16xf32, #tpu.memory_space<smem>>
    %c9 = arith.constant 9 : index
    %9 = memref.load %arg1[%c9] : memref<16xf32, #tpu.memory_space<smem>>
    %c10 = arith.constant 10 : index
    %10 = memref.load %arg1[%c10] : memref<16xf32, #tpu.memory_space<smem>>
    %c11 = arith.constant 11 : index
    %11 = memref.load %arg1[%c11] : memref<16xf32, #tpu.memory_space<smem>>
    %c12 = arith.constant 12 : index
    %12 = memref.load %arg1[%c12] : memref<16xf32, #tpu.memory_space<smem>>
    %c13 = arith.constant 13 : index
    %13 = memref.load %arg1[%c13] : memref<16xf32, #tpu.memory_space<smem>>
    %c14 = arith.constant 14 : index
    %14 = memref.load %arg1[%c14] : memref<16xf32, #tpu.memory_space<smem>>
    %c15 = arith.constant 15 : index
    %15 = memref.load %arg1[%c15] : memref<16xf32, #tpu.memory_space<smem>>
    %c0_0 = arith.constant 0 : index
    %16 = memref.load %arg4[%c0_0] : memref<1xf32, #tpu.memory_space<smem>>
    %c0_1 = arith.constant 0 : index
    %c0_2 = arith.constant 0 : index
    %17 = vector.load %arg3[%c0_1, %c0_2] : memref<1x16xf32, #tpu.memory_space<vmem>>, vector<1x16xf32>
    %c0_3 = arith.constant 0 : index
    %c0_4 = arith.constant 0 : index
    %18 = vector.load %arg2[%c0_3, %c0_4] : memref<16x64xf32, #tpu.memory_space<vmem>>, vector<16x64xf32>
    %cst = arith.constant dense<0.000000e+00> : vector<1x64xf32>
    %19 = tpu.matmul %17, %18, %cst {dimension_numbers = #tpu.dot_dimension_numbers<[1], [0], [0], [1], [0, 0, 1, 1], [], []>} : vector<1x16xf32>, vector<16x64xf32>, vector<1x64xf32> -> vector<1x64xf32>
    %20 = tpu.iota {dimensions = array<i32: 0>} : vector<8x64xi32>
    %21 = tpu.iota {dimensions = array<i32: 1>} : vector<8x64xi32>
    %c8_i32 = arith.constant 8 : i32
    %22 = vector.broadcast %c8_i32 : i32 to vector<8x64xi32>
    %23 = arith.muli %20, %22 : vector<8x64xi32>
    %24 = arith.cmpi sge, %21, %23 : vector<8x64xi32>
    %c8_i32_5 = arith.constant 8 : i32
    %25 = vector.broadcast %c8_i32_5 : i32 to vector<8x64xi32>
    %26 = arith.addi %23, %25 : vector<8x64xi32>
    %27 = arith.cmpi slt, %21, %26 : vector<8x64xi32>
    %28 = arith.andi %24, %27 : vector<8x64xi1>
    %29 = arith.extui %28 : vector<8x64xi1> to vector<8x64xi32>
    %30 = arith.sitofp %29 : vector<8x64xi32> to vector<8x64xf32>
    %31 = tpu.iota {dimensions = array<i32: 0>} : vector<64x8xi32>
    %32 = tpu.iota {dimensions = array<i32: 1>} : vector<64x8xi32>
    %cst_6 = arith.constant 0.000000e+00 : f32
    %33 = vector.broadcast %cst_6 : f32 to vector<64x8xf32>
    %c0_i32 = arith.constant 0 : i32
    %34 = vector.broadcast %c0_i32 : i32 to vector<64x8xi32>
    %35 = arith.addi %32, %34 : vector<64x8xi32>
    %36 = arith.cmpi eq, %31, %35 : vector<64x8xi32>
    %37 = arith.extui %36 : vector<64x8xi1> to vector<64x8xi32>
    %38 = arith.sitofp %37 : vector<64x8xi32> to vector<64x8xf32>
    %39 = arith.addf %33, %38 : vector<64x8xf32>
    %c8_i32_7 = arith.constant 8 : i32
    %40 = vector.broadcast %c8_i32_7 : i32 to vector<64x8xi32>
    %41 = arith.addi %32, %40 : vector<64x8xi32>
    %42 = arith.cmpi eq, %31, %41 : vector<64x8xi32>
    %43 = arith.extui %42 : vector<64x8xi1> to vector<64x8xi32>
    %44 = arith.sitofp %43 : vector<64x8xi32> to vector<64x8xf32>
    %45 = arith.addf %39, %44 : vector<64x8xf32>
    %c16_i32 = arith.constant 16 : i32
    %46 = vector.broadcast %c16_i32 : i32 to vector<64x8xi32>
    %47 = arith.addi %32, %46 : vector<64x8xi32>
    %48 = arith.cmpi eq, %31, %47 : vector<64x8xi32>
    %49 = arith.extui %48 : vector<64x8xi1> to vector<64x8xi32>
    %50 = arith.sitofp %49 : vector<64x8xi32> to vector<64x8xf32>
    %51 = arith.addf %45, %50 : vector<64x8xf32>
    %c24_i32 = arith.constant 24 : i32
    %52 = vector.broadcast %c24_i32 : i32 to vector<64x8xi32>
    %53 = arith.addi %32, %52 : vector<64x8xi32>
    %54 = arith.cmpi eq, %31, %53 : vector<64x8xi32>
    %55 = arith.extui %54 : vector<64x8xi1> to vector<64x8xi32>
    %56 = arith.sitofp %55 : vector<64x8xi32> to vector<64x8xf32>
    %57 = arith.addf %51, %56 : vector<64x8xf32>
    %c32_i32 = arith.constant 32 : i32
    %58 = vector.broadcast %c32_i32 : i32 to vector<64x8xi32>
    %59 = arith.addi %32, %58 : vector<64x8xi32>
    %60 = arith.cmpi eq, %31, %59 : vector<64x8xi32>
    %61 = arith.extui %60 : vector<64x8xi1> to vector<64x8xi32>
    %62 = arith.sitofp %61 : vector<64x8xi32> to vector<64x8xf32>
    %63 = arith.addf %57, %62 : vector<64x8xf32>
    %c40_i32 = arith.constant 40 : i32
    %64 = vector.broadcast %c40_i32 : i32 to vector<64x8xi32>
    %65 = arith.addi %32, %64 : vector<64x8xi32>
    %66 = arith.cmpi eq, %31, %65 : vector<64x8xi32>
    %67 = arith.extui %66 : vector<64x8xi1> to vector<64x8xi32>
    %68 = arith.sitofp %67 : vector<64x8xi32> to vector<64x8xf32>
    %69 = arith.addf %63, %68 : vector<64x8xf32>
    %c48_i32 = arith.constant 48 : i32
    %70 = vector.broadcast %c48_i32 : i32 to vector<64x8xi32>
    %71 = arith.addi %32, %70 : vector<64x8xi32>
    %72 = arith.cmpi eq, %31, %71 : vector<64x8xi32>
    %73 = arith.extui %72 : vector<64x8xi1> to vector<64x8xi32>
    %74 = arith.sitofp %73 : vector<64x8xi32> to vector<64x8xf32>
    %75 = arith.addf %69, %74 : vector<64x8xf32>
    %c56_i32 = arith.constant 56 : i32
    %76 = vector.broadcast %c56_i32 : i32 to vector<64x8xi32>
    %77 = arith.addi %32, %76 : vector<64x8xi32>
    %78 = arith.cmpi eq, %31, %77 : vector<64x8xi32>
    %79 = arith.extui %78 : vector<64x8xi1> to vector<64x8xi32>
    %80 = arith.sitofp %79 : vector<64x8xi32> to vector<64x8xf32>
    %81 = arith.addf %75, %80 : vector<64x8xf32>
    %82 = vector.broadcast %19 : vector<1x64xf32> to vector<8x64xf32>
    %83 = arith.mulf %30, %82 : vector<8x64xf32>
    %cst_8 = arith.constant dense<0.000000e+00> : vector<8x8xf32>
    %84 = tpu.matmul %83, %81, %cst_8 {dimension_numbers = #tpu.dot_dimension_numbers<[1], [0], [0], [1], [0, 0, 1, 1], [], []>} : vector<8x64xf32>, vector<64x8xf32>, vector<8x8xf32> -> vector<8x8xf32>
    %85 = arith.mulf %84, %84 : vector<8x8xf32>
    %86 = vector.shape_cast %85 : vector<8x8xf32> to vector<1x8x8xf32>
    %cst_9 = arith.constant dense<0.000000e+00> : vector<1xf32>
    %87 = vector.multi_reduction <add>, %86, %cst_9 [1, 2] : vector<1x8x8xf32> to vector<1xf32>
    %88 = vector.shape_cast %87 : vector<1xf32> to vector<1x1x1xf32>
    %89 = vector.extract %88[0, 0, 0] : f32 from vector<1x1x1xf32>
    %cst_10 = arith.constant 1.000000e-30 : f32
    %90 = arith.maximumf %89, %cst_10 : f32
    %91 = math.rsqrt %90 : f32
    %92 = vector.broadcast %91 : f32 to vector<8x8xf32>
    %93 = arith.mulf %84, %92 : vector<8x8xf32>
    %c0_11 = arith.constant 0 : index
    %c0_12 = arith.constant 0 : index
    %c0_13 = arith.constant 0 : index
    %94 = vector.load %arg0[%c0_11, %c0_12, %c0_13] : memref<2x8x8xf32, #tpu.memory_space<vmem>>, vector<1x8x8xf32>
    %95 = vector.shape_cast %94 : vector<1x8x8xf32> to vector<8x8xf32>
    %c1_14 = arith.constant 1 : index
    %c0_15 = arith.constant 0 : index
    %c0_16 = arith.constant 0 : index
    %96 = vector.load %arg0[%c1_14, %c0_15, %c0_16] : memref<2x8x8xf32, #tpu.memory_space<vmem>>, vector<1x8x8xf32>
    %97 = vector.shape_cast %96 : vector<1x8x8xf32> to vector<8x8xf32>
    %cst_17 = arith.constant dense<0.000000e+00> : vector<8x8xf32>
    %98 = tpu.matmul %95, %95, %cst_17 {dimension_numbers = #tpu.dot_dimension_numbers<[1], [0], [0], [1], [0, 0, 1, 1], [], []>} : vector<8x8xf32>, vector<8x8xf32>, vector<8x8xf32> -> vector<8x8xf32>
    %cst_18 = arith.constant dense<0.000000e+00> : vector<8x8xf32>
    %99 = tpu.matmul %95, %97, %cst_18 {dimension_numbers = #tpu.dot_dimension_numbers<[1], [0], [0], [1], [0, 0, 1, 1], [], []>} : vector<8x8xf32>, vector<8x8xf32>, vector<8x8xf32> -> vector<8x8xf32>
    %cst_19 = arith.constant dense<0.000000e+00> : vector<8x8xf32>
    %100 = tpu.matmul %97, %95, %cst_19 {dimension_numbers = #tpu.dot_dimension_numbers<[1], [0], [0], [1], [0, 0, 1, 1], [], []>} : vector<8x8xf32>, vector<8x8xf32>, vector<8x8xf32> -> vector<8x8xf32>
    %cst_20 = arith.constant dense<0.000000e+00> : vector<8x8xf32>
    %101 = tpu.matmul %97, %97, %cst_20 {dimension_numbers = #tpu.dot_dimension_numbers<[1], [0], [0], [1], [0, 0, 1, 1], [], []>} : vector<8x8xf32>, vector<8x8xf32>, vector<8x8xf32> -> vector<8x8xf32>
    %cst_21 = arith.constant 0.000000e+00 : f32
    %102 = vector.broadcast %cst_21 : f32 to vector<8x8xf32>
    %cst_22 = arith.constant 0.000000e+00 : f32
    %103 = vector.broadcast %cst_22 : f32 to vector<8x8xf32>
    %104 = vector.broadcast %0 : f32 to vector<8x8xf32>
    %105 = arith.mulf %104, %98 : vector<8x8xf32>
    %106 = arith.addf %103, %105 : vector<8x8xf32>
    %107 = vector.broadcast %1 : f32 to vector<8x8xf32>
    %108 = arith.mulf %107, %99 : vector<8x8xf32>
    %109 = arith.addf %106, %108 : vector<8x8xf32>
    %110 = vector.broadcast %2 : f32 to vector<8x8xf32>
    %111 = arith.mulf %110, %100 : vector<8x8xf32>
    %112 = arith.addf %109, %111 : vector<8x8xf32>
    %113 = vector.broadcast %3 : f32 to vector<8x8xf32>
    %114 = arith.mulf %113, %101 : vector<8x8xf32>
    %115 = arith.addf %112, %114 : vector<8x8xf32>
    %cst_23 = arith.constant dense<0.000000e+00> : vector<8x8xf32>
    %116 = tpu.matmul %93, %115, %cst_23 {dimension_numbers = #tpu.dot_dimension_numbers<[1], [0], [0], [1], [0, 0, 1, 1], [], []>} : vector<8x8xf32>, vector<8x8xf32>, vector<8x8xf32> -> vector<8x8xf32>
    %cst_24 = arith.constant dense<0.000000e+00> : vector<8x8xf32>
    %117 = tpu.matmul %116, %93, %cst_24 {dimension_numbers = #tpu.dot_dimension_numbers<[1], [1], [0], [0], [0, 0, 1, 0], [], []>} : vector<8x8xf32>, vector<8x8xf32>, vector<8x8xf32> -> vector<8x8xf32>
    %118 = arith.mulf %98, %117 : vector<8x8xf32>
    %119 = arith.addf %102, %118 : vector<8x8xf32>
    %cst_25 = arith.constant 0.000000e+00 : f32
    %120 = vector.broadcast %cst_25 : f32 to vector<8x8xf32>
    %121 = vector.broadcast %4 : f32 to vector<8x8xf32>
    %122 = arith.mulf %121, %98 : vector<8x8xf32>
    %123 = arith.addf %120, %122 : vector<8x8xf32>
    %124 = vector.broadcast %5 : f32 to vector<8x8xf32>
    %125 = arith.mulf %124, %99 : vector<8x8xf32>
    %126 = arith.addf %123, %125 : vector<8x8xf32>
    %127 = vector.broadcast %6 : f32 to vector<8x8xf32>
    %128 = arith.mulf %127, %100 : vector<8x8xf32>
    %129 = arith.addf %126, %128 : vector<8x8xf32>
    %130 = vector.broadcast %7 : f32 to vector<8x8xf32>
    %131 = arith.mulf %130, %101 : vector<8x8xf32>
    %132 = arith.addf %129, %131 : vector<8x8xf32>
    %cst_26 = arith.constant dense<0.000000e+00> : vector<8x8xf32>
    %133 = tpu.matmul %93, %132, %cst_26 {dimension_numbers = #tpu.dot_dimension_numbers<[1], [0], [0], [1], [0, 0, 1, 1], [], []>} : vector<8x8xf32>, vector<8x8xf32>, vector<8x8xf32> -> vector<8x8xf32>
    %cst_27 = arith.constant dense<0.000000e+00> : vector<8x8xf32>
    %134 = tpu.matmul %133, %93, %cst_27 {dimension_numbers = #tpu.dot_dimension_numbers<[1], [1], [0], [0], [0, 0, 1, 0], [], []>} : vector<8x8xf32>, vector<8x8xf32>, vector<8x8xf32> -> vector<8x8xf32>
    %135 = arith.mulf %99, %134 : vector<8x8xf32>
    %136 = arith.addf %119, %135 : vector<8x8xf32>
    %cst_28 = arith.constant 0.000000e+00 : f32
    %137 = vector.broadcast %cst_28 : f32 to vector<8x8xf32>
    %138 = vector.broadcast %8 : f32 to vector<8x8xf32>
    %139 = arith.mulf %138, %98 : vector<8x8xf32>
    %140 = arith.addf %137, %139 : vector<8x8xf32>
    %141 = vector.broadcast %9 : f32 to vector<8x8xf32>
    %142 = arith.mulf %141, %99 : vector<8x8xf32>
    %143 = arith.addf %140, %142 : vector<8x8xf32>
    %144 = vector.broadcast %10 : f32 to vector<8x8xf32>
    %145 = arith.mulf %144, %100 : vector<8x8xf32>
    %146 = arith.addf %143, %145 : vector<8x8xf32>
    %147 = vector.broadcast %11 : f32 to vector<8x8xf32>
    %148 = arith.mulf %147, %101 : vector<8x8xf32>
    %149 = arith.addf %146, %148 : vector<8x8xf32>
    %cst_29 = arith.constant dense<0.000000e+00> : vector<8x8xf32>
    %150 = tpu.matmul %93, %149, %cst_29 {dimension_numbers = #tpu.dot_dimension_numbers<[1], [0], [0], [1], [0, 0, 1, 1], [], []>} : vector<8x8xf32>, vector<8x8xf32>, vector<8x8xf32> -> vector<8x8xf32>
    %cst_30 = arith.constant dense<0.000000e+00> : vector<8x8xf32>
    %151 = tpu.matmul %150, %93, %cst_30 {dimension_numbers = #tpu.dot_dimension_numbers<[1], [1], [0], [0], [0, 0, 1, 0], [], []>} : vector<8x8xf32>, vector<8x8xf32>, vector<8x8xf32> -> vector<8x8xf32>
    %152 = arith.mulf %100, %151 : vector<8x8xf32>
    %153 = arith.addf %136, %152 : vector<8x8xf32>
    %cst_31 = arith.constant 0.000000e+00 : f32
    %154 = vector.broadcast %cst_31 : f32 to vector<8x8xf32>
    %155 = vector.broadcast %12 : f32 to vector<8x8xf32>
    %156 = arith.mulf %155, %98 : vector<8x8xf32>
    %157 = arith.addf %154, %156 : vector<8x8xf32>
    %158 = vector.broadcast %13 : f32 to vector<8x8xf32>
    %159 = arith.mulf %158, %99 : vector<8x8xf32>
    %160 = arith.addf %157, %159 : vector<8x8xf32>
    %161 = vector.broadcast %14 : f32 to vector<8x8xf32>
    %162 = arith.mulf %161, %100 : vector<8x8xf32>
    %163 = arith.addf %160, %162 : vector<8x8xf32>
    %164 = vector.broadcast %15 : f32 to vector<8x8xf32>
    %165 = arith.mulf %164, %101 : vector<8x8xf32>
    %166 = arith.addf %163, %165 : vector<8x8xf32>
    %cst_32 = arith.constant dense<0.000000e+00> : vector<8x8xf32>
    %167 = tpu.matmul %93, %166, %cst_32 {dimension_numbers = #tpu.dot_dimension_numbers<[1], [0], [0], [1], [0, 0, 1, 1], [], []>} : vector<8x8xf32>, vector<8x8xf32>, vector<8x8xf32> -> vector<8x8xf32>
    %cst_33 = arith.constant dense<0.000000e+00> : vector<8x8xf32>
    %168 = tpu.matmul %167, %93, %cst_33 {dimension_numbers = #tpu.dot_dimension_numbers<[1], [1], [0], [0], [0, 0, 1, 0], [], []>} : vector<8x8xf32>, vector<8x8xf32>, vector<8x8xf32> -> vector<8x8xf32>
    %169 = arith.mulf %101, %168 : vector<8x8xf32>
    %170 = arith.addf %153, %169 : vector<8x8xf32>
    %171 = vector.shape_cast %170 : vector<8x8xf32> to vector<1x8x8xf32>
    %cst_34 = arith.constant dense<0.000000e+00> : vector<1xf32>
    %172 = vector.multi_reduction <add>, %171, %cst_34 [1, 2] : vector<1x8x8xf32> to vector<1xf32>
    %173 = vector.shape_cast %172 : vector<1xf32> to vector<1x1x1xf32>
    %174 = vector.extract %173[0, 0, 0] : f32 from vector<1x1x1xf32>
    %175 = arith.mulf %16, %16 : f32
    %176 = arith.divf %174, %175 : f32
    %177 = vector.broadcast %176 : f32 to vector<1x1xf32>
    %c0_35 = arith.constant 0 : index
    %c0_36 = arith.constant 0 : index
    %178 = vector.load %arg5[%c0_35, %c0_36] : memref<1x1xf32, #tpu.memory_space<vmem>>, vector<1x1xf32>
    tpu.vector_store %arg5[%c0_35, %c0_36], %177 {strides = array<i32>} : memref<1x1xf32, #tpu.memory_space<vmem>>, vector<1x1xf32>,
    return
  }
}

</mosaic_0001>

<bundles_post_ra>
// kernel: custom-call.2
= control target key start
LH: loop header
LB: loop body
LE: loop exit
PB: predicated region body
PF: predicated region fallthrough
CT: control target
= control target key end

     0   :  { %s2361_s30 = smov [#allocation0]   ;;  %s2721_s0 = inlined_call_operand.vmem [shape: f32[8,8], index: 0, kind: input, shape index: {}]   ;;  %s2722_s1 = inlined_call_operand.vmem [shape: f32[8,8], index: 1, kind: input, shape index: {}]   ;;  %s2723_s2 = inlined_call_operand.vmem [shape: f32[8,8], index: 2, kind: input, shape index: {}]   ;;  %s2724_s3 = inlined_call_operand.vmem [shape: f32[8,8], index: 3, kind: input, shape index: {}]   ;;  %s2725_s4 = inlined_call_operand.vmem [shape: f32[8], index: 4, kind: output, shape index: {0}]   ;;  %s2726_s5 = inlined_call_operand.vmem [shape: f32[8], index: 5, kind: output, shape index: {1}]   ;;  %s2727_s6 = inlined_call_operand.vmem [shape: f32[8,8], index: 6, kind: output, shape index: {2}]   ;;  %s2728_s7 = inlined_call_operand.vmem [shape: f32[8,8], index: 7, kind: output, shape index: {3}]   ;;  %s2729_s8 = inlined_call_operand.vmem [shape: f32[8,8], index: 8, kind: output, shape index: {4}]   ;;  %s2730_s9 = inlined_call_operand.vmem [shape: f32[8,8], index: 9, kind: output, shape index: {5}]  }
   0x1   :  { %s2365_s12 = smov %s2721_s0  }
   0x2 LB: > { %v54_v0 = vld [vmem:[%s2367_s12] sm:$0xff]  ;;  %s56_s12 = scalar_lea.vmem %s2367_s12, 8   ;;  %s2367_s12 = sphi %s2365_s12, %s56_s12   ;;  %s2363_s30 = sphi %s2361_s30, %s57_s30  }
   0x3   : > { %55 = vst [vmem:[%s2363_s30] sm:$0xff] %v54_v0  ;;  %s57_s30 = scalar_lea.vmem %s2363_s30, 8   ;;  %p51_p0 = scmp.gt.s32.totalorder %s56_s12, %s2721_s0 }
   0x4   :  { %s2369_s15 = smov (%p51_p0), [#allocation1]   ;;  %s2373_s18 = smov (%p51_p0), %s2722_s1  }
   0x5   :  { %53 = sbr.rel (!%p51_p0) target bundleno = 2 (0x2), region = 358 }
   0xa LB: > { %v110_v1 = vld [vmem:[%s2375_s18] sm:$0xff]  ;;  %s112_s18 = scalar_lea.vmem %s2375_s18, 8   ;;  %s2375_s18 = sphi %s2373_s18, %s112_s18   ;;  %s2371_s15 = sphi %s2369_s15, %s113_s15  }
   0xb   : > { %111 = vst [vmem:[%s2371_s15] sm:$0xff] %v110_v1  ;;  %s113_s15 = scalar_lea.vmem %s2371_s15, 8   ;;  %p107_p1 = scmp.gt.s32.totalorder %s112_s18, %s2722_s1 }
   0xc   :  { %s2377_s0 = smov (%p107_p1), [#allocation2]   ;;  %s2381_s23 = smov (%p107_p1), %s2723_s2  }
   0xd   :  { %109 = sbr.rel (!%p107_p1) target bundleno = 10 (0xa), region = 380 }
  0x12 LB: > { %v166_v2 = vld [vmem:[%s2383_s23] sm:$0xff]  ;;  %s168_s23 = scalar_lea.vmem %s2383_s23, 8   ;;  %s2383_s23 = sphi %s2381_s23, %s168_s23   ;;  %s2379_s0 = sphi %s2377_s0, %s169_s0  }
  0x13   : > { %167 = vst [vmem:[%s2379_s0] sm:$0xff] %v166_v2  ;;  %s169_s0 = scalar_lea.vmem %s2379_s0, 8   ;;  %p163_p2 = scmp.gt.s32.totalorder %s168_s23, %s2723_s2 }
  0x14   :  { %s2385_s1 = smov (%p163_p2), [#allocation3]   ;;  %s2389_s28 = smov (%p163_p2), %s2724_s3  }
  0x15   :  { %165 = sbr.rel (!%p163_p2) target bundleno = 18 (0x12), region = 402 }
  0x1a LB: > { %v222_v3 = vld [vmem:[%s2391_s28] sm:$0xff]  ;;  %s224_s28 = scalar_lea.vmem %s2391_s28, 8   ;;  %s2391_s28 = sphi %s2389_s28, %s224_s28   ;;  %s2387_s1 = sphi %s2385_s1, %s225_s1  }
  0x1b   : > { %223 = vst [vmem:[%s2387_s1] sm:$0xff] %v222_v3  ;;  %s225_s1 = scalar_lea.vmem %s2387_s1, 8   ;;  %p219_p3 = scmp.gt.s32.totalorder %s224_s28, %s2724_s3 }
  0x1c   :  { %s235_s2 = smov (%p219_p3), [#allocation12]  ;;  %v236_v4 = vld [vmem:[#allocation0] sm:$0xff] (%p219_p3)  ;;  %s238_s10 = smov (%p219_p3), [#allocation13]  ;;  %v239_v5 = vld [vmem:[#allocation1] sm:$0xff] (%p219_p3)  ;;  %v242_v6 = vld [vmem:[#allocation2] sm:$0xff] (%p219_p3)  ;;  %v252_v7 = vlaneseq (%p219_p3)  ;;  %v2433_v11 = vmov (%p219_p3), 0.0  }
  0x1d   :  { %221 = sbr.rel (!%p219_p3) target bundleno = 26 (0x1a), region = 424  ;;  %237 = vst [vmem:[%s235_s2] sm:$0xff] (%p219_p3), %v236_v4  ;;  %s241_s11 = smov (%p219_p3), [#allocation14] }
  0x1e   :  { %s244_s12 = smov (%p219_p3), [#allocation15]  ;;  %240 = vst [vmem:[%s238_s10] sm:$0xff] (%p219_p3), %v239_v5  ;;  %v2510_v9 = vand.u32 (%p219_p3), 127, %v252_v7  ;;  %v2512_v10 = vshrl.u32 (%p219_p3), %v252_v7, 7  ;;  %s251_s3 = smov (%p219_p3), [#allocation8] }
  0x1f   :  { %243 = vst [vmem:[%s241_s11] sm:$0xff] (%p219_p3), %v242_v6  ;;  %s264_s13 = smov (%p219_p3), [#allocation11]  ;;  %s1387_s14 = smov (%p219_p3), [#allocation12] }
  0x20   :  { %247 = vst [vmem:[#allocation8] sm:$0xff] (%p219_p3), %v2433_v11  ;;  %v254_v9 = vmov (%p219_p3), %v2510_v9  ;;  %v257_v10 = vmov (%p219_p3), %v2512_v10  ;;  %vm1391_vm2 = vcmp.lt.s32.totalorder (%p219_p3), %v2510_v9, 8  ;;  %s1404_s15 = smov (%p219_p3), [#allocation13]  ;;  %s1421_s16 = smov (%p219_p3), [#allocation14] }
  0x21   :  { %248 = vst [vmem:[#allocation9] sm:$0xff] (%p219_p3), %v2433_v11  ;;  %vm261_vm0 = vcmp.eq.s32.totalorder (%p219_p3), %v257_v10, %v254_v9  ;;  %v267_v9 = vmov (%p219_p3), %v2510_v9  ;;  %v270_v10 = vmov (%p219_p3), %v2512_v10  ;;  %s1438_s17 = smov (%p219_p3), [#allocation15] }
  0x22   :  { %v245_v8 = vld [vmem:[#allocation3] sm:$0xff]  ;;  %249 = vst [vmem:[#allocation10] sm:$0xff] %v2433_v11  ;;  %vm274_vm1 = vcmp.eq.s32.totalorder %v270_v10, %v267_v9  ;;  %v1383_v9 = vmov %v2510_v9  ;;  %v1386_v10 = vmov %v2512_v10 }
  0x23   :  { %246 = vst [vmem:[%s244_s12] sm:$0xff] %v245_v8  ;;  %v1400_v9 = vmov %v2510_v9  ;;  %v1403_v10 = vmov %v2512_v10  ;;  %vm1396_vm3 = vcmp.eq.s32.totalorder %v1386_v10, %v1383_v9 }
  0x24   :  { %250 = vst [vmem:[#allocation11] sm:$0xff] %v2433_v11  ;;  %v1393_v16 = vld [vmem:[%s1387_s14] sm:$0xff]  ;;  %v1417_v9 = vmov %v2510_v9  ;;  %v1420_v10 = vmov %v2512_v10 }
  0x25   :  { %v1410_v17 = vld [vmem:[%s1404_s15] sm:$0xff]  ;;  %v1394_v18 = vsel %vm1391_vm2, %v1393_v16, 0.0  ;;  %v1434_v9 = vmov %v2510_v9  ;;  %v1437_v10 = vmov %v2512_v10 }
  0x26   :  { %v1411_v19 = vsel %vm1391_vm2, %v1410_v17, 0.0  ;;  %v1427_v20 = vld [vmem:[%s1421_s16] sm:$0xff]  ;;  %v1395_v22 = vmul.f32 %v1394_v18, %v1394_v18  ;;  %vm1447_vm4 = vcmp.eq.s32.totalorder %v1437_v10, %v1434_v9 }
  0x27   :  { %v258_v12 = vld [vmem:[%s251_s3] sm:$0xff]  ;;  %v1412_v23 = vmul.f32 %v1411_v19, %v1411_v19  ;;  %v1428_v24 = vsel %vm1391_vm2, %v1427_v20, 0.0 }
  0x28   :  { %v262_v13 = vsel %vm261_vm0, 1.0, %v258_v12  ;;  %v1429_v26 = vmul.f32 %v1428_v24, %v1428_v24  ;;  %v1397_v29 = vsel %vm1396_vm3, 0.0, %v1395_v22 }
  0x29   :  { %263 = vst [vmem:[%s251_s3] sm:$0xff] %v262_v13  ;;  %v1414_v27 = vadd.f32 %v1412_v23, %v1395_v22  ;;  %v1413_v31 = vadd.f32 %v1412_v23, %v1397_v29 }
  0x2a   :  { %v1444_v21 = vld [vmem:[%s1438_s17] sm:$0xff] }
  0x2b   :  { %v271_v14 = vld [vmem:[%s264_s13] sm:$0xff]  ;;  %v1445_v25 = vsel %vm1391_vm2, %v1444_v21, 0.0  ;;  %v1431_v30 = vadd.f32 %v1429_v26, %v1414_v27  ;;  %v1430_v33 = vadd.f32 %v1429_v26, %v1413_v31 }
  0x2c   :  { %v275_v15 = vsel %vm274_vm1, 1.0, %v271_v14  ;;  %v1446_v28 = vmul.f32 %v1445_v25, %v1445_v25 }
  0x2d   :  { %276 = vst [vmem:[%s264_s13] sm:$0xff] %v275_v15 }
  0x2e   :  { %v1450_v32 = vadd.f32 %v1446_v28, %v1431_v30  ;;  %v1448_v34 = vsel %vm1447_vm4, 0.0, %v1446_v28 }
  0x2f   :  { %v1449_v35 = vadd.f32 %v1448_v34, %v1430_v33 }
  0x30   :  { %1451 = vadd.xlane.f32.xlu0 %v1450_v32 }
  0x38   :  { %1459 = vadd.xlane.f32.xlu0 %v1449_v35 }
  0xa3   :  { %v1452_v36 = vpop.xlane.xlu0 %1451 }
  0xa4   :  { %v1453_v37 = vrot.slane %v1452_v36, 4 }
  0xa6   :  { %v1454_v38 = vadd.f32 %v1453_v37, %v1452_v36 }
  0xa8   :  { %v1455_v39 = vrot.slane %v1454_v38, 2 }
  0xaa   :  { %v1456_v43 = vadd.f32 %v1455_v39, %v1454_v38 }
  0xab   :  { %v1460_v40 = vpop.xlane.xlu0 %1459 }
  0xac   :  { %v1461_v41 = vrot.slane %v1460_v40, 4  ;;  %v1457_v46 = vrot.slane %v1456_v43, 1 }
  0xae   :  { %v1462_v42 = vadd.f32 %v1461_v41, %v1460_v40  ;;  %v1458_v49 = vadd.f32 %v1457_v46, %v1456_v43 }
  0xb0   :  { %v1463_v44 = vrot.slane %v1462_v42, 2 }
  0xb2   :  { %v1464_v45 = vadd.f32 %v1463_v44, %v1462_v42 }
  0xb4   :  { %v1465_v47 = vrot.slane %v1464_v45, 1 }
  0xb6   :  { %v1466_v48 = vadd.f32 %v1465_v47, %v1464_v45 }
  0xb8   :  { %1642 = vpush %v1466_v48 }
  0xb9   :  { %1644 = vpush %v1458_v49 }
  0xe9   :  { %s1643_s18 = spop %1642 }
  0xea   :  { %s1645_s19 = spop %1644 }
  0xeb   :  { %s1469_s20 = smul.f32 1e-10, %s1645_s19 }
  0xed   :  { %p1470_p4 = scmp.le.f32.partialorder %s1643_s18, %s1469_s20 }
  0xee   :  { %s2535_s0 = smov (!%p1470_p4), 0  }
  0xef   :  { %1473 = sbr.rel (%p1470_p4) target bundleno = 897 (0x381), region = 440 }
  0xf4 LB: > { %s2540_s21 = smov 0   ;;  %s2395_s0 = sphi %s2535_s0, %s2731_s0  }
  0xf5 LB: >> { %s381_s22 = smov [#allocation12]  ;;  %v385_v9 = vmov %v2510_v9  ;;  %v388_v10 = vmov %v2512_v10  ;;  %s401_s23 = smov [#allocation13]  ;;  %s2399_s21 = sphi %s2540_s21, %s380_s21  }
  0xf6   : >> { %v405_v9 = vmov %v2510_v9  ;;  %v408_v10 = vmov %v2512_v10  ;;  %v389_v50 = vld [vmem:[%s381_s22] sm:$0xff]  ;;  %vm392_vm5 = vcmp.eq.s32.totalorder %v388_v10, %v385_v9  ;;  %s421_s24 = smov [#allocation15]  ;;  %s382_s25 = smov [#allocation16] }
  0xf7   : >> { %vm412_vm6 = vcmp.eq.s32.totalorder %v408_v10, %v405_v9  ;;  %v425_v9 = vmov %v2510_v9  ;;  %v428_v10 = vmov %v2512_v10  ;;  %v393_v51 = vsel %vm392_vm5, %v389_v50, 0.0  ;;  %v409_v52 = vld [vmem:[%s401_s23] sm:$0xff]  ;;  %s402_s1 = smov [#allocation17]  ;;  %s422_s26 = smov [#allocation18] }
  0xf8   : >> { %vm432_vm7 = vcmp.eq.s32.totalorder %v428_v10, %v425_v9  ;;  %v394_v53 = vrot.slane %v393_v51, 4  ;;  %v413_v54 = vsel %vm412_vm6, %v409_v52, 0.0  ;;  %v429_v55 = vld [vmem:[%s421_s24] sm:$0xff]  ;;  %s445_s27 = smov [#allocation17]  ;;  %s443_s28 = smov [#allocation16]  ;;  %v534_v9 = vmov %v2510_v9 }
  0xf9   : >> { %v414_v56 = vrot.slane %v413_v54, 4  ;;  %v433_v57 = vsel %vm432_vm7, %v429_v55, 0.0  ;;  %s447_s29 = smov [#allocation18]  ;;  %s522_s30 = smov [#allocation19]  ;;  %v537_v10 = vmov %v2512_v10 }
  0xfa   : >> { %v395_v58 = vadd.f32 %v394_v53, %v393_v51  ;;  %v434_v59 = vrot.slane %v433_v57, 4  ;;  %s524_s2 = smov [#allocation20]  ;;  %s441_s10 = smov [#allocation21] }
  0xfb   : >> { %v415_v60 = vadd.f32 %v414_v56, %v413_v54  ;;  %s442_s11 = smov [#allocation22]  ;;  %s526_s10 = smov %s441_s10 }
  0xfc   : >> { %v396_v61 = vrot.slane %v395_v58, 2  ;;  %v435_v62 = vadd.f32 %v434_v59, %v433_v57  ;;  %s528_s11 = smov %s442_s11  ;;  %s530_s12 = smov [#allocation21] }
  0xfd   : >> { %v416_v63 = vrot.slane %v415_v60, 2  ;;  %s545_s3 = smov [#allocation22]  ;;  %s543_s13 = smov [#allocation23] }
  0xfe   : >> { %v397_v0 = vadd.f32 %v396_v61, %v395_v58  ;;  %v436_v1 = vrot.slane %v435_v62, 2  ;;  %s558_s14 = smov [#allocation24]  ;;  %s560_s15 = smov [#allocation23] }
  0xff   : >> { %v417_v2 = vadd.f32 %v416_v63, %v415_v60  ;;  %s2560_s16 = smov [#allocation12]  ;;  %s2562_s17 = smov [#allocation13] }
 0x100   : >> { %v398_v3 = vrot.slane %v397_v0, 1  ;;  %v437_v4 = vadd.f32 %v436_v1, %v435_v62  ;;  %s2564_s18 = smov [#allocation14]  ;;  %s784_s19 = smov [#allocation23] }
 0x101   : >> { %v418_v5 = vrot.slane %v417_v2, 1  ;;  %s2566_s20 = smov [#allocation8]  ;;  %s2568_s22 = smov [#allocation9] }
 0x102   : >> { %v399_v6 = vadd.f32 %v398_v3, %v397_v0  ;;  %v438_v7 = vrot.slane %v437_v4, 1  ;;  %s2570_s23 = smov [#allocation15]  ;;  %s2572_s24 = smov [#allocation10] }
 0x103   : >> { %v419_v8 = vadd.f32 %v418_v5, %v417_v2  ;;  %s380_s21 = sadd.s32 1, %s2399_s21  }
 0x104   : >> { %400 = vst [vmem:[%s382_s25] sm:$0x1] %v399_v6  ;;  %v439_v11 = vadd.f32 %v438_v7, %v437_v4  ;;  %s562_s25 = smov [#allocation24]  ;;  %p377_p5 = scmp.ge.s32.totalorder %s380_s21, 15  }
 0x105   : >> { %420 = vst [vmem:[%s402_s1] sm:$0x1] %v419_v8  ;;  %s786_s1 = smov [#allocation24] }
 0x106   : >> { %440 = vst [vmem:[%s422_s26] sm:$0x1] %v439_v11  ;;  %s2576_s26 = smov [#allocation11] }
 0x10b   : >> { %v444_v19 = vld [vmem:[%s443_s28] sm:$0xff]  ;;  %s590_s28 = smov [#allocation22] }
 0x10c   : >> { %v2551_v12 = vld [vmem:[%s445_s27] sm:$0xff]  ;;  %v498_v43 = vand.u32 2147483647, %v444_v19  ;;  %s588_s27 = smov [#allocation21] }
 0x10d   : >> { %v450_v13 = vmul.f32 2.0, %v2551_v12  ;;  %v448_v20 = vld [vmem:[%s447_s29] sm:$0xff]  ;;  %v499_v51 = vand.u32 2147483647, %v2551_v12  ;;  %s2590_s29 = smov [#allocation14] }
 0x10e   : >> { %v449_v23 = vsub.f32 %v448_v20, %v444_v19  ;;  %v500_v44 = vand.u32 2147483647, %v448_v20 }
 0x10f   : >> { %2121 = vrcp.f32 %v450_v13  ;;  %v462_v16 = vand.u32 2147483648, %v450_v13  ;;  %vm456_vm8 = vweird.f32 %v450_v13  ;;  %v460_v18 = vand.u32 2147483647, %v450_v13 }
 0x110   : >> { %v501_v46 = vmin.f32 %v498_v43, %v500_v44 }
 0x111   : >> { %v463_v22 = vor.u32 1.1754944e-38, %v462_v16  ;;  %vm461_vm11 = vcmp.eq.f32.partialorder %v460_v18, 8.507059e+37  ;;  %v569_v16 = vld [vmem:[%s2562_s17] sm:$0xff] }
 0x112   : >> { %v502_v52 = vmul.f32 1.1920929e-08, %v501_v46 }
 0x114   : >> { %vm503_vm4 = vcmp.le.f32.partialorder %v499_v51, %v502_v52 }
 0x115   : >> { %v2122_v14 = vpop.eup %2121 }
 0x116   : >> { %v452_v15 = vmul.f32 %v2122_v14, %v450_v13  ;;  %vm457_vm9 = vweird.f32 %v2122_v14 }
 0x117   : >> { %vm458_vm10 = vmor %vm456_vm8, %vm457_vm9  ;;  %vm539_vm8 = vcmp.eq.s32.totalorder %v537_v10, %v534_v9  ;;  %v549_v9 = vmov %v2510_v9  ;;  %v552_v10 = vmov %v2512_v10 }
 0x118   : >> { %v453_v17 = vsub.f32 1.0, %v452_v15  ;;  %vm554_vm9 = vcmp.eq.s32.totalorder %v552_v10, %v549_v9  ;;  %v620_v9 = vmov %v2510_v9 }
 0x119   : >> { %v661_v9 = vmov %v2510_v9 }
 0x11a   : >> { %v454_v21 = vmul.f32 %v2122_v14, %v453_v17  ;;  %v570_v17 = vld [vmem:[%s2564_s18] sm:$0xff]  ;;  %v647_v9 = vmov %v2510_v9 }
 0x11c   : >> { %v455_v24 = vadd.f32 %v2122_v14, %v454_v21 }
 0x11e   : >> { %v459_v25 = vsel %vm458_vm10, %v2122_v14, %v455_v24  ;;  %v794_v24 = vld [vmem:[%s2572_s24] sm:$0xff]  ;;  %vm744_vm10 = vcmp.eq.s32.totalorder %v2512_v10, 0 }
 0x11f   : >> { %v464_v26 = vsel %vm461_vm11, %v463_v22, %v459_v25  ;;  %v568_v22 = vld [vmem:[%s2560_s16] sm:$0xff]  ;;  %vm756_vm11 = vcmp.eq.s32.totalorder %v2512_v10, 7  ;;  %v623_v10 = vmov %v2512_v10 }
 0x120   : >> { %v465_v27 = vmul.f32 %v464_v26, %v449_v23  ;;  %v571_v23 = vld [vmem:[%s2570_s23] sm:$0xff]  ;;  %v664_v10 = vmov %v2512_v10 }
 0x121   : >> { %v650_v10 = vmov %v2512_v10 }
 0x122   : >> { %v467_v28 = vmul.f32 %v465_v27, %v465_v27  ;;  %vm466_vm14 = vcmp.ge.f32.partialorder %v465_v27, 0.0 }
 0x124   : >> { %v468_v29 = vadd.f32 1.0, %v467_v28 }
 0x126   : >> { %2123 = vrsqrt.f32 %v468_v29  ;;  %vm476_vm12 = vcmp.eq.f32.partialorder %v468_v29, inf  ;;  %v479_v36 = vand.u32 2147483648, %v468_v29  ;;  %vm478_vm13 = vcmp.eq.f32.partialorder %v468_v29, 0.0 }
 0x12c   : >> { %v2124_v30 = vpop.eup %2123 }
 0x12d   : >> { %v470_v31 = vmul.f32 %v2124_v30, %v468_v29 }
 0x12f   : >> { %v471_v32 = vmul.f32 %v2124_v30, %v470_v31 }
 0x131   : >> { %v472_v33 = vmul.f32 0.5, %v471_v32 }
 0x133   : >> { %v473_v34 = vsub.f32 1.5, %v472_v33 }
 0x135   : >> { %v474_v35 = vmul.f32 %v2124_v30, %v473_v34 }
 0x137   : >> { %v475_v37 = vmul.f32 %v474_v35, %v468_v29 }
 0x139   : >> { %v477_v38 = vsel %vm476_vm12, %v468_v29, %v475_v37  ;;  %v795_v29 = vld [vmem:[%s2576_s26] sm:$0xff]  ;;  %vm628_vm12 = vcmp.eq.s32.totalorder %v623_v10, %v620_v9  ;;  %v634_v9 = vmov %v2510_v9  ;;  %v637_v10 = vmov %v2512_v10 }
 0x13a   : >> { %v480_v39 = vsel %vm478_vm13, %v479_v36, %v477_v38  ;;  %vm669_vm13 = vcmp.eq.s32.totalorder %v664_v10, %v661_v9 }
 0x13b   : >> { %v481_v40 = vxor.u32 2147483648, %v480_v39 }
 0x13d   : >> { %v482_v41 = vsel %vm466_vm14, %v480_v39, %v481_v40  ;;  %vm654_vm14 = vcmp.eq.s32.totalorder %v650_v10, %v647_v9 }
 0x13e   : >> { %v483_v42 = vadd.f32 %v482_v41, %v465_v27 }
 0x140   : >> { %2125 = vrcp.f32 %v483_v42  ;;  %v495_v48 = vand.u32 2147483648, %v483_v42  ;;  %vm489_vm15 = vweird.f32 %v483_v42  ;;  %v493_v50 = vand.u32 2147483647, %v483_v42 }
 0x142   : >> { %v496_v54 = vor.u32 1.1754944e-38, %v495_v48  ;;  %vm494_vm3 = vcmp.eq.f32.partialorder %v493_v50, 8.507059e+37 }
 0x146   : >> { %v2126_v45 = vpop.eup %2125 }
 0x147   : >> { %v485_v47 = vmul.f32 %v2126_v45, %v483_v42  ;;  %vm490_vm0 = vweird.f32 %v2126_v45 }
 0x148   : >> { %vm491_vm1 = vmor %vm489_vm15, %vm490_vm0  ;;  %vm641_vm15 = vcmp.eq.s32.totalorder %v637_v10, %v634_v9  ;;  %vm700_vm0 = vcmp.eq.s32.totalorder %v2510_v9, 7  ;;  %v284_v10 = vmov (%p377_p5), %v2512_v10 }
 0x149   : >> { %v486_v49 = vsub.f32 1.0, %v485_v47 }
 0x14b   : >> { %v487_v53 = vmul.f32 %v2126_v45, %v486_v49 }
 0x14d   : >> { %v488_v55 = vadd.f32 %v2126_v45, %v487_v53 }
 0x14f   : >> { %v492_v56 = vsel %vm491_vm1, %v2126_v45, %v488_v55  ;;  %vm683_vm1 = vcmp.eq.s32.totalorder %v2510_v9, 0 }
 0x150   : >> { %v497_v57 = vsel %vm494_vm3, %v496_v54, %v492_v56  ;;  %vm687_vm3 = vcmp.eq.s32.totalorder %v2510_v9, 1  ;;  %v281_v9 = vmov (%p377_p5), %v2510_v9 }
 0x151   : >> { %v504_v58 = vsel %vm503_vm4, 0.0, %v497_v57  ;;  %vm296_vm4 = vcmp.eq.s32.totalorder (%p377_p5), %v284_v10, %v281_v9  ;;  %v300_v9 = vmov (%p377_p5), %v2510_v9  ;;  %v303_v10 = vmov (%p377_p5), %v2512_v10 }
 0x152   : >> { %v505_v59 = vmul.f32 %v504_v58, %v504_v58  ;;  %v518_v60 = vmul.f32 %v504_v58, %v2551_v12  ;;  %v317_v9 = vmov (%p377_p5), %v2510_v9  ;;  %v320_v10 = vmov (%p377_p5), %v2512_v10 }
 0x153   : > { %v334_v9 = vmov (%p377_p5), %v2510_v9  ;;  %v337_v10 = vmov (%p377_p5), %v2512_v10 }
 0x154   : >> { %v506_v61 = vadd.f32 1.0, %v505_v59  ;;  %v519_v62 = vsub.f32 %v444_v19, %v518_v60  ;;  %v521_v63 = vadd.f32 %v518_v60, %v448_v20  ;;  %v792_v19 = vld [vmem:[%s2566_s20] sm:$0xff] }
 0x155   : >> { %v793_v20 = vld [vmem:[%s2568_s22] sm:$0xff] }
 0x156   : >> { %2127 = vrsqrt.f32 %v506_v61  ;;  %523 = vst [vmem:[%s522_s30] sm:$0xff] %v519_v62  ;;  %vm513_vm5 = vweird.f32 %v506_v61  ;;  %s2592_s30 = smov [#allocation13] }
 0x157   : >> { %525 = vst [vmem:[%s524_s2] sm:$0xff] %v521_v63  ;;  %s812_s2 = smov [#allocation8] }
 0x15c   : >> { %v2128_v0 = vpop.eup %2127 }
 0x15d   : >> { %v508_v1 = vmul.f32 %v2128_v0, %v506_v61  ;;  %vm514_vm6 = vweird.f32 %v2128_v0 }
 0x15e   : >> { %vm515_vm7 = vmor %vm513_vm5, %vm514_vm6  ;;  %vm349_vm5 = vcmp.eq.s32.totalorder (%p377_p5), %v337_v10, %v334_v9 }
 0x15f   : >> { %v509_v2 = vmul.f32 %v2128_v0, %v508_v1 }
 0x161   : >> { %v510_v3 = vmul.f32 0.5, %v509_v2 }
 0x163   : >> { %v511_v4 = vsub.f32 1.5, %v510_v3 }
 0x165   : >> { %v512_v5 = vmul.f32 %v2128_v0, %v511_v4 }
 0x167   : >> { %v516_v6 = vsel %vm515_vm7, %v2128_v0, %v512_v5 }
 0x168   : >> { %527 = vst [vmem:[%s526_s10] sm:$0xff] %v516_v6  ;;  %v517_v7 = vmul.f32 %v516_v6, %v504_v58  ;;  %s813_s10 = smov [#allocation10] }
 0x16a   : >> { %529 = vst [vmem:[%s528_s11] sm:$0xff] %v517_v7  ;;  %s2596_s11 = smov [#allocation9] }
 0x16f   : >> { %v531_v8 = vld [vmem:[%s530_s12] ss:$0 sm:$0xff]  ;;  %s2598_s12 = smov [#allocation11] }
 0x170   : >> { %v540_v11 = vsel %vm539_vm8, %v531_v8, 0.0  ;;  %v589_v52 = vld [vmem:[%s588_s27] ss:$0 sm:$0xff]  ;;  %s737_s27 = smov [#allocation14] }
 0x171   : >> { %541 = vadd.xlane.f32.xlu0 %v540_v11  ;;  %v546_v12 = vld [vmem:[%s545_s3] ss:$0 sm:$0xff]  ;;  %s2603_s3 = smov [#allocation12] }
 0x172   : >> { %v555_v13 = vsel %vm554_vm9, %v546_v12, 0.0  ;;  %v591_v53 = vld [vmem:[%s590_s28] ss:$0 sm:$0xff]  ;;  %s736_s28 = smov [#allocation12] }
 0x179   : >> { %556 = vadd.xlane.f32.xlu0 %v555_v13 }
 0x1e4   : >> { %v542_v14 = vpop.xlane.xlu0 %541 }
 0x1e5   : >> { %544 = vst [vmem:[%s543_s13] sm:$0xff] %v542_v14  ;;  %s595_s13 = smov [#allocation15] }
 0x1ec   : >> { %v557_v15 = vpop.xlane.xlu0 %556  ;;  %v561_v18 = vld [vmem:[%s560_s15] sm:$0xff]  ;;  %s658_s15 = smov [#allocation20] }
 0x1ed   : >> { %559 = vst [vmem:[%s558_s14] sm:$0xff] %v557_v15  ;;  %v785_v21 = vld [vmem:[%s784_s19] sm:$0xff]  ;;  %v575_v25 = vmul.f32 %v569_v16, %v561_v18  ;;  %v579_v26 = vmul.f32 %v570_v17, %v561_v18  ;;  %v572_v46 = vmul.f32 %v568_v22, %v561_v18  ;;  %v582_v48 = vmul.f32 %v571_v23, %v561_v18  ;;  %s617_s14 = smov [#allocation19]  ;;  %s631_s19 = smov [#allocation13] }
 0x1ee   : >> { %v796_v30 = vmul.f32 %v792_v19, %v785_v21  ;;  %v799_v31 = vmul.f32 %v793_v20, %v785_v21  ;;  %v803_v38 = vmul.f32 %v794_v24, %v785_v21  ;;  %v806_v42 = vmul.f32 %v795_v29, %v785_v21 }
 0x1f4   : >> { %v563_v27 = vld [vmem:[%s562_s25] sm:$0xff]  ;;  %s673_s25 = smov [#allocation13] }
 0x1f5   : >> { %v787_v28 = vld [vmem:[%s786_s1] sm:$0xff]  ;;  %v576_v32 = vmul.f32 %v571_v23, %v563_v27  ;;  %v578_v33 = vmul.f32 %v568_v22, %v563_v27  ;;  %v573_v39 = vmul.f32 %v570_v17, %v563_v27  ;;  %v581_v43 = vmul.f32 %v569_v16, %v563_v27  ;;  %s2435_s1 = smov 127  }
 0x1f6   : >> { %v797_v34 = vmul.f32 %v794_v24, %v787_v28  ;;  %v800_v35 = vmul.f32 %v795_v29, %v787_v28  ;;  %v802_v36 = vmul.f32 %v792_v19, %v787_v28  ;;  %v805_v37 = vmul.f32 %v793_v20, %v787_v28  ;;  %v624_v22 = vld [vmem:[%s617_s14] ss:$0 sm:$0xff] }
 0x1f7   : >> { %v577_v40 = vsub.f32 %v575_v25, %v576_v32  ;;  %v580_v41 = vadd.f32 %v579_v26, %v578_v33  ;;  %v574_v50 = vsub.f32 %v572_v46, %v573_v39  ;;  %v583_v51 = vadd.f32 %v582_v48, %v581_v43  ;;  %v665_v23 = vld [vmem:[%s658_s15] ss:$0 sm:$0xff] }
 0x1f8   : >> { %v798_v44 = vsub.f32 %v796_v30, %v797_v34  ;;  %v801_v45 = vsub.f32 %v799_v31, %v800_v35  ;;  %v804_v47 = vadd.f32 %v803_v38, %v802_v36  ;;  %v807_v49 = vadd.f32 %v806_v42, %v805_v37 }
 0x1f9   : >> { %585 = vst [vmem:[%s2562_s17] sm:$0xff] %v577_v40  ;;  %s657_s17 = smov [#allocation15] }
 0x1fa   : >> { %586 = vst [vmem:[%s2564_s18] sm:$0xff] %v580_v41  ;;  %s644_s18 = smov [#allocation14] }
 0x1fb   : >> { %808 = vst [vmem:[%s2566_s20] sm:$0xff] %v798_v44  ;;  %s2634_s20 = smov [#allocation12] }
 0x1fc   : >> { %809 = vst [vmem:[%s2568_s22] sm:$0xff] %v801_v45  ;;  %s2636_s22 = smov [#allocation15] }
 0x1fd   : >> { %810 = vst [vmem:[%s2572_s24] sm:$0xff] %v804_v47  ;;  %s2434_s24 = smov 1  }
 0x1fe   : >> { %811 = vst [vmem:[%s2576_s26] sm:$0xff] %v807_v49  ;;  %s2646_s26 = smov [#allocation13] }
 0x1ff   : >> { %584 = vst [vmem:[%s2560_s16] sm:$0xff] %v574_v50  ;;  %s616_s16 = smov [#allocation12] }
 0x200   : >> { %587 = vst [vmem:[%s2570_s23] sm:$0xff] %v583_v51  ;;  %v597_v55 = vld [vmem:[%s2592_s30] sm:$0xff]  ;;  %s2638_s23 = smov [#allocation14] }
 0x201   : >> { %v598_v54 = vld [vmem:[%s2590_s29] sm:$0xff]  ;;  %v601_v4 = vmul.f32 %v597_v55, %v591_v53  ;;  %v604_v12 = vmul.f32 %v597_v55, %v589_v52 }
 0x202   : >> { %v814_v56 = vld [vmem:[%s812_s2] ss:$0 sm:$0xff]  ;;  %v1613_v58 = vld [vmem:[%s812_s2 + $0x7] ss:$0 sm:$0xff]  ;;  %v609_v7 = vmul.f32 %v598_v54, %v591_v53  ;;  %v606_v8 = vmul.f32 %v598_v54, %v589_v52 }
 0x203   : >> { %v1612_v57 = vld [vmem:[%s812_s2 - $0x1] sm:$0xfe]  ;;  %v1617_v62 = vld [vmem:[%s2596_s11 + $0x7] ss:$0 sm:$0xff] }
 0x204   : >> { %v821_v59 = vsel %vm744_vm10, %v814_v56, %v1612_v57  ;;  %v838_v60 = vld [vmem:[%s2596_s11] ss:$0 sm:$0xff]  ;;  %v1615_v0 = vld [vmem:[%s813_s10 + $0x1] sm:$0x7f] }
 0x205   : >> { %v1616_v61 = vld [vmem:[%s2596_s11 - $0x1] sm:$0xfe]  ;;  %824 = vst [vmem:[%s812_s2] sm:$0xff] %v821_v59  ;;  %v833_v2 = vsel %vm756_vm11, %v1613_v58, %v1615_v0 }
 0x206   : >> { %v825_v63 = vld [vmem:[%s813_s10] ss:$0 sm:$0xff]  ;;  %v845_v1 = vsel %vm744_vm10, %v838_v60, %v1616_v61  ;;  %v1619_v3 = vld [vmem:[%s2598_s12 + $0x1] sm:$0x7f] }
 0x207   : >> { %1614 = vst [vmem:[%s812_s2 + $0x1] sm:$0x1] %v825_v63  ;;  %v849_v5 = vld [vmem:[%s2598_s12] ss:$0 sm:$0xff]  ;;  %v857_v6 = vsel %vm756_vm11, %v1617_v62, %v1619_v3  ;;  %s285_s2 = smov (%p377_p5), [#allocation12] }
 0x208   : >> { %835 = vst [vmem:[%s813_s10] sm:$0xff] %v833_v2  ;;  %v596_v11 = vld [vmem:[%s2603_s3] sm:$0xff]  ;;  %s304_s10 = smov (%p377_p5), [#allocation13] }
 0x209   : >> { %848 = vst [vmem:[%s2596_s11] sm:$0xff] %v845_v1  ;;  %v599_v13 = vld [vmem:[%s595_s13] sm:$0xff]  ;;  %v600_v14 = vmul.f32 %v596_v11, %v589_v52  ;;  %v603_v15 = vmul.f32 %v596_v11, %v591_v53 }
 0x20a   : >> { %1618 = vst [vmem:[%s2596_s11 + $0x1] sm:$0x1] %v849_v5  ;;  %v607_v16 = vmul.f32 %v599_v13, %v591_v53  ;;  %v610_v17 = vmul.f32 %v599_v13, %v589_v52  ;;  %s321_s11 = smov (%p377_p5), [#allocation14] }
 0x20b   : >> { %859 = vst [vmem:[%s2598_s12] sm:$0xff] %v857_v6  ;;  %v602_v18 = vsub.f32 %v600_v14, %v601_v4  ;;  %v605_v21 = vadd.f32 %v604_v12, %v603_v15  ;;  %s338_s12 = smov (%p377_p5), [#allocation15] }
 0x20c   : >> { %v611_v19 = vadd.f32 %v610_v17, %v609_v7  ;;  %v608_v20 = vsub.f32 %v606_v8, %v607_v16 }
 0x20d   : >> { %612 = vst [vmem:[%s2603_s3] sm:$0xff] %v602_v18 }
 0x20e   : >> { %615 = vst [vmem:[%s595_s13] sm:$0xff] %v611_v19 }
 0x20f   : >> { %614 = vst [vmem:[%s2590_s29] sm:$0xff] %v608_v20  ;;  %s761_s29 = smov [#allocation15] }
 0x210   : >> { %613 = vst [vmem:[%s2592_s30] sm:$0xff] %v605_v21  ;;  %s860_s30 = sadd.s32 (%p377_p5), 1, %s2395_s0  }
 0x211   : > { %p373_p6 = scmp.ge.s32.totalorder (%p377_p5), %s860_s30, 15  ;;  %s2731_s0 = smov (%p377_p5), %s860_s30 }
 0x214   : >> { %v625_v24 = vld [vmem:[%s616_s16] sm:$0xff] }
 0x215   : >> { %v666_v25 = vld [vmem:[%s657_s17] sm:$0xff]  ;;  %v629_v26 = vsel %vm628_vm12, %v624_v22, %v625_v24 }
 0x216   : >> { %v670_v27 = vsel %vm669_vm13, %v665_v23, %v666_v25  ;;  %v651_v28 = vld [vmem:[%s644_s18] sm:$0xff]  ;;  %630 = vst [vmem:[%s616_s16] sm:$0xff] %v629_v26 }
 0x217   : >> { %671 = vst [vmem:[%s657_s17] sm:$0xff] %v670_v27  ;;  %v655_v29 = vsel %vm654_vm14, 0.0, %v651_v28  ;;  %v638_v30 = vld [vmem:[%s631_s19] sm:$0xff] }
 0x218   : >> { %656 = vst [vmem:[%s644_s18] sm:$0xff] %v655_v29  ;;  %v642_v31 = vsel %vm641_vm15, 0.0, %v638_v30 }
 0x219   : >> { %643 = vst [vmem:[%s631_s19] sm:$0xff] %v642_v31 }
 0x21d   : >> { %v678_v32 = vld [vmem:[%s2634_s20] sm:$0xff] }
 0x21e   : >> { %v706_v33 = vld [vmem:[%s2636_s22] sm:$0xff]  ;;  %679 = vrot.lane.b32.xlu1 %v678_v32, %s2434_s24 }
 0x21f   : >> { %707 = vrot.lane.b32.xlu0 %v706_v33, %s2434_s24  ;;  %v710_v34 = vld [vmem:[%s2638_s23] sm:$0xff] }
 0x220   : >> { %711 = vrot.lane.b32.xlu2 %v710_v34, %s2434_s24  ;;  %v695_v35 = vld [vmem:[%s673_s25] sm:$0xff] }
 0x226   : >> { %675 = vrot.lane.b32.xlu1 %v695_v35, %s2434_s24 }
 0x228   : >> { %696 = vrot.lane.b32.xlu2 %v695_v35, %s2435_s1 }
 0x22e   : >> { %728 = vrot.lane.b32.xlu1 %v706_v33, %s2435_s1 }
 0x27a   : >> { %v712_v36 = vpop.permute.xlu2 %711 }
 0x27b   : >> { %v716_v44 = vsel %vm683_vm1, %v710_v34, %v712_v36 }
 0x282   : >> { %v697_v37 = vpop.permute.xlu2 %696 }
 0x283   : >> { %v701_v38 = vsel %vm700_vm0, %v678_v32, %v697_v37 }
 0x284   : >> { %703 = vst [vmem:[%s673_s25] sm:$0xff] %v701_v38 }
 0x28b   : >> { %v762_v39 = vld [vmem:[%s2646_s26] ss:$0 sm:$0xff]  ;;  %v1609_v41 = vld [vmem:[%s2646_s26 + $0x7] ss:$0 sm:$0xff] }
 0x28c   : >> { %v1608_v40 = vld [vmem:[%s2646_s26 - $0x1] sm:$0xfe] }
 0x28d   : >> { %v769_v42 = vsel %vm744_vm10, %v762_v39, %v1608_v40 }
 0x28e   : >> { %772 = vst [vmem:[%s2646_s26] sm:$0xff] %v769_v42 }
 0x290   : >> { %v680_v43 = vpop.permute.xlu1 %679 }
 0x291   : >> { %v708_v45 = vpop.permute.xlu0 %707  ;;  %v684_v48 = vsel %vm683_vm1, %v678_v32, %v680_v43 }
 0x292   : >> { %v720_v46 = vsel %vm687_vm3, %v708_v45, %v716_v44 }
 0x293   : >> { %v726_v47 = vsel %vm1391_vm2, %v720_v46, 0.0 }
 0x294   : >> { %734 = vst [vmem:[%s2638_s23] sm:$0xff] %v726_v47 }
 0x298   : >> { %v676_v49 = vpop.permute.xlu1 %675 }
 0x299   : >> { %v688_v50 = vsel %vm687_vm3, %v676_v49, %v684_v48 }
 0x29a   : >> { %v694_v51 = vsel %vm1391_vm2, %v688_v50, 0.0 }
 0x29b   : >> { %702 = vst [vmem:[%s2634_s20] sm:$0xff] %v694_v51  ;;  %v1607_v53 = vld [vmem:[%s737_s27 + $0x1] sm:$0x7f]  ;;  %v749_v60 = vld [vmem:[%s737_s27] ss:$0 sm:$0xff] }
 0x2a0   : >> { %v729_v52 = vpop.permute.xlu1 %728 }
 0x2a1   : >> { %v733_v54 = vsel %vm700_vm0, %v710_v34, %v729_v52 }
 0x2a2   : >> { %v738_v55 = vld [vmem:[%s736_s28] ss:$0 sm:$0xff]  ;;  %v1605_v57 = vld [vmem:[%s736_s28 + $0x7] ss:$0 sm:$0xff]  ;;  %735 = vst [vmem:[%s2636_s22] sm:$0xff] %v733_v54 }
 0x2a3   : >> { %v1604_v56 = vld [vmem:[%s736_s28 - $0x1] sm:$0xfe]  ;;  %v757_v59 = vsel %vm756_vm11, %v1605_v57, %v1607_v53 }
 0x2a4   : >> { %v745_v58 = vsel %vm744_vm10, %v738_v55, %v1604_v56  ;;  %759 = vst [vmem:[%s737_s27] sm:$0xff] %v757_v59 }
 0x2a5   : >> { %748 = vst [vmem:[%s736_s28] sm:$0xff] %v745_v58 }
 0x2a6   : >> { %1606 = vst [vmem:[%s736_s28 + $0x1] sm:$0x1] %v749_v60 }
 0x2a9   : >> { %v773_v61 = vld [vmem:[%s761_s29] ss:$0 sm:$0xff]  ;;  %v1611_v62 = vld [vmem:[%s761_s29 + $0x1] sm:$0x7f] }
 0x2aa   : >> { %1610 = vst [vmem:[%s2646_s26 + $0x1] sm:$0x1] %v773_v61  ;;  %v781_v63 = vsel %vm756_vm11, %v1609_v41, %v1611_v62  ;;  %379 = sbr.rel (!%p377_p5) target bundleno = 245 (0xf5), region = 435 }
 0x2ab   : >> { %783 = vst [vmem:[%s761_s29] sm:$0xff] %v781_v63  ;;  %v327_v4 = vld [vmem:[%s321_s11] sm:$0xff] (%p377_p5) }
 0x2ac   : > { %v328_v8 = vsel (%p377_p5), %vm1391_vm2, %v327_v4, 0.0 }
 0x2ad   : > { %v291_v0 = vld [vmem:[%s285_s2] sm:$0xff] (%p377_p5)  ;;  %v329_v12 = vmul.f32 (%p377_p5), %v328_v8, %v328_v8 }
 0x2ae   : > { %v292_v2 = vsel (%p377_p5), %vm1391_vm2, %v291_v0, 0.0 }
 0x2af   : > { %v293_v6 = vmul.f32 %v292_v2, %v292_v2 }
 0x2b1   : > { %v310_v1 = vld [vmem:[%s304_s10] sm:$0xff]  ;;  %v297_v15 = vsel %vm296_vm4, 0.0, %v293_v6 }
 0x2b2   : > { %v311_v3 = vsel %vm1391_vm2, %v310_v1, 0.0  ;;  %v344_v5 = vld [vmem:[%s338_s12] sm:$0xff] }
 0x2b3   : > { %v312_v7 = vmul.f32 %v311_v3, %v311_v3  ;;  %v345_v11 = vsel %vm1391_vm2, %v344_v5, 0.0 }
 0x2b4   : > { %v346_v14 = vmul.f32 %v345_v11, %v345_v11 }
 0x2b5   : > { %v314_v13 = vadd.f32 %v312_v7, %v293_v6  ;;  %v313_v17 = vadd.f32 %v312_v7, %v297_v15 }
 0x2b6   : > { %v350_v20 = vsel %vm349_vm5, 0.0, %v346_v14 }
 0x2b7   : > { %v331_v16 = vadd.f32 %v329_v12, %v314_v13  ;;  %v330_v19 = vadd.f32 %v329_v12, %v313_v17 }
 0x2b9   : > { %v352_v18 = vadd.f32 %v346_v14, %v331_v16  ;;  %v351_v21 = vadd.f32 %v350_v20, %v330_v19 }
 0x2bb   : > { %353 = vadd.xlane.f32.xlu0 %v352_v18 }
 0x2c3   : > { %361 = vadd.xlane.f32.xlu0 %v351_v21 }
 0x32e   : > { %v354_v22 = vpop.xlane.xlu0 %353 }
 0x32f   : > { %v355_v23 = vrot.slane %v354_v22, 4 }
 0x331   : > { %v356_v24 = vadd.f32 %v355_v23, %v354_v22 }
 0x333   : > { %v357_v25 = vrot.slane %v356_v24, 2 }
 0x335   : > { %v358_v29 = vadd.f32 %v357_v25, %v356_v24 }
 0x336   : > { %v362_v26 = vpop.xlane.xlu0 %361 }
 0x337   : > { %v363_v27 = vrot.slane %v362_v26, 4  ;;  %v359_v32 = vrot.slane %v358_v29, 1 }
 0x339   : > { %v364_v28 = vadd.f32 %v363_v27, %v362_v26  ;;  %v360_v35 = vadd.f32 %v359_v32, %v358_v29 }
 0x33b   : > { %v365_v30 = vrot.slane %v364_v28, 2 }
 0x33d   : > { %v366_v31 = vadd.f32 %v365_v30, %v364_v28 }
 0x33f   : > { %v367_v33 = vrot.slane %v366_v31, 1 }
 0x341   : > { %v368_v34 = vadd.f32 %v367_v33, %v366_v31 }
 0x343   : > { %1646 = vpush %v368_v34 }
 0x344   : > { %1648 = vpush %v360_v35 }
 0x374   : > { %s1647_s21 = spop %1646 }
 0x375   : > { %s1649_s3 = spop %1648 }
 0x376   : > { %s371_s13 = smul.f32 1e-10, %s1649_s3 }
 0x378   : > { %p372_p7 = scmp.le.f32.partialorder %s1647_s21, %s371_s13 }
 0x37a   : > { %p374_p8 = por %p373_p6, %p372_p7 }
 0x37c   :  { %862 = sbr.rel (!%p374_p8) target bundleno = 244 (0xf4), region = 446 }
 0x381 PF:  { %s863_s14 = smov [#allocation12]  ;;  %v867_v9 = vmov %v2510_v9  ;;  %v870_v10 = vmov %v2512_v10  ;;  %s883_s15 = smov [#allocation15] }
 0x382   :  { %v887_v9 = vmov %v2510_v9  ;;  %v890_v10 = vmov %v2512_v10  ;;  %v871_v36 = vld [vmem:[%s863_s14] sm:$0xff]  ;;  %vm874_vm6 = vcmp.eq.s32.totalorder %v870_v10, %v867_v9  ;;  %s864_s0 = smov [#allocation4]  ;;  %s884_s16 = smov [#allocation6] }
 0x383   :  { %vm894_vm7 = vcmp.eq.s32.totalorder %v890_v10, %v887_v9  ;;  %v875_v37 = vsel %vm874_vm6, %v871_v36, 0.0  ;;  %v891_v38 = vld [vmem:[%s883_s15] sm:$0xff]  ;;  %s2401_s24 = smov %s2727_s6   ;;  %s2405_s25 = smov [#allocation8]  }
 0x384   :  { %v876_v39 = vrot.slane %v875_v37, 4  ;;  %v895_v40 = vsel %vm894_vm7, %v891_v38, 0.0 }
 0x385   :  { %v896_v41 = vrot.slane %v895_v40, 4 }
 0x386   :  { %v877_v42 = vadd.f32 %v876_v39, %v875_v37 }
 0x387   :  { %v897_v43 = vadd.f32 %v896_v41, %v895_v40 }
 0x388   :  { %v878_v44 = vrot.slane %v877_v42, 2 }
 0x389   :  { %v898_v45 = vrot.slane %v897_v43, 2 }
 0x38a   :  { %v879_v46 = vadd.f32 %v878_v44, %v877_v42 }
 0x38b   :  { %v899_v47 = vadd.f32 %v898_v45, %v897_v43 }
 0x38c   :  { %v880_v48 = vrot.slane %v879_v46, 1 }
 0x38d   :  { %v900_v49 = vrot.slane %v899_v47, 1 }
 0x38e   :  { %v881_v50 = vadd.f32 %v880_v48, %v879_v46 }
 0x38f   :  { %v901_v51 = vadd.f32 %v900_v49, %v899_v47 }
 0x390   :  { %882 = vst [vmem:[%s864_s0] sm:$0x1] %v881_v50 }
 0x391   :  { %902 = vst [vmem:[%s884_s16] sm:$0x1] %v901_v51 }
 0x397   :  { %v905_v9 = vld [vmem:[#allocation4] sm:$0x1] }
 0x398   :  { %908 = vst [vmem:[#allocation5] sm:$0x1] %v905_v9  ;;  %v911_v10 = vld [vmem:[#allocation6] sm:$0x1] }
 0x399   :  { %914 = vst [vmem:[#allocation7] sm:$0x1] %v911_v10 }
 0x39f   :  { %v971_v52 = vld [vmem:[#allocation5] sm:$0x1] }
 0x3a0   :  { %972 = vst [vmem:[%s2725_s4] sm:$0x1] %v971_v52  ;;  %v1029_v53 = vld [vmem:[#allocation7] sm:$0x1] }
 0x3a1   :  { %1030 = vst [vmem:[%s2726_s5] sm:$0x1] %v1029_v53 }
 0x3a2 LB: > { %v1074_v54 = vld [vmem:[%s2407_s25] sm:$0xff]  ;;  %s1076_s25 = scalar_lea.vmem %s2407_s25, 8   ;;  %s2407_s25 = sphi %s2405_s25, %s1076_s25   ;;  %s2403_s24 = sphi %s2401_s24, %s1077_s24  }
 0x3a3   : > { %1075 = vst [vmem:[%s2403_s24] sm:$0xff] %v1074_v54  ;;  %s1077_s24 = scalar_lea.vmem %s2403_s24, 8   ;;  %p1071_p9 = scmp.gt.s32.totalorder %s1076_s25, [#allocation8] }
 0x3a4   :  { %s2409_s5 = smov (%p1071_p9), %s2728_s7   ;;  %s2413_s26 = smov (%p1071_p9), [#allocation9]  }
 0x3a5   :  { %1073 = sbr.rel (!%p1071_p9) target bundleno = 930 (0x3a2), region = 512 }
 0x3aa LB: > { %v1130_v55 = vld [vmem:[%s2415_s26] sm:$0xff]  ;;  %s1132_s26 = scalar_lea.vmem %s2415_s26, 8   ;;  %s2415_s26 = sphi %s2413_s26, %s1132_s26   ;;  %s2411_s5 = sphi %s2409_s5, %s1133_s5  }
 0x3ab   : > { %1131 = vst [vmem:[%s2411_s5] sm:$0xff] %v1130_v55  ;;  %s1133_s5 = scalar_lea.vmem %s2411_s5, 8   ;;  %p1127_p10 = scmp.gt.s32.totalorder %s1132_s26, [#allocation9] }
 0x3ac   :  { %s2417_s28 = smov (%p1127_p10), %s2729_s8   ;;  %s2421_s29 = smov (%p1127_p10), [#allocation10]  }
 0x3ad   :  { %1129 = sbr.rel (!%p1127_p10) target bundleno = 938 (0x3aa), region = 534 }
 0x3b2 LB: > { %v1186_v56 = vld [vmem:[%s2423_s29] sm:$0xff]  ;;  %s1188_s29 = scalar_lea.vmem %s2423_s29, 8   ;;  %s2423_s29 = sphi %s2421_s29, %s1188_s29   ;;  %s2419_s28 = sphi %s2417_s28, %s1189_s28  }
 0x3b3   : > { %1187 = vst [vmem:[%s2419_s28] sm:$0xff] %v1186_v56  ;;  %s1189_s28 = scalar_lea.vmem %s2419_s28, 8   ;;  %p1183_p11 = scmp.gt.s32.totalorder %s1188_s29, [#allocation10] }
 0x3b4   :  { %s2425_s2 = smov (%p1183_p11), %s2730_s9   ;;  %s2429_s10 = smov (%p1183_p11), [#allocation11]  }
 0x3b5   :  { %1185 = sbr.rel (!%p1183_p11) target bundleno = 946 (0x3b2), region = 556 }
 0x3ba LB: > { %v1242_v57 = vld [vmem:[%s2431_s10] sm:$0xff]  ;;  %s1244_s10 = scalar_lea.vmem %s2431_s10, 8   ;;  %s2431_s10 = sphi %s2429_s10, %s1244_s10   ;;  %s2427_s2 = sphi %s2425_s2, %s1245_s2  }
 0x3bb   : > { %1243 = vst [vmem:[%s2427_s2] sm:$0xff] %v1242_v57  ;;  %s1245_s2 = scalar_lea.vmem %s2427_s2, 8   ;;  %p1239_p12 = scmp.gt.s32.totalorder %s1244_s10, [#allocation11] }
 0x3bd   :  { %1241 = sbr.rel (!%p1239_p12) target bundleno = 954 (0x3ba), region = 578 }

// kernel: tfim_forward.3
= control target key start
LH: loop header
LB: loop body
LE: loop exit
PB: predicated region body
PF: predicated region fallthrough
CT: control target
= control target key end

     0   :  { %11 = vsyncpa [#allocation5], 0  ;;  %s1146_s0 = inlined_call_operand.vmem [shape: f32[2,8,8], index: 0, kind: input, shape index: {}]   ;;  %s1147_s1 = inlined_call_operand.vmem [shape: f32[16], index: 1, kind: input, shape index: {}]   ;;  %s1148_s2 = inlined_call_operand.vmem [shape: f32[16,64], index: 2, kind: input, shape index: {}]   ;;  %s1149_s3 = inlined_call_operand.vmem [shape: f32[1,16], index: 3, kind: input, shape index: {}]   ;;  %s1150_s4 = inlined_call_operand.<no memory space> [shape: f32[1], index: 4, kind: input, shape index: {}]   ;;  %s1151_s5 = inlined_call_operand.hbm [shape: f32[1,1], index: 5, kind: output, shape index: {}]  }
   0x1   :  { %12 = vsyncpa [#allocation4], 0  ;;  %s20_s20 = sshll.u32 %s1147_s1, 4  ;;  %s910_s21 = smov [#allocation3]   ;;  %s21_s20 = int_to_ptr.vmem [resolvable:$true] %s20_s20 }
   0x2   :  { %23 = dma.vmem_to_smem %s21_s20, 16, %s910_s21, [#allocation5]  }
   0x3   :  { %906 = dma.done.wait [#allocation5], 16  }
   0x4   :  { %907 = vsyncadd [#allocation5], 4294967280 }
   0x5   :  { %34 = sfence }
   0x6   :  { %v54_v0 = vld [vmem:[%s1148_s2 + $0x8] sm:$0xff]  ;;  %v53_v1 = vld [vmem:[%s1148_s2] sm:$0xff]  ;;  %v79_v2 = vlaneseq  ;;  %vm55_vm0 = vcmask 130048   ;;  %v911_v14 = vmov 0.0   ;;  %s792_s29 = sld [smem:[#allocation3 + $0xc]]  ;;  %s743_s25 = smul.f32 %s1150_s4, %s1150_s4 }
   0x7   :  { %73 = vmatpush.msra.mxu0 %v54_v0  ;;  %v52_v3 = vld [vmem:[%s1149_s3] sm:$0x1]  ;;  %s785_s30 = sld [smem:[#allocation3 + $0x5]]  ;;  %s913_s20 = smov 1e-30  }
   0x8   :  { %v957_v4 = vshrl.u32 %v79_v2, 7  ;;  %v959_v5 = vand.u32 127, %v79_v2  ;;  %s793_s6 = sld [smem:[#allocation3 + $0xd]]  ;;  %s914_s4 = smov [#allocation6]  }
   0x9   :  { %74 = vmatpush.msra.mxu0 %v53_v1  ;;  %s1073_s7 = sld [smem:[#allocation3 + $0x6]]  ;;  %s769_s26 = sshll.u32 %s914_s4, 4  ;;  %s770_s26 = int_to_ptr.vmem [resolvable:$true] %s769_s26 }
   0xa   :  { %796 = vmatmul.msk.f32.vlgmr.msra.gmra.mxu0 %vm55_vm0, %v52_v3  ;;  %v96_v6 = vadd.s32 56, %v957_v4  ;;  %v963_v7 = vadd.s32 8, %v959_v5  ;;  %v966_v8 = vadd.s32 16, %v959_v5  ;;  %v969_v9 = vadd.s32 24, %v959_v5  ;;  %s1075_s8 = sld [smem:[#allocation3 + $0xe]]  ;;  %s771_s3 = sshll.u32 %s1151_s5, 4  ;;  %s772_s3 = int_to_ptr.hbm [resolvable:$true] %s771_s3 }
   0xb   :  { %v972_v10 = vadd.s32 32, %v959_v5  ;;  %v975_v11 = vadd.s32 40, %v959_v5  ;;  %v294_v12 = vadd.s32 48, %v959_v5  ;;  %v327_v13 = vadd.s32 56, %v959_v5  ;;  %s1077_s9 = sld [smem:[#allocation3 + $0x7]] }
   0xc   :  { %vm104_vm1 = vcmp.eq.s32.totalorder %v96_v6, %v959_v5  ;;  %vm137_vm2 = vcmp.eq.s32.totalorder %v96_v6, %v963_v7  ;;  %vm170_vm3 = vcmp.eq.s32.totalorder %v96_v6, %v966_v8  ;;  %vm203_vm4 = vcmp.eq.s32.totalorder %v96_v6, %v969_v9  ;;  %s1079_s10 = sld [smem:[#allocation3 + $0xf]] }
   0xd   :  { %v805_v15 = vsel %vm104_vm1, 1.0, %v911_v14  ;;  %v812_v16 = vsel %vm137_vm2, 1.0, %v911_v14  ;;  %v818_v17 = vsel %vm170_vm3, 1.0, %v911_v14  ;;  %vm236_vm5 = vcmp.eq.s32.totalorder %v96_v6, %v972_v10  ;;  %s35_s11 = sld [smem:[#allocation3]] }
   0xe   :  { %v161_v18 = vadd.f32 %v812_v16, %v805_v15  ;;  %vm269_vm6 = vcmp.eq.s32.totalorder %v96_v6, %v975_v11  ;;  %vm302_vm7 = vcmp.eq.s32.totalorder %v96_v6, %v294_v12  ;;  %v823_v19 = vsel %vm203_vm4, 1.0, %v911_v14  ;;  %s781_s12 = sld [smem:[#allocation3 + $0x1]] }
   0xf   :  { %vm335_vm8 = vcmp.eq.s32.totalorder %v96_v6, %v327_v13  ;;  %v827_v21 = vsel %vm236_vm5, 1.0, %v911_v14  ;;  %v830_v22 = vsel %vm269_vm6, 1.0, %v911_v14  ;;  %v95_v23 = vadd.s32 48, %v957_v4  ;;  %s1081_s13 = sld [smem:[#allocation3 + $0x2]] }
  0x10   :  { %v194_v20 = vadd.f32 %v818_v17, %v161_v18  ;;  %v832_v24 = vsel %vm302_vm7, 1.0, %v911_v14  ;;  %v833_v25 = vsel %vm335_vm8, 1.0, %v911_v14  ;;  %v94_v26 = vadd.s32 40, %v957_v4  ;;  %s1083_s14 = sld [smem:[#allocation3 + $0x3]] }
  0x11   :  { %v93_v27 = vadd.s32 32, %v957_v4  ;;  %vm103_vm9 = vcmp.eq.s32.totalorder %v95_v23, %v959_v5  ;;  %vm136_vm10 = vcmp.eq.s32.totalorder %v95_v23, %v963_v7  ;;  %vm169_vm11 = vcmp.eq.s32.totalorder %v95_v23, %v966_v8  ;;  %s788_s15 = sld [smem:[#allocation3 + $0x8]] }
  0x12   :  { %v227_v28 = vadd.f32 %v823_v19, %v194_v20  ;;  %v804_v29 = vsel %vm103_vm9, 1.0, %v911_v14  ;;  %v811_v30 = vsel %vm136_vm10, 1.0, %v911_v14  ;;  %v817_v31 = vsel %vm169_vm11, 1.0, %v911_v14  ;;  %s789_s16 = sld [smem:[#allocation3 + $0x9]] }
  0x13   :  { %vm202_vm12 = vcmp.eq.s32.totalorder %v95_v23, %v969_v9  ;;  %v160_v33 = vadd.f32 %v811_v30, %v804_v29  ;;  %vm235_vm13 = vcmp.eq.s32.totalorder %v95_v23, %v972_v10  ;;  %v92_v34 = vadd.s32 24, %v957_v4  ;;  %v413_v30 = vld [vmem:[%s1146_s0] sm:$0xff]  ;;  %s1085_s17 = sld [smem:[#allocation3 + $0xa]] }
  0x14   :  { %v260_v32 = vadd.f32 %v827_v21, %v227_v28  ;;  %v822_v35 = vsel %vm202_vm12, 1.0, %v911_v14  ;;  %v826_v36 = vsel %vm235_vm13, 1.0, %v911_v14  ;;  %vm268_vm14 = vcmp.eq.s32.totalorder %v95_v23, %v975_v11  ;;  %434 = vmatpush.msra.mxu2 %v413_v30  ;;  %s1087_s18 = sld [smem:[#allocation3 + $0xb]] }
  0x15   :  { %vm102_vm15 = vcmp.eq.s32.totalorder %v94_v26, %v959_v5  ;;  %v193_v38 = vadd.f32 %v817_v31, %v160_v33  ;;  %v829_v39 = vsel %vm268_vm14, 1.0, %v911_v14  ;;  %vm301_vm0 = vcmp.eq.s32.totalorder %v95_v23, %v294_v12 }
  0x16   :  { %v293_v37 = vadd.f32 %v830_v22, %v260_v32  ;;  %v803_v40 = vsel %vm102_vm15, 1.0, %v911_v14  ;;  %vm135_vm1 = vcmp.eq.s32.totalorder %v94_v26, %v963_v7  ;;  %vm168_vm2 = vcmp.eq.s32.totalorder %v94_v26, %v966_v8  ;;  %477 = vmatpush.msrb.mxu2 %v413_v30 }
  0x17   :  { %vm201_vm3 = vcmp.eq.s32.totalorder %v94_v26, %v969_v9  ;;  %v226_v42 = vadd.f32 %v822_v35, %v193_v38  ;;  %v810_v43 = vsel %vm135_vm1, 1.0, %v911_v14  ;;  %v816_v44 = vsel %vm168_vm2, 1.0, %v911_v14 }
  0x18   :  { %v326_v41 = vadd.f32 %v832_v24, %v293_v37  ;;  %v831_v45 = vsel %vm301_vm0, 1.0, %v911_v14  ;;  %v159_v46 = vadd.f32 %v810_v43, %v803_v40  ;;  %v821_v47 = vsel %vm201_vm3, 1.0, %v911_v14 }
  0x19   :  { %vm234_vm4 = vcmp.eq.s32.totalorder %v94_v26, %v972_v10  ;;  %v259_v49 = vadd.f32 %v826_v36, %v226_v42  ;;  %vm267_vm5 = vcmp.eq.s32.totalorder %v94_v26, %v975_v11  ;;  %vm101_vm6 = vcmp.eq.s32.totalorder %v93_v27, %v959_v5 }
  0x1a   :  { %v359_v48 = vadd.f32 %v833_v25, %v326_v41  ;;  %v825_v50 = vsel %vm234_vm4, 1.0, %v911_v14  ;;  %v192_v51 = vadd.f32 %v816_v44, %v159_v46  ;;  %vm134_vm7 = vcmp.eq.s32.totalorder %v93_v27, %v963_v7 }
  0x1b   :  { %vm167_vm8 = vcmp.eq.s32.totalorder %v93_v27, %v966_v8  ;;  %v292_v52 = vadd.f32 %v829_v39, %v259_v49  ;;  %v802_v53 = vsel %vm101_vm6, 1.0, %v911_v14  ;;  %v809_v54 = vsel %vm134_vm7, 1.0, %v911_v14 }
  0x1c   :  { %374 = vmatpush.msra.mxu1 %v359_v48  ;;  %v815_v55 = vsel %vm167_vm8, 1.0, %v911_v14  ;;  %v225_v56 = vadd.f32 %v821_v47, %v192_v51  ;;  %v158_v57 = vadd.f32 %v809_v54, %v802_v53  ;;  %vm200_vm9 = vcmp.eq.s32.totalorder %v93_v27, %v969_v9 }
  0x1d   :  { %vm233_vm10 = vcmp.eq.s32.totalorder %v93_v27, %v972_v10  ;;  %v325_v58 = vadd.f32 %v831_v45, %v292_v52  ;;  %v828_v59 = vsel %vm267_vm5, 1.0, %v911_v14  ;;  %v820_v60 = vsel %vm200_vm9, 1.0, %v911_v14 }
  0x1e   :  { %vm100_vm11 = vcmp.eq.s32.totalorder %v92_v34, %v959_v5  ;;  %v258_v61 = vadd.f32 %v825_v50, %v225_v56  ;;  %v191_v62 = vadd.f32 %v815_v55, %v158_v57  ;;  %vm133_vm12 = vcmp.eq.s32.totalorder %v92_v34, %v963_v7 }
  0x1f   :  { %v801_v63 = vsel %vm100_vm11, 1.0, %v911_v14  ;;  %375 = vmatpush.msra.mxu1 %v325_v58  ;;  %v824_v0 = vsel %vm233_vm10, 1.0, %v911_v14  ;;  %v808_v1 = vsel %vm133_vm12, 1.0, %v911_v14  ;;  %vm166_vm13 = vcmp.eq.s32.totalorder %v92_v34, %v966_v8 }
  0x20   :  { %vm199_vm14 = vcmp.eq.s32.totalorder %v92_v34, %v969_v9  ;;  %v291_v2 = vadd.f32 %v828_v59, %v258_v61  ;;  %v224_v3 = vadd.f32 %v820_v60, %v191_v62  ;;  %v157_v6 = vadd.f32 %v808_v1, %v801_v63 }
  0x21   :  { %v814_v10 = vsel %vm166_vm13, 1.0, %v911_v14  ;;  %v819_v11 = vsel %vm199_vm14, 1.0, %v911_v14  ;;  %v91_v16 = vadd.s32 16, %v957_v4  ;;  %v90_v19 = vadd.s32 8, %v957_v4 }
  0x22   :  { %376 = vmatpush.msra.mxu1 %v291_v2  ;;  %v257_v12 = vadd.f32 %v824_v0, %v224_v3  ;;  %v190_v13 = vadd.f32 %v814_v10, %v157_v6  ;;  %vm97_vm4 = vcmp.eq.s32.totalorder %v957_v4, %v959_v5  ;;  %v83_v25 = vmul.u32 8, %v957_v4  ;;  %v836_v4 = vld [vmem:[%s1146_s0 + $0x8] sm:$0xff]  ;;  %s784_s0 = sld [smem:[#allocation3 + $0x4]] }
  0x23   :  { %vm99_vm15 = vcmp.eq.s32.totalorder %v91_v16, %v959_v5  ;;  %vm132_vm0 = vcmp.eq.s32.totalorder %v91_v16, %v963_v7  ;;  %vm165_vm1 = vcmp.eq.s32.totalorder %v91_v16, %v966_v8  ;;  %vm98_vm2 = vcmp.eq.s32.totalorder %v90_v19, %v959_v5  ;;  %454 = vmatpush.msra.mxu3 %v836_v4 }
  0x24   :  { %377 = vmatpush.msra.mxu1 %v257_v12  ;;  %v223_v15 = vadd.f32 %v819_v11, %v190_v13  ;;  %v800_v9 = vsel %vm99_vm15, 1.0, %v911_v14  ;;  %v807_v17 = vsel %vm132_vm0, 1.0, %v911_v14  ;;  %v813_v20 = vsel %vm165_vm1, 1.0, %v911_v14 }
  0x25   :  { %v156_v18 = vadd.f32 %v807_v17, %v800_v9  ;;  %vm131_vm3 = vcmp.eq.s32.totalorder %v90_v19, %v963_v7  ;;  %v799_v22 = vsel %vm98_vm2, 1.0, %v911_v14  ;;  %v912_v8 = vmov 1.0   ;;  %497 = vmatpush.msrb.mxu3 %v836_v4 }
  0x26   :  { %378 = vmatpush.msra.mxu1 %v223_v15  ;;  %v806_v23 = vsel %vm131_vm3, 1.0, %v911_v14  ;;  %v85_v26 = vadd.s32 8, %v83_v25  ;;  %vm84_vm5 = vcmp.ge.s32.totalorder %v959_v5, %v83_v25  ;;  %vm362_vm8 = vcmask 523264  }
  0x27   :  { %v189_v21 = vadd.f32 %v813_v20, %v156_v18  ;;  %v155_v24 = vadd.f32 %v806_v23, %v799_v22  ;;  %vm387_vm9 = vcmask 64512   ;;  %v676_v41 = vstv %s792_s29 }
  0x28   :  { %vm86_vm6 = vcmp.lt.s32.totalorder %v959_v5, %v85_v26  ;;  %837 = vmatmul.msk.f32.vlgmr.msra.gmra.mxu2 %vm387_vm9, %v413_v30  ;;  %838 = vmatmul.msk.f32.vlgmr.msra.gmra.mxu3 %vm387_vm9, %v413_v30  ;;  %v562_v40 = vstv %s784_s0  ;;  %v565_v43 = vstv %s785_s30  ;;  %v679_v44 = vstv %s793_s6 }
  0x29   :  { %379 = vmatpush.msra.mxu1 %v189_v21  ;;  %vm87_vm7 = vmand %vm84_vm5, %vm86_vm6  ;;  %v502_v49 = vstv %s35_s11  ;;  %v505_v50 = vstv %s781_s12  ;;  %v568_v51 = vstv %s1073_s7  ;;  %v682_v52 = vstv %s1075_s8 }
  0x2a   :  { %v797_v27 = vsel %vm87_vm7, 1.0, %v911_v14  ;;  %v571_v55 = vstv %s1077_s9  ;;  %v685_v56 = vstv %s1079_s10  ;;  %v619_v57 = vstv %s788_s15 }
  0x2b   :  { %380 = vmatpush.msra.mxu1 %v155_v24  ;;  %v622_v58 = vstv %s789_s16  ;;  %v508_v63 = vstv %s1081_s13  ;;  %v511_v0 = vstv %s1083_s14  ;;  %v625_v1 = vstv %s1085_s17 }
  0x2c   :  { %v628_v2 = vstv %s1087_s18  ;;  %vm762_vm1 = vcmask 0  }
  0x2d   :  { %834 = vmatpush.msk.msra.mxu1 %vm97_vm4, %v912_v8 }
  0x30   :  { %839 = vmatmul.msk.f32.vlgmr.msrb.gmra.mxu2 %vm387_vm9, %v836_v4  ;;  %840 = vmatmul.msk.f32.vlgmr.msrb.gmra.mxu3 %vm387_vm9, %v836_v4 }
  0x87   :  { %v76_v7 = vpop.f32.mrf.mxu0 }
  0x88   :  { %v360_v28 = vperm.slane %v76_v7, 0 }
  0x8a   :  { %v361_v29 = vmul.f32 %v797_v27, %v360_v28 }
  0x8c   :  { %835 = vmatmul.msk.f32.vlgmr.msra.gmra.mxu1 %vm362_vm8, %v361_v29 }
  0xab   :  { %v1089_v39 = vpop.f32.mrf.mxu2  ;;  %v1091_v42 = vpop.f32.mrf.mxu3 }
  0xac   :  { %v563_v45 = vmul.f32 %v562_v40, %v1089_v39  ;;  %v677_v46 = vmul.f32 %v676_v41, %v1089_v39  ;;  %v566_v47 = vmul.f32 %v565_v43, %v1091_v42  ;;  %v680_v48 = vmul.f32 %v679_v44, %v1091_v42 }
  0xad   :  { %v503_v53 = vmul.f32 %v502_v49, %v1089_v39  ;;  %v506_v54 = vmul.f32 %v505_v50, %v1091_v42  ;;  %v620_v61 = vmul.f32 %v619_v57, %v1089_v39  ;;  %v623_v62 = vmul.f32 %v622_v58, %v1091_v42 }
  0xae   :  { %v567_v59 = vadd.f32 %v566_v47, %v563_v45  ;;  %v681_v60 = vadd.f32 %v680_v48, %v677_v46 }
  0xaf   :  { %v507_v10 = vadd.f32 %v506_v54, %v503_v53  ;;  %v624_v11 = vadd.f32 %v623_v62, %v620_v61 }
  0xb3   :  { %v1109_v3 = vpop.f32.mrf.mxu2  ;;  %v1111_v6 = vpop.f32.mrf.mxu3 }
  0xb4   :  { %v569_v12 = vmul.f32 %v568_v51, %v1109_v3  ;;  %v683_v13 = vmul.f32 %v682_v52, %v1109_v3  ;;  %v572_v15 = vmul.f32 %v571_v55, %v1111_v6  ;;  %v686_v16 = vmul.f32 %v685_v56, %v1111_v6 }
  0xb5   :  { %v509_v9 = vmul.f32 %v508_v63, %v1109_v3  ;;  %v512_v17 = vmul.f32 %v511_v0, %v1111_v6  ;;  %v626_v18 = vmul.f32 %v625_v1, %v1109_v3  ;;  %v629_v19 = vmul.f32 %v628_v2, %v1111_v6 }
  0xb6   :  { %v570_v20 = vadd.f32 %v569_v12, %v567_v59  ;;  %v684_v21 = vadd.f32 %v683_v13, %v681_v60 }
  0xb7   :  { %v510_v22 = vadd.f32 %v509_v9, %v507_v10  ;;  %v627_v23 = vadd.f32 %v626_v18, %v624_v11 }
  0xb8   :  { %v573_v8 = vadd.f32 %v572_v15, %v570_v20  ;;  %v687_v25 = vadd.f32 %v686_v16, %v684_v21 }
  0xb9   :  { %v513_v26 = vadd.f32 %v512_v17, %v510_v22  ;;  %v630_v7 = vadd.f32 %v629_v19, %v627_v23 }
  0xba   :  { %589 = vmatpush.msra.mxu3 %v573_v8 }
  0xbb   :  { %532 = vmatpush.msrb.mxu0 %v513_v26  ;;  %646 = vmatpush.msrb.mxu1 %v630_v7 }
  0xbc   :  { %703 = vmatpush.msrb.mxu3 %v687_v25 }
 0x109   :  { %v1068_v5 = vpop.f32.mrf.mxu1 }
 0x10a   :  { %v386_v14 = vmul.f32 %v1068_v5, %v1068_v5 }
 0x10c   :  { %v388_v31 = vsel %vm387_vm9, %v386_v14, 0.0 }
 0x10d   :  { %389 = vadd.xlane.f32.xlu0 %v388_v31 }
 0x180   :  { %v390_v32 = vpop.xlane.xlu0 %389 }
 0x181   :  { %v391_v33 = vrot.slane %v390_v32, 4 }
 0x183   :  { %v392_v34 = vadd.f32 %v391_v33, %v390_v32 }
 0x185   :  { %v393_v35 = vrot.slane %v392_v34, 2 }
 0x187   :  { %v394_v36 = vadd.f32 %v393_v35, %v392_v34 }
 0x189   :  { %v395_v37 = vrot.slane %v394_v36, 1 }
 0x18b   :  { %v396_v38 = vadd.f32 %v395_v37, %v394_v36 }
 0x18d   :  { %853 = vpush %v396_v38 }
 0x1be   :  { %s854_s19 = spop %853 }
 0x1bf   :  { %s398_s21 = smax.f32 %s913_s20, %s854_s19 }
 0x1c0   :  { %v399_v24 = vstv %s398_s21 }
 0x1c1   :  { %866 = vrsqrt.f32 %v399_v24  ;;  %vm406_vm11 = vweird.f32 %v399_v24 }
 0x1c7   :  { %v867_v27 = vpop.eup %866 }
 0x1c8   :  { %v401_v28 = vmul.f32 %v867_v27, %v399_v24  ;;  %vm407_vm10 = vweird.f32 %v867_v27 }
 0x1c9   :  { %vm408_vm12 = vmor %vm406_vm11, %vm407_vm10 }
 0x1ca   :  { %v402_v29 = vmul.f32 %v867_v27, %v401_v28 }
 0x1cc   :  { %v403_v30 = vmul.f32 0.5, %v402_v29 }
 0x1ce   :  { %v404_v4 = vsub.f32 1.5, %v403_v30 }
 0x1d0   :  { %v405_v14 = vmul.f32 %v867_v27, %v404_v4 }
 0x1d2   :  { %v409_v31 = vsel %vm408_vm12, %v867_v27, %v405_v14 }
 0x1d3   :  { %855 = vpush %v409_v31 }
 0x204   :  { %s856_s22 = spop %855 }
 0x205   :  { %v411_v32 = vstv %s856_s22 }
 0x206   :  { %v412_v33 = vmul.f32 %v411_v32, %v1068_v5 }
 0x208   :  { %841 = vmatmul.msk.f32.vlgmr.msrb.gmra.mxu0 %vm387_vm9, %v412_v33  ;;  %842 = vmatpush.xpose.msk.msra.mxu2 %vm387_vm9, %v412_v33 }
 0x209   :  { %844 = vmatmul.msk.f32.vlgmr.msra.gmra.mxu3 %vm387_vm9, %v412_v33  ;;  %845 = vmatpush.xpose.msk.msra.mxu0 %vm387_vm9, %v412_v33 }
 0x20a   :  { %847 = vmatmul.msk.f32.vlgmr.msrb.gmra.mxu1 %vm387_vm9, %v412_v33 }
 0x20c   :  { %848 = vmatpush.xpose.msk.msrb.mxu2 %vm387_vm9, %v412_v33 }
 0x20d   :  { %851 = vmatpush.xpose.msk.msrb.mxu0 %vm387_vm9, %v412_v33 }
 0x211   :  { %850 = vmatmul.msk.f32.vlgmr.msrb.gmra.mxu3 %vm387_vm9, %v412_v33 }
 0x285   :  { %v534_v34 = vpop.f32.mrf.mxu0 }
 0x286   :  { %843 = vmatmul.msk.f32.vlgmr.msra.gmra.mxu2 %vm387_vm9, %v534_v34 }
 0x287   :  { %v648_v35 = vpop.f32.mrf.mxu1 }
 0x28c   :  { %v591_v5 = vpop.f32.mrf.mxu3 }
 0x28d   :  { %846 = vmatmul.msk.f32.vlgmr.msra.gmra.mxu0 %vm387_vm9, %v591_v5 }
 0x28e   :  { %849 = vmatmul.msk.f32.vlgmr.msrb.gmra.mxu2 %vm387_vm9, %v648_v35 }
 0x294   :  { %v705_v36 = vpop.f32.mrf.mxu3 }
 0x295   :  { %852 = vmatmul.msk.f32.vlgmr.msrb.gmra.mxu0 %vm387_vm9, %v705_v36 }
 0x309   :  { %v557_v37 = vpop.f32.mrf.mxu2 }
 0x30a   :  { %v614_v38 = vpop.f32.mrf.mxu0  ;;  %v560_v40 = vmul.f32 %v557_v37, %v1089_v39  ;;  %v744_v39 = vstv %s743_s25 }
 0x30b   :  { %v617_v41 = vmul.f32 %v614_v38, %v1091_v42  ;;  %868 = vrcp.f32 %v744_v39  ;;  %vm750_vm13 = vweird.f32 %v744_v39  ;;  %v756_v57 = vand.u32 2147483648, %v744_v39 }
 0x30c   :  { %v754_v59 = vand.u32 2147483647, %v744_v39 }
 0x30d   :  { %v618_v44 = vadd.f32 %v617_v41, %v560_v40  ;;  %v757_v62 = vor.u32 1.1754944e-38, %v756_v57 }
 0x30e   :  { %vm755_vm0 = vcmp.eq.f32.partialorder %v754_v59, 8.507059e+37 }
 0x311   :  { %v671_v43 = vpop.f32.mrf.mxu2  ;;  %v869_v42 = vpop.eup %868 }
 0x312   :  { %v674_v45 = vmul.f32 %v671_v43, %v1109_v3  ;;  %v728_v46 = vpop.f32.mrf.mxu0  ;;  %v746_v51 = vmul.f32 %v869_v42, %v744_v39  ;;  %vm751_vm14 = vweird.f32 %v869_v42 }
 0x313   :  { %v731_v48 = vmul.f32 %v728_v46, %v1111_v6  ;;  %vm752_vm15 = vmor %vm750_vm13, %vm751_vm14 }
 0x314   :  { %v675_v47 = vadd.f32 %v674_v45, %v618_v44  ;;  %v747_v52 = vsub.f32 1.0, %v746_v51 }
 0x316   :  { %v732_v49 = vadd.f32 %v731_v48, %v675_v47  ;;  %v748_v54 = vmul.f32 %v869_v42, %v747_v52 }
 0x318   :  { %v733_v50 = vsel %vm387_vm9, %v732_v49, 0.0  ;;  %v749_v58 = vadd.f32 %v869_v42, %v748_v54 }
 0x319   :  { %734 = vadd.xlane.f32.xlu0 %v733_v50 }
 0x31a   :  { %v753_v63 = vsel %vm752_vm15, %v869_v42, %v749_v58 }
 0x31b   :  { %v758_v2 = vsel %vm755_vm0, %v757_v62, %v753_v63 }
 0x38c   :  { %v735_v53 = vpop.xlane.xlu0 %734 }
 0x38d   :  { %v736_v55 = vrot.slane %v735_v53, 4 }
 0x38f   :  { %v737_v56 = vadd.f32 %v736_v55, %v735_v53 }
 0x391   :  { %v738_v60 = vrot.slane %v737_v56, 2 }
 0x393   :  { %v739_v61 = vadd.f32 %v738_v60, %v737_v56 }
 0x395   :  { %v740_v0 = vrot.slane %v739_v61, 1 }
 0x397   :  { %v741_v1 = vadd.f32 %v740_v0, %v739_v61 }
 0x399   :  { %857 = vpush %v741_v1 }
 0x39a   :  { %859 = vpush %v758_v2 }
 0x3ca   :  { %s858_s27 = spop %857 }
 0x3cb   :  { %s860_s28 = spop %859 }
 0x3cc   :  { %s760_s0 = smul.f32 %s860_s28, %s858_s27 }
 0x3ce   :  { %v761_v3 = vstv %s760_s0 }
 0x3cf   :  { %763 = vst.msk [vmem:[#allocation6] sm:$0x1] %vm762_vm1, %v761_v3 }
 0x3d0   :  { %774 = dma.vmem_to_hbm [thread:$0]  %s770_s26, 16, %s772_s3, [#allocation4]  }
 0x3d1   :  { %908 = dma.done.wait [#allocation4], 16  }
 0x3d2   :  { %909 = vsyncadd [#allocation4], 4294967280 }
 0x3d3   :  { %779 = vsyncpa [#allocation4], 1 }
 0x3d4   :  { %780 = vsyncpa [#allocation5], 1 }

// kernel: tfim_forward.2
= control target key start
LH: loop header
LB: loop body
LE: loop exit
PB: predicated region body
PF: predicated region fallthrough
CT: control target
= control target key end

     0   :  { %v13_v0 = vlaneseq  ;;  %vm330_vm0 = vcmask 64512   ;;  %v3598_v7 = vmov 0.0   ;;  %s4555_s0 = inlined_call_operand.vmem [shape: f32[2,8,8], index: 0, kind: input, shape index: {}]   ;;  %s4556_s1 = inlined_call_operand.vmem [shape: f32[1,64], index: 1, kind: input, shape index: {}]   ;;  %s4557_s2 = inlined_call_operand.vmem [shape: f32[16,64], index: 2, kind: output, shape index: {0}]   ;;  %s4558_s3 = inlined_call_operand.vmem [shape: f32[16,16], index: 3, kind: output, shape index: {1}]  }
   0x1   :  { %v329_v1 = vld [vmem:[%s4555_s0] sm:$0xff] }
   0x2   :  { %500 = vmatpush.msra.mxu2 %v329_v1  ;;  %v3622_v2 = vshrl.u32 %v13_v0, 7  ;;  %v3624_v3 = vand.u32 127, %v13_v0  ;;  %370 = vmatpush.msra.mxu0 %v329_v1 }
   0x4   :  { %vm66_vm1 = vcmp.eq.s32.totalorder %v3622_v2, %v3624_v3  ;;  %v3629_v4 = vmul.u32 8, %v3624_v3  ;;  %v15_v5 = vadd.s32 8, %v3622_v2  ;;  %v3633_v6 = vadd.s32 8, %v3624_v3 }
   0x5   :  { %v3636_v8 = vsel %vm66_vm1, 1.0, %v3598_v7  ;;  %v16_v9 = vadd.s32 16, %v3622_v2  ;;  %v3640_v10 = vadd.s32 24, %v3622_v2  ;;  %v3657_v14 = vadd.s32 16, %v3624_v3 }
   0x6   :  { %3285 = vmatmul.msk.f32.vlgmr.msra.gmra.mxu2 %vm330_vm0, %v3636_v8  ;;  %vm25_vm2 = vcmp.ge.s32.totalorder %v3622_v2, %v3629_v4  ;;  %v3647_v11 = vadd.s32 8, %v3629_v4  ;;  %vm67_vm3 = vcmp.eq.s32.totalorder %v15_v5, %v3624_v3  ;;  %vm100_vm4 = vcmp.eq.s32.totalorder %v15_v5, %v3633_v6 }
   0x7   :  { %v3226_v12 = vsel %vm67_vm3, 1.0, %v3598_v7  ;;  %v3233_v13 = vsel %vm100_vm4, 1.0, %v3598_v7  ;;  %vm68_vm6 = vcmp.eq.s32.totalorder %v16_v9, %v3624_v3  ;;  %vm26_vm8 = vcmp.ge.s32.totalorder %v15_v5, %v3629_v4 }
   0x8   :  { %vm34_vm5 = vcmp.lt.s32.totalorder %v3622_v2, %v3647_v11  ;;  %vm35_vm9 = vcmp.lt.s32.totalorder %v15_v5, %v3647_v11  ;;  %vm101_vm10 = vcmp.eq.s32.totalorder %v16_v9, %v3633_v6  ;;  %v3665_v16 = vadd.f32 %v3233_v13, %v3226_v12 }
   0x9   :  { %vm42_vm7 = vmand %vm25_vm2, %vm34_vm5  ;;  %vm69_vm11 = vcmp.eq.s32.totalorder %v3640_v10, %v3624_v3  ;;  %v3227_v17 = vsel %vm68_vm6, 1.0, %v3598_v7  ;;  %v3234_v18 = vsel %vm101_vm10, 1.0, %v3598_v7  ;;  %vm102_vm12 = vcmp.eq.s32.totalorder %v3640_v10, %v3633_v6 }
   0xa   :  { %v3663_v15 = vsel %vm42_vm7, 1.0, %v3598_v7  ;;  %vm43_vm13 = vmand %vm26_vm8, %vm35_vm9  ;;  %vm134_vm14 = vcmp.eq.s32.totalorder %v16_v9, %v3657_v14  ;;  %v3228_v19 = vsel %vm69_vm11, 1.0, %v3598_v7  ;;  %v3235_v20 = vsel %vm102_vm12, 1.0, %v3598_v7 }
   0xb   :  { %3261 = vmatmul.msk.f32.vlgmr.msra.gmra.mxu0 %vm330_vm0, %v3663_v15  ;;  %v125_v21 = vadd.f32 %v3234_v18, %v3227_v17  ;;  %vm135_vm15 = vcmp.eq.s32.totalorder %v3640_v10, %v3657_v14  ;;  %v3683_v22 = vadd.s32 24, %v3624_v3  ;;  %v3686_v23 = vadd.s32 32, %v3622_v2 }
   0xc   :  { %v3689_v24 = vsel %vm43_vm13, 1.0, %v3598_v7  ;;  %v3240_v25 = vsel %vm134_vm14, 1.0, %v3598_v7  ;;  %vm27_vm1 = vcmp.ge.s32.totalorder %v16_v9, %v3629_v4  ;;  %v126_v26 = vadd.f32 %v3235_v20, %v3228_v19 }
   0xd   :  { %vm70_vm2 = vcmp.eq.s32.totalorder %v3686_v23, %v3624_v3  ;;  %vm103_vm3 = vcmp.eq.s32.totalorder %v3686_v23, %v3633_v6  ;;  %v3698_v27 = vadd.s32 40, %v3622_v2  ;;  %vm36_vm4 = vcmp.lt.s32.totalorder %v16_v9, %v3647_v11 }
   0xe   :  { %3286 = vmatmul.msk.f32.gmra.mxu2 %vm330_vm0, %v3665_v16  ;;  %v3241_v28 = vsel %vm135_vm15, 1.0, %v3598_v7  ;;  %v3229_v29 = vsel %vm70_vm2, 1.0, %v3598_v7  ;;  %v3236_v30 = vsel %vm103_vm3, 1.0, %v3598_v7  ;;  %v3704_v31 = vadd.f32 %v3240_v25, %v125_v21  ;;  %vm44_vm7 = vmand %vm27_vm1, %vm36_vm4 }
   0xf   :  { %vm168_vm5 = vcmp.eq.s32.totalorder %v3640_v10, %v3683_v22  ;;  %vm136_vm6 = vcmp.eq.s32.totalorder %v3686_v23, %v3657_v14  ;;  %v159_v32 = vadd.f32 %v3241_v28, %v126_v26  ;;  %v127_v33 = vadd.f32 %v3236_v30, %v3229_v29 }
  0x10   :  { %vm71_vm8 = vcmp.eq.s32.totalorder %v3698_v27, %v3624_v3  ;;  %vm104_vm9 = vcmp.eq.s32.totalorder %v3698_v27, %v3633_v6  ;;  %v3246_v34 = vsel %vm168_vm5, 1.0, %v3598_v7  ;;  %v3242_v35 = vsel %vm136_vm6, 1.0, %v3598_v7 }
  0x11   :  { %v3719_v36 = vadd.s32 32, %v3624_v3  ;;  %vm28_vm10 = vcmp.ge.s32.totalorder %v3640_v10, %v3629_v4  ;;  %vm37_vm11 = vcmp.lt.s32.totalorder %v3640_v10, %v3647_v11  ;;  %vm169_vm12 = vcmp.eq.s32.totalorder %v3686_v23, %v3683_v22 }
  0x12   :  { %vm137_vm13 = vcmp.eq.s32.totalorder %v3698_v27, %v3657_v14  ;;  %v3732_v37 = vsel %vm44_vm7, 1.0, %v3598_v7  ;;  %v3230_v38 = vsel %vm71_vm8, 1.0, %v3598_v7  ;;  %v3237_v39 = vsel %vm104_vm9, 1.0, %v3598_v7  ;;  %vm45_vm14 = vmand %vm28_vm10, %vm37_vm11 }
  0x13   :  { %3262 = vmatmul.msk.f32.gmra.mxu0 %vm330_vm0, %v3689_v24  ;;  %v3736_v40 = vadd.f32 %v3246_v34, %v159_v32  ;;  %v160_v41 = vadd.f32 %v3242_v35, %v127_v33  ;;  %v3739_v42 = vadd.s32 40, %v3624_v3  ;;  %v3742_v43 = vadd.s32 48, %v3622_v2  ;;  %v3309_v35 = vld [vmem:[%s4555_s0 + $0x8] sm:$0xff] }
  0x14   :  { %v3247_v44 = vsel %vm169_vm12, 1.0, %v3598_v7  ;;  %vm202_vm15 = vcmp.eq.s32.totalorder %v3686_v23, %v3719_v36  ;;  %v3243_v45 = vsel %vm137_vm13, 1.0, %v3598_v7  ;;  %vm170_vm1 = vcmp.eq.s32.totalorder %v3698_v27, %v3683_v22  ;;  %624 = vmatpush.msrb.mxu0 %v3309_v35 }
  0x15   :  { %v128_v46 = vadd.f32 %v3237_v39, %v3230_v38  ;;  %vm203_vm2 = vcmp.eq.s32.totalorder %v3698_v27, %v3719_v36  ;;  %vm72_vm3 = vcmp.eq.s32.totalorder %v3742_v43, %v3624_v3  ;;  %vm105_vm4 = vcmp.eq.s32.totalorder %v3742_v43, %v3633_v6 }
  0x16   :  { %3287 = vmatmul.msk.f32.gmra.mxu2 %vm330_vm0, %v3704_v31  ;;  %v3231_v47 = vsel %vm72_vm3, 1.0, %v3598_v7  ;;  %v3238_v48 = vsel %vm105_vm4, 1.0, %v3598_v7  ;;  %vm138_vm5 = vcmp.eq.s32.totalorder %v3742_v43, %v3657_v14  ;;  %v3763_v49 = vadd.s32 56, %v3622_v2 }
  0x17   :  { %v3766_v50 = vsel %vm45_vm14, 1.0, %v3598_v7  ;;  %v193_v51 = vadd.f32 %v3247_v44, %v160_v41  ;;  %vm29_vm6 = vcmp.ge.s32.totalorder %v3686_v23, %v3629_v4  ;;  %v3251_v52 = vsel %vm202_vm15, 1.0, %v3598_v7 }
  0x18   :  { %vm38_vm7 = vcmp.lt.s32.totalorder %v3686_v23, %v3647_v11  ;;  %v3248_v53 = vsel %vm170_vm1, 1.0, %v3598_v7  ;;  %v129_v54 = vadd.f32 %v3238_v48, %v3231_v47  ;;  %v161_v55 = vadd.f32 %v3243_v45, %v128_v46 }
  0x19   :  { %v3252_v56 = vsel %vm203_vm2, 1.0, %v3598_v7  ;;  %vm236_vm8 = vcmp.eq.s32.totalorder %v3698_v27, %v3739_v42  ;;  %v3244_v57 = vsel %vm138_vm5, 1.0, %v3598_v7  ;;  %vm171_vm9 = vcmp.eq.s32.totalorder %v3742_v43, %v3683_v22  ;;  %vm46_vm5 = vmand %vm29_vm6, %vm38_vm7 }
  0x1a   :  { %vm73_vm10 = vcmp.eq.s32.totalorder %v3763_v49, %v3624_v3  ;;  %vm106_vm11 = vcmp.eq.s32.totalorder %v3763_v49, %v3633_v6  ;;  %vm139_vm12 = vcmp.eq.s32.totalorder %v3763_v49, %v3657_v14  ;;  %v3791_v58 = vadd.f32 %v3251_v52, %v193_v51 }
  0x1b   :  { %3263 = vmatmul.msk.f32.gmra.mxu0 %vm330_vm0, %v3732_v37  ;;  %v3232_v59 = vsel %vm73_vm10, 1.0, %v3598_v7  ;;  %v3239_v60 = vsel %vm106_vm11, 1.0, %v3598_v7  ;;  %v3245_v61 = vsel %vm139_vm12, 1.0, %v3598_v7  ;;  %v162_v62 = vadd.f32 %v3244_v57, %v129_v54 }
  0x1c   :  { %v130_v63 = vadd.f32 %v3239_v60, %v3232_v59  ;;  %vm172_vm13 = vcmp.eq.s32.totalorder %v3763_v49, %v3683_v22  ;;  %vm205_vm14 = vcmp.eq.s32.totalorder %v3763_v49, %v3719_v36  ;;  %v194_v0 = vadd.f32 %v3248_v53, %v161_v55 }
  0x1d   :  { %v3249_v1 = vsel %vm171_vm9, 1.0, %v3598_v7  ;;  %v263_v2 = vadd.s32 48, %v3624_v3  ;;  %v3250_v5 = vsel %vm172_vm13, 1.0, %v3598_v7  ;;  %vm204_vm15 = vcmp.eq.s32.totalorder %v3742_v43, %v3719_v36 }
  0x1e   :  { %3288 = vmatmul.msk.f32.gmra.mxu2 %vm330_vm0, %v3736_v40  ;;  %v163_v6 = vadd.f32 %v3245_v61, %v130_v63  ;;  %vm238_vm1 = vcmp.eq.s32.totalorder %v3763_v49, %v3739_v42  ;;  %v296_v9 = vadd.s32 56, %v3624_v3  ;;  %vm31_vm2 = vcmp.ge.s32.totalorder %v3742_v43, %v3629_v4 }
  0x1f   :  { %vm40_vm3 = vcmp.lt.s32.totalorder %v3742_v43, %v3647_v11  ;;  %v3254_v10 = vsel %vm205_vm14, 1.0, %v3598_v7  ;;  %vm32_vm4 = vcmp.ge.s32.totalorder %v3763_v49, %v3629_v4  ;;  %v195_v12 = vadd.f32 %v3249_v1, %v162_v62 }
  0x20   :  { %v196_v3 = vadd.f32 %v3250_v5, %v163_v6  ;;  %vm271_vm9 = vcmp.eq.s32.totalorder %v3763_v49, %v263_v2  ;;  %vm41_vm10 = vcmp.lt.s32.totalorder %v3763_v49, %v3647_v11  ;;  %v227_v13 = vadd.f32 %v3252_v56, %v194_v0 }
  0x21   :  { %v3255_v14 = vsel %vm236_vm8, 1.0, %v3598_v7  ;;  %v3253_v17 = vsel %vm204_vm15, 1.0, %v3598_v7  ;;  %v3257_v18 = vsel %vm238_vm1, 1.0, %v3598_v7  ;;  %vm49_vm6 = vmand %vm32_vm4, %vm41_vm10  ;;  %vm237_vm7 = vcmp.eq.s32.totalorder %v3742_v43, %v3739_v42 }
  0x22   :  { %v229_v19 = vadd.f32 %v3254_v10, %v196_v3  ;;  %vm304_vm11 = vcmp.eq.s32.totalorder %v3763_v49, %v296_v9  ;;  %v3841_v20 = vsel %vm49_vm6, 1.0, %v3598_v7  ;;  %v3844_v21 = vsel %vm46_vm5, 1.0, %v3598_v7  ;;  %vm48_vm8 = vmand %vm31_vm2, %vm40_vm3 }
  0x23   :  { %3264 = vmatmul.msk.f32.gmra.mxu0 %vm330_vm0, %v3766_v50  ;;  %v3259_v22 = vsel %vm271_vm9, 1.0, %v3598_v7  ;;  %3269 = vmatpush.xpose.msk.msra.mxu1 %vm330_vm0, %v3841_v20  ;;  %vm30_vm12 = vcmp.ge.s32.totalorder %v3698_v27, %v3629_v4  ;;  %vm39_vm13 = vcmp.lt.s32.totalorder %v3698_v27, %v3647_v11  ;;  %v228_v23 = vadd.f32 %v3253_v17, %v195_v12 }
  0x24   :  { %3318 = vmatpush.xpose.msk.msrb.mxu2 %vm330_vm0, %v3841_v20  ;;  %v262_v25 = vadd.f32 %v3257_v18, %v229_v19  ;;  %v3861_v26 = vadd.f32 %v3255_v14, %v227_v13  ;;  %v3256_v28 = vsel %vm237_vm7, 1.0, %v3598_v7  ;;  %v3260_v29 = vsel %vm304_vm11, 1.0, %v3598_v7  ;;  %vm47_vm15 = vmand %vm30_vm12, %vm39_vm13 }
  0x25   :  { %vm270_vm14 = vcmp.eq.s32.totalorder %v3742_v43, %v263_v2  ;;  %v3869_v30 = vsel %vm48_vm8, 1.0, %v3598_v7  ;;  %v261_v11 = vadd.f32 %v3256_v28, %v228_v23  ;;  %v3222_v33 = vsel %vm47_vm15, 1.0, %v3598_v7 }
  0x26   :  { %3289 = vmatmul.msk.f32.gmra.mxu2 %vm330_vm0, %v3791_v58  ;;  %v295_v4 = vadd.f32 %v3259_v22, %v262_v25  ;;  %v3258_v32 = vsel %vm270_vm14, 1.0, %v3598_v7  ;;  %vm849_vm1 = vcmask 516096   ;;  %vm905_vm2 = vcmask 130048  }
  0x27   :  { %3270 = vmatpush.xpose.msk.msra.mxu1 %vm330_vm0, %v3869_v30  ;;  %v3885_v34 = vadd.f32 %v3258_v32, %v261_v11 }
  0x28   :  { %3319 = vmatpush.xpose.msk.msrb.mxu2 %vm330_vm0, %v3869_v30  ;;  %v3875_v27 = vadd.f32 %v3260_v29, %v295_v4 }
  0x2a   :  { %3293 = vmatpush.xpose.msk.msra.mxu3 %vm330_vm0, %v3875_v27 }
  0x2b   :  { %3265 = vmatmul.msk.f32.gmra.mxu0 %vm330_vm0, %v3844_v21  ;;  %3271 = vmatpush.xpose.msk.msra.mxu1 %vm330_vm0, %v3222_v33 }
  0x2c   :  { %3320 = vmatpush.xpose.msk.msrb.mxu2 %vm330_vm0, %v3222_v33 }
  0x2e   :  { %3290 = vmatmul.msk.f32.gmra.mxu2 %vm330_vm0, %v3861_v26  ;;  %3294 = vmatpush.xpose.msk.msra.mxu3 %vm330_vm0, %v3885_v34 }
  0x2f   :  { %3272 = vmatpush.xpose.msk.msra.mxu1 %vm330_vm0, %v3844_v21 }
  0x30   :  { %3321 = vmatpush.xpose.msk.msrb.mxu2 %vm330_vm0, %v3844_v21 }
  0x32   :  { %3295 = vmatpush.xpose.msk.msra.mxu3 %vm330_vm0, %v3861_v26 }
  0x33   :  { %3266 = vmatmul.msk.f32.gmra.mxu0 %vm330_vm0, %v3222_v33  ;;  %3273 = vmatpush.xpose.msk.msra.mxu1 %vm330_vm0, %v3766_v50 }
  0x34   :  { %3322 = vmatpush.xpose.msk.msrb.mxu2 %vm330_vm0, %v3766_v50 }
  0x36   :  { %3291 = vmatmul.msk.f32.gmra.mxu2 %vm330_vm0, %v3885_v34  ;;  %3296 = vmatpush.xpose.msk.msra.mxu3 %vm330_vm0, %v3791_v58 }
  0x37   :  { %3274 = vmatpush.xpose.msk.msra.mxu1 %vm330_vm0, %v3732_v37 }
  0x38   :  { %3323 = vmatpush.xpose.msk.msrb.mxu2 %vm330_vm0, %v3732_v37 }
  0x3a   :  { %3297 = vmatpush.xpose.msk.msra.mxu3 %vm330_vm0, %v3736_v40 }
  0x3b   :  { %3267 = vmatmul.msk.f32.gmra.mxu0 %vm330_vm0, %v3869_v30  ;;  %3275 = vmatpush.xpose.msk.msra.mxu1 %vm330_vm0, %v3689_v24 }
  0x3c   :  { %3324 = vmatpush.xpose.msk.msrb.mxu2 %vm330_vm0, %v3689_v24 }
  0x3e   :  { %3292 = vmatmul.msk.f32.gmra.mxu2 %vm330_vm0, %v3875_v27  ;;  %3298 = vmatpush.xpose.msk.msra.mxu3 %vm330_vm0, %v3704_v31 }
  0x3f   :  { %3276 = vmatpush.xpose.msk.msra.mxu1 %vm330_vm0, %v3663_v15 }
  0x40   :  { %3325 = vmatpush.xpose.msk.msrb.mxu2 %vm330_vm0, %v3663_v15 }
  0x42   :  { %3299 = vmatpush.xpose.msk.msra.mxu3 %vm330_vm0, %v3665_v16 }
  0x43   :  { %3268 = vmatmul.msk.f32.gmra.mxu0 %vm330_vm0, %v3841_v20  ;;  %730 = vmatpush.msrb.mxu1 %v3309_v35 }
  0x44   :  { %3342 = vmatpush.xpose.msk.msra.mxu2 %vm330_vm0, %v3875_v27 }
  0x46   :  { %3300 = vmatpush.xpose.msk.msra.mxu3 %vm330_vm0, %v3636_v8 }
  0x48   :  { %3343 = vmatpush.xpose.msk.msra.mxu2 %vm330_vm0, %v3885_v34 }
  0x4a   :  { %3499 = vmatpush.xpose.msk.msrb.mxu3 %vm330_vm0, %v3875_v27 }
  0x4b   :  { %3310 = vmatmul.msk.f32.vlgmr.msrb.gmra.mxu0 %vm330_vm0, %v3663_v15 }
  0x4c   :  { %3344 = vmatpush.xpose.msk.msra.mxu2 %vm330_vm0, %v3861_v26 }
  0x4e   :  { %3500 = vmatpush.xpose.msk.msrb.mxu3 %vm330_vm0, %v3885_v34 }
  0x50   :  { %3345 = vmatpush.xpose.msk.msra.mxu2 %vm330_vm0, %v3791_v58 }
  0x52   :  { %3501 = vmatpush.xpose.msk.msrb.mxu3 %vm330_vm0, %v3861_v26 }
  0x53   :  { %3311 = vmatmul.msk.f32.gmra.mxu0 %vm330_vm0, %v3689_v24 }
  0x54   :  { %3346 = vmatpush.xpose.msk.msra.mxu2 %vm330_vm0, %v3736_v40 }
  0x56   :  { %3502 = vmatpush.xpose.msk.msrb.mxu3 %vm330_vm0, %v3791_v58 }
  0x58   :  { %3347 = vmatpush.xpose.msk.msra.mxu2 %vm330_vm0, %v3704_v31 }
  0x5a   :  { %3503 = vmatpush.xpose.msk.msrb.mxu3 %vm330_vm0, %v3736_v40 }
  0x5b   :  { %3312 = vmatmul.msk.f32.gmra.mxu0 %vm330_vm0, %v3732_v37 }
  0x5c   :  { %3348 = vmatpush.xpose.msk.msra.mxu2 %vm330_vm0, %v3665_v16 }
  0x5e   :  { %3504 = vmatpush.xpose.msk.msrb.mxu3 %vm330_vm0, %v3704_v31 }
  0x60   :  { %3349 = vmatpush.xpose.msk.msra.mxu2 %vm330_vm0, %v3636_v8 }
  0x62   :  { %3505 = vmatpush.xpose.msk.msrb.mxu3 %vm330_vm0, %v3665_v16 }
  0x63   :  { %3313 = vmatmul.msk.f32.gmra.mxu0 %vm330_vm0, %v3766_v50 }
  0x66   :  { %3506 = vmatpush.xpose.msk.msrb.mxu3 %vm330_vm0, %v3636_v8 }
  0x6b   :  { %3314 = vmatmul.msk.f32.gmra.mxu0 %vm330_vm0, %v3844_v21 }
  0x73   :  { %3315 = vmatmul.msk.f32.gmra.mxu0 %vm330_vm0, %v3222_v33  ;;  %v848_v33 = vld [vmem:[%s4556_s1] sm:$0x1] }
  0x7b   :  { %3316 = vmatmul.msk.f32.gmra.mxu0 %vm330_vm0, %v3869_v30 }
  0x83   :  { %3317 = vmatmul.msk.f32.gmra.mxu0 %vm330_vm0, %v3841_v20 }
  0x88   :  { %v372_v36 = vpop.f32.mrf.mxu0 }
  0x89   :  { %3277 = vmatmul.msk.f32.vlgmr.msra.gmra.mxu1 %vm330_vm0, %v372_v36  ;;  %v502_v38 = vpop.f32.mrf.mxu2 }
  0x8a   :  { %3301 = vmatmul.msk.f32.vlgmr.msra.gmra.mxu3 %vm330_vm0, %v502_v38 }
  0x90   :  { %v375_v15 = vpop.f32.mrf.mxu0 }
  0x91   :  { %3278 = vmatmul.msk.f32.gmra.mxu1 %vm330_vm0, %v375_v15  ;;  %v505_v39 = vpop.f32.mrf.mxu2 }
  0x92   :  { %3302 = vmatmul.msk.f32.gmra.mxu3 %vm330_vm0, %v505_v39 }
  0x98   :  { %v378_v24 = vpop.f32.mrf.mxu0 }
  0x99   :  { %3279 = vmatmul.msk.f32.gmra.mxu1 %vm330_vm0, %v378_v24  ;;  %v508_v37 = vpop.f32.mrf.mxu2 }
  0x9a   :  { %3303 = vmatmul.msk.f32.gmra.mxu3 %vm330_vm0, %v508_v37 }
  0xa0   :  { %v381_v41 = vpop.f32.mrf.mxu0 }
  0xa1   :  { %3280 = vmatmul.msk.f32.gmra.mxu1 %vm330_vm0, %v381_v41  ;;  %v511_v42 = vpop.f32.mrf.mxu2 }
  0xa2   :  { %3304 = vmatmul.msk.f32.gmra.mxu3 %vm330_vm0, %v511_v42 }
  0xa8   :  { %v384_v43 = vpop.f32.mrf.mxu0 }
  0xa9   :  { %3281 = vmatmul.msk.f32.gmra.mxu1 %vm330_vm0, %v384_v43  ;;  %v514_v44 = vpop.f32.mrf.mxu2 }
  0xaa   :  { %3305 = vmatmul.msk.f32.gmra.mxu3 %vm330_vm0, %v514_v44 }
  0xb0   :  { %v387_v45 = vpop.f32.mrf.mxu0 }
  0xb1   :  { %3282 = vmatmul.msk.f32.gmra.mxu1 %vm330_vm0, %v387_v45  ;;  %v517_v46 = vpop.f32.mrf.mxu2 }
  0xb2   :  { %3306 = vmatmul.msk.f32.gmra.mxu3 %vm330_vm0, %v517_v46 }
  0xb8   :  { %v390_v47 = vpop.f32.mrf.mxu0 }
  0xb9   :  { %3283 = vmatmul.msk.f32.gmra.mxu1 %vm330_vm0, %v390_v47  ;;  %v520_v48 = vpop.f32.mrf.mxu2 }
  0xba   :  { %3307 = vmatmul.msk.f32.gmra.mxu3 %vm330_vm0, %v520_v48 }
  0xc0   :  { %v393_v49 = vpop.f32.mrf.mxu0 }
  0xc1   :  { %3284 = vmatmul.msk.f32.gmra.mxu1 %vm330_vm0, %v393_v49  ;;  %v523_v50 = vpop.f32.mrf.mxu2 }
  0xc2   :  { %3308 = vmatmul.msk.f32.gmra.mxu3 %vm330_vm0, %v523_v50 }
  0xc8   :  { %v626_v51 = vpop.f32.mrf.mxu0 }
  0xc9   :  { %3334 = vmatmul.msk.f32.vlgmr.msrb.gmra.mxu1 %vm330_vm0, %v3636_v8  ;;  %3326 = vmatmul.msk.f32.vlgmr.msrb.gmra.mxu2 %vm330_vm0, %v626_v51 }
  0xd0   :  { %v629_v52 = vpop.f32.mrf.mxu0 }
  0xd1   :  { %3335 = vmatmul.msk.f32.gmra.mxu1 %vm330_vm0, %v3665_v16  ;;  %3327 = vmatmul.msk.f32.gmra.mxu2 %vm330_vm0, %v629_v52 }
  0xd8   :  { %v632_v8 = vpop.f32.mrf.mxu0 }
  0xd9   :  { %3336 = vmatmul.msk.f32.gmra.mxu1 %vm330_vm0, %v3704_v31  ;;  %3328 = vmatmul.msk.f32.gmra.mxu2 %vm330_vm0, %v632_v8 }
  0xe0   :  { %v635_v16 = vpop.f32.mrf.mxu0 }
  0xe1   :  { %3337 = vmatmul.msk.f32.gmra.mxu1 %vm330_vm0, %v3736_v40  ;;  %3329 = vmatmul.msk.f32.gmra.mxu2 %vm330_vm0, %v635_v16 }
  0xe8   :  { %v638_v40 = vpop.f32.mrf.mxu0 }
  0xe9   :  { %3338 = vmatmul.msk.f32.gmra.mxu1 %vm330_vm0, %v3791_v58  ;;  %3330 = vmatmul.msk.f32.gmra.mxu2 %vm330_vm0, %v638_v40 }
  0xf0   :  { %v641_v54 = vpop.f32.mrf.mxu0 }
  0xf1   :  { %3339 = vmatmul.msk.f32.gmra.mxu1 %vm330_vm0, %v3861_v26  ;;  %3331 = vmatmul.msk.f32.gmra.mxu2 %vm330_vm0, %v641_v54 }
  0xf8   :  { %v644_v56 = vpop.f32.mrf.mxu0 }
  0xf9   :  { %3340 = vmatmul.msk.f32.gmra.mxu1 %vm330_vm0, %v3885_v34  ;;  %3332 = vmatmul.msk.f32.gmra.mxu2 %vm330_vm0, %v644_v56 }
 0x100   :  { %v647_v58 = vpop.f32.mrf.mxu0 }
 0x101   :  { %3341 = vmatmul.msk.f32.gmra.mxu1 %vm330_vm0, %v3875_v27  ;;  %3333 = vmatmul.msk.f32.gmra.mxu2 %vm330_vm0, %v647_v58 }
 0x106   :  { %v4016_v31 = vpop.f32.mrf.mxu1 }
 0x10d   :  { %v4038_v12 = vpop.f32.mrf.mxu3 }
 0x10e   :  { %v4019_v53 = vpop.f32.mrf.mxu1 }
 0x115   :  { %v4040_v3 = vpop.f32.mrf.mxu3 }
 0x116   :  { %v4022_v55 = vpop.f32.mrf.mxu1 }
 0x11d   :  { %v573_v13 = vpop.f32.mrf.mxu3 }
 0x11e   :  { %v4025_v57 = vpop.f32.mrf.mxu1  ;;  %v593_v40 = vmul.f32 %v573_v13, %v4022_v55  ;;  %v591_v55 = vmul.f32 %v4038_v12, %v4016_v31 }
 0x125   :  { %v576_v14 = vpop.f32.mrf.mxu3 }
 0x126   :  { %v4028_v59 = vpop.f32.mrf.mxu1  ;;  %v594_v50 = vmul.f32 %v576_v14, %v4025_v57  ;;  %v592_v57 = vmul.f32 %v4040_v3, %v4019_v53 }
 0x12d   :  { %v579_v17 = vpop.f32.mrf.mxu3 }
 0x12e   :  { %v452_v60 = vpop.f32.mrf.mxu1  ;;  %v595_v46 = vmul.f32 %v579_v17, %v4028_v59 }
 0x135   :  { %v582_v18 = vpop.f32.mrf.mxu3 }
 0x136   :  { %v455_v61 = vpop.f32.mrf.mxu1  ;;  %v596_v42 = vmul.f32 %v582_v18, %v452_v60 }
 0x13d   :  { %v585_v20 = vpop.f32.mrf.mxu3 }
 0x13e   :  { %v458_v62 = vpop.f32.mrf.mxu1  ;;  %v597_v39 = vmul.f32 %v585_v20, %v455_v61 }
 0x145   :  { %v588_v22 = vpop.f32.mrf.mxu3 }
 0x146   :  { %v732_v63 = vpop.f32.mrf.mxu1  ;;  %v598_v24 = vmul.f32 %v588_v22, %v458_v62 }
 0x147   :  { %3350 = vmatmul.msk.f32.vlgmr.msra.gmra.mxu2 %vm330_vm0, %v732_v63 }
 0x14c   :  { %v691_v19 = vpop.f32.mrf.mxu2 }
 0x14e   :  { %v735_v0 = vpop.f32.mrf.mxu1 }
 0x14f   :  { %3351 = vmatmul.msk.f32.vlgmr.msrb.gmra.mxu3 %vm330_vm0, %v735_v0 }
 0x154   :  { %v694_v21 = vpop.f32.mrf.mxu2 }
 0x156   :  { %v738_v1 = vpop.f32.mrf.mxu1 }
 0x157   :  { %3352 = vmatmul.msk.f32.gmra.mxu3 %vm330_vm0, %v738_v1 }
 0x15c   :  { %v697_v23 = vpop.f32.mrf.mxu2 }
 0x15e   :  { %v741_v2 = vpop.f32.mrf.mxu1 }
 0x15f   :  { %3353 = vmatmul.msk.f32.gmra.mxu3 %vm330_vm0, %v741_v2 }
 0x164   :  { %v700_v26 = vpop.f32.mrf.mxu2 }
 0x166   :  { %v744_v5 = vpop.f32.mrf.mxu1 }
 0x167   :  { %3354 = vmatmul.msk.f32.gmra.mxu3 %vm330_vm0, %v744_v5 }
 0x16c   :  { %v703_v29 = vpop.f32.mrf.mxu2 }
 0x16e   :  { %v747_v6 = vpop.f32.mrf.mxu1 }
 0x16f   :  { %3355 = vmatmul.msk.f32.gmra.mxu3 %vm330_vm0, %v747_v6 }
 0x174   :  { %v706_v11 = vpop.f32.mrf.mxu2 }
 0x176   :  { %v750_v9 = vpop.f32.mrf.mxu1 }
 0x177   :  { %3356 = vmatmul.msk.f32.gmra.mxu3 %vm330_vm0, %v750_v9 }
 0x17c   :  { %v709_v32 = vpop.f32.mrf.mxu2 }
 0x17e   :  { %v753_v10 = vpop.f32.mrf.mxu1 }
 0x17f   :  { %3357 = vmatmul.msk.f32.gmra.mxu3 %vm330_vm0, %v753_v10  ;;  %vm845_vm0 = vcmask 523264  }
 0x180   :  { %846 = vst.msk [vmem:[%s4557_s2] sm:$0xff] %vm845_vm0, %v3598_v7 }
 0x181   :  { %850 = vst.msk [vmem:[%s4557_s2] sm:$0x1] %vm849_vm1, %v848_v33 }
 0x182   :  { %847 = vst.msk [vmem:[%s4557_s2 + $0x8] sm:$0xff] %vm845_vm0, %v3598_v7 }
 0x184   :  { %v712_v35 = vpop.f32.mrf.mxu2 }
 0x188   :  { %v874_v7 = vld [vmem:[%s4557_s2] sm:$0xff] }
 0x189   :  { %v4062_v38 = vld [vmem:[%s4557_s2 + $0x8] sm:$0xff] }
 0x18a   :  { %3359 = vmatpush.xpose.msk.msrb.mxu2 %vm845_vm0, %v4062_v38  ;;  %923 = vmatpush.msra.mxu0 %v4062_v38 }
 0x18b   :  { %3372 = vmatpush.xpose.msk.msra.mxu3 %vm845_vm0, %v4062_v38 }
 0x18c   :  { %924 = vmatpush.msra.mxu0 %v874_v7 }
 0x18e   :  { %970 = vmatpush.msrb.mxu0 %v4062_v38  ;;  %3360 = vmatpush.xpose.msk.msrb.mxu2 %vm845_vm0, %v874_v7 }
 0x190   :  { %971 = vmatpush.msrb.mxu0 %v874_v7 }
 0x192   :  { %3363 = vmatpush.xpose.msk.msra.mxu2 %vm845_vm0, %v4062_v38 }
 0x196   :  { %3364 = vmatpush.xpose.msk.msra.mxu2 %vm845_vm0, %v874_v7 }
 0x1ca   :  { %v797_v16 = vpop.f32.mrf.mxu2 }
 0x1cb   :  { %v821_v59 = vmul.f32 %v797_v16, %v691_v19 }
 0x1cd   :  { %v829_v0 = vadd.f32 %v821_v59, %v591_v55 }
 0x1cf   :  { %v4104_v2 = vsub.f32 0.0, %v829_v0 }
 0x1d2   :  { %v800_v25 = vpop.f32.mrf.mxu3 }
 0x1d3   :  { %v822_v54 = vmul.f32 %v800_v25, %v694_v21 }
 0x1d5   :  { %v830_v62 = vadd.f32 %v822_v54, %v592_v57 }
 0x1d7   :  { %v4101_v53 = vsub.f32 0.0, %v830_v62 }
 0x1da   :  { %v803_v28 = vpop.f32.mrf.mxu3 }
 0x1db   :  { %v823_v51 = vmul.f32 %v803_v28, %v697_v23 }
 0x1dd   :  { %v831_v60 = vadd.f32 %v823_v51, %v593_v40 }
 0x1df   :  { %v4098_v1 = vsub.f32 0.0, %v831_v60 }
 0x1e2   :  { %v806_v30 = vpop.f32.mrf.mxu3 }
 0x1e3   :  { %v824_v47 = vmul.f32 %v806_v30, %v700_v26 }
 0x1e5   :  { %v832_v56 = vadd.f32 %v824_v47, %v594_v50 }
 0x1e7   :  { %v4095_v63 = vsub.f32 0.0, %v832_v56 }
 0x1ea   :  { %v809_v4 = vpop.f32.mrf.mxu3 }
 0x1eb   :  { %v825_v43 = vmul.f32 %v809_v4, %v703_v29 }
 0x1ed   :  { %v833_v52 = vadd.f32 %v825_v43, %v595_v46 }
 0x1ef   :  { %v4090_v61 = vsub.f32 0.0, %v833_v52 }
 0x1f2   :  { %v812_v27 = vpop.f32.mrf.mxu3 }
 0x1f3   :  { %v826_v37 = vmul.f32 %v812_v27, %v706_v11 }
 0x1f5   :  { %v834_v48 = vadd.f32 %v826_v37, %v596_v42 }
 0x1f7   :  { %v4084_v58 = vsub.f32 0.0, %v834_v48 }
 0x1fa   :  { %v815_v34 = vpop.f32.mrf.mxu3 }
 0x1fb   :  { %v827_v36 = vmul.f32 %v815_v34, %v709_v32 }
 0x1fd   :  { %v835_v44 = vadd.f32 %v827_v36, %v597_v39 }
 0x1ff   :  { %v4080_v8 = vsub.f32 0.0, %v835_v44 }
 0x202   :  { %v818_v15 = vpop.f32.mrf.mxu3 }
 0x203   :  { %v828_v41 = vmul.f32 %v818_v15, %v712_v35 }
 0x205   :  { %v836_v45 = vadd.f32 %v828_v41, %v598_v24 }
 0x207   :  { %v4075_v49 = vsub.f32 0.0, %v836_v45 }
 0x209   :  { %862 = vmatpush.msra.mxu1 %v4075_v49 }
 0x20b   :  { %863 = vmatpush.msra.mxu1 %v4080_v8 }
 0x20d   :  { %864 = vmatpush.msra.mxu1 %v4084_v58 }
 0x20f   :  { %865 = vmatpush.msra.mxu1 %v4090_v61 }
 0x211   :  { %866 = vmatpush.msra.mxu1 %v4095_v63 }
 0x213   :  { %867 = vmatpush.msra.mxu1 %v4098_v1 }
 0x215   :  { %868 = vmatpush.msra.mxu1 %v4101_v53 }
 0x217   :  { %869 = vmatpush.msra.mxu1 %v4104_v2 }
 0x218   :  { %3358 = vmatmul.msk.f32.vlgmr.msra.gmra.mxu1 %vm845_vm0, %v848_v33 }
 0x219   :  { %1076 = vmatpush.msrb.mxu1 %v4062_v38 }
 0x295   :  { %v871_v31 = vpop.f32.mrf.mxu1 }
 0x296   :  { %3361 = vmatmul.msk.f32.vlgmr.msrb.gmra.mxu2 %vm845_vm0, %v871_v31 }
 0x297   :  { %1016 = vmatpush.msrb.mxu2 %v4075_v49 }
 0x299   :  { %1017 = vmatpush.msrb.mxu2 %v4080_v8 }
 0x29b   :  { %1018 = vmatpush.msrb.mxu2 %v4084_v58 }
 0x29d   :  { %1019 = vmatpush.msrb.mxu2 %v4090_v61 }
 0x29f   :  { %1020 = vmatpush.msrb.mxu2 %v4095_v63 }
 0x2a1   :  { %1021 = vmatpush.msrb.mxu2 %v4098_v1 }
 0x2a3   :  { %1022 = vmatpush.msrb.mxu2 %v4101_v53 }
 0x2a5   :  { %1023 = vmatpush.msrb.mxu2 %v4104_v2 }
 0x319   :  { %v902_v5 = vpop.f32.mrf.mxu2 }
 0x31a   :  { %3362 = vmatmul.msk.f32.vlgmr.msra.gmra.mxu0 %vm905_vm2, %v902_v5 }
 0x31b   :  { %3368 = vmatpush.xpose.msk.msra.mxu0 %vm845_vm0, %v4062_v38 }
 0x397   :  { %v926_v6 = vpop.f32.mrf.mxu0 }
 0x398   :  { %v929_v9 = vsub.f32 %v871_v31, %v926_v6 }
 0x39a   :  { %3365 = vmatmul.msk.f32.vlgmr.msra.gmra.mxu2 %vm845_vm0, %v929_v9 }
 0x39b   :  { %1169 = vmatpush.msra.mxu2 %v4075_v49 }
 0x39d   :  { %1170 = vmatpush.msra.mxu2 %v4080_v8 }
 0x39f   :  { %1171 = vmatpush.msra.mxu2 %v4084_v58 }
 0x3a1   :  { %1172 = vmatpush.msra.mxu2 %v4090_v61 }
 0x3a3   :  { %1173 = vmatpush.msra.mxu2 %v4095_v63 }
 0x3a5   :  { %1174 = vmatpush.msra.mxu2 %v4098_v1 }
 0x3a7   :  { %1175 = vmatpush.msra.mxu2 %v4101_v53 }
 0x3a9   :  { %1176 = vmatpush.msra.mxu2 %v4104_v2 }
 0x41d   :  { %v950_v10 = vpop.f32.mrf.mxu2 }
 0x41e   :  { %3366 = vmatmul.msk.f32.vlgmr.msrb.gmra.mxu0 %vm905_vm2, %v950_v10 }
 0x49b   :  { %v973_v12 = vpop.f32.mrf.mxu0 }
 0x49c   :  { %v976_v3 = vsub.f32 %v929_v9, %v973_v12 }
 0x49e   :  { %v977_v13 = vmul.f32 %v976_v3, %v976_v3 }
 0x4a0   :  { %v978_v14 = vsel %vm849_vm1, %v977_v13, 0.0 }
 0x4a1   :  { %979 = vadd.xlane.f32.xlu0 %v978_v14 }
 0x514   :  { %v980_v17 = vpop.xlane.xlu0 %979 }
 0x515   :  { %v981_v18 = vrot.slane %v980_v17, 4 }
 0x517   :  { %v982_v19 = vadd.f32 %v981_v18, %v980_v17 }
 0x519   :  { %v983_v20 = vrot.slane %v982_v19, 2 }
 0x51b   :  { %v984_v21 = vadd.f32 %v983_v20, %v982_v19 }
 0x51d   :  { %v985_v22 = vrot.slane %v984_v21, 1 }
 0x51f   :  { %v986_v23 = vadd.f32 %v985_v22, %v984_v21 }
 0x521   :  { %3507 = vpush %v986_v23 }
 0x552   :  { %s3508_s26 = spop %3507 }
 0x553   :  { %v989_v25 = vstv %s3508_s26  ;;  %p988_p0 = scmp.gt.f32.partialorder %s3508_s26, 1e-30 }
 0x554   :  { %3568 = vrsqrt.f32 %v989_v25  ;;  %vm996_vm4 = vweird.f32 %v989_v25 }
 0x55a   :  { %v3569_v26 = vpop.eup %3568 }
 0x55b   :  { %v991_v28 = vmul.f32 %v3569_v26, %v989_v25  ;;  %vm997_vm3 = vweird.f32 %v3569_v26 }
 0x55c   :  { %vm998_vm5 = vmor %vm996_vm4, %vm997_vm3 }
 0x55d   :  { %v992_v29 = vmul.f32 %v3569_v26, %v991_v28 }
 0x55f   :  { %v993_v30 = vmul.f32 0.5, %v992_v29 }
 0x561   :  { %v994_v4 = vsub.f32 1.5, %v993_v30 }
 0x563   :  { %v995_v11 = vmul.f32 %v3569_v26, %v994_v4 }
 0x565   :  { %v999_v27 = vsel %vm998_vm5, %v3569_v26, %v995_v11 }
 0x566   :  { %3509 = vpush %v999_v27 }
 0x597   :  { %s3510_s27 = spop %3509 }
 0x598   :  { %s4560_s27 = smov (!%p988_p0, %s3510_s27), 0.0 }
 0x599   :  { %v1002_v32 = vstv %s4560_s27 }
 0x59a   :  { %v1003_v33 = vmul.f32 %v1002_v32, %v976_v3 }
 0x59c   :  { %1004 = vst.msk [vmem:[%s4557_s2 + $0x1] sm:$0x1] %vm849_vm1, %v1003_v33  ;;  %3367 = vmatmul.msk.f32.vlgmr.msrb.gmra.mxu2 %vm845_vm0, %v1003_v33 }
 0x59d   :  { %1382 = vmatpush.msrb.mxu2 %v4062_v38 }
 0x5a3   :  { %v1028_v34 = vld [vmem:[%s4557_s2] sm:$0xff] }
 0x5a4   :  { %3369 = vmatpush.xpose.msk.msra.mxu0 %vm845_vm0, %v1028_v34  ;;  %1077 = vmatpush.msrb.mxu1 %v1028_v34 }
 0x5a5   :  { %3373 = vmatpush.xpose.msk.msra.mxu3 %vm845_vm0, %v1028_v34 }
 0x5a6   :  { %3377 = vmatpush.xpose.msk.msra.mxu1 %vm845_vm0, %v4062_v38 }
 0x5a8   :  { %1123 = vmatpush.msrb.mxu0 %v4062_v38 }
 0x5a9   :  { %1229 = vmatpush.msrb.mxu3 %v4062_v38 }
 0x5aa   :  { %1124 = vmatpush.msrb.mxu0 %v1028_v34 }
 0x61f   :  { %v1025_v35 = vpop.f32.mrf.mxu2 }
 0x620   :  { %3370 = vmatmul.msk.f32.vlgmr.msra.gmra.mxu0 %vm845_vm0, %v1025_v35 }
 0x621   :  { %3381 = vmatpush.xpose.msk.msra.mxu0 %vm845_vm0, %v4062_v38 }
 0x69d   :  { %v1056_v36 = vpop.f32.mrf.mxu0 }
 0x69e   :  { %3371 = vmatmul.msk.f32.vlgmr.msrb.gmra.mxu1 %vm905_vm2, %v1056_v36 }
 0x71b   :  { %v1079_v15 = vpop.f32.mrf.mxu1 }
 0x71c   :  { %v1082_v39 = vsub.f32 %v1025_v35, %v1079_v15 }
 0x71e   :  { %3374 = vmatmul.msk.f32.vlgmr.msra.gmra.mxu3 %vm845_vm0, %v1082_v39 }
 0x7a1   :  { %v1103_v24 = vpop.f32.mrf.mxu3 }
 0x7a2   :  { %3375 = vmatmul.msk.f32.vlgmr.msrb.gmra.mxu0 %vm905_vm2, %v1103_v24 }
 0x81f   :  { %v1126_v37 = vpop.f32.mrf.mxu0 }
 0x820   :  { %v1129_v41 = vsub.f32 %v1082_v39, %v1126_v37 }
 0x822   :  { %v1130_v7 = vmul.f32 %v1129_v41, %v1129_v41 }
 0x824   :  { %v1131_v42 = vsel %vm849_vm1, %v1130_v7, 0.0 }
 0x825   :  { %1132 = vadd.xlane.f32.xlu0 %v1131_v42 }
 0x898   :  { %v1133_v43 = vpop.xlane.xlu0 %1132 }
 0x899   :  { %v1134_v44 = vrot.slane %v1133_v43, 4 }
 0x89b   :  { %v1135_v45 = vadd.f32 %v1134_v44, %v1133_v43 }
 0x89d   :  { %v1136_v46 = vrot.slane %v1135_v45, 2 }
 0x89f   :  { %v1137_v47 = vadd.f32 %v1136_v46, %v1135_v45 }
 0x8a1   :  { %v1138_v48 = vrot.slane %v1137_v47, 1 }
 0x8a3   :  { %v1139_v50 = vadd.f32 %v1138_v48, %v1137_v47 }
 0x8a5   :  { %3511 = vpush %v1139_v50 }
 0x8d6   :  { %s3512_s5 = spop %3511 }
 0x8d7   :  { %v1142_v51 = vstv %s3512_s5  ;;  %p1141_p1 = scmp.gt.f32.partialorder %s3512_s5, 1e-30 }
 0x8d8   :  { %3570 = vrsqrt.f32 %v1142_v51  ;;  %vm1149_vm10 = vweird.f32 %v1142_v51 }
 0x8de   :  { %v3571_v52 = vpop.eup %3570 }
 0x8df   :  { %v1144_v16 = vmul.f32 %v3571_v52, %v1142_v51  ;;  %vm1150_vm9 = vweird.f32 %v3571_v52 }
 0x8e0   :  { %vm1151_vm6 = vmor %vm1149_vm10, %vm1150_vm9 }
 0x8e1   :  { %v1145_v40 = vmul.f32 %v3571_v52, %v1144_v16 }
 0x8e3   :  { %v1146_v54 = vmul.f32 0.5, %v1145_v40 }
 0x8e5   :  { %v1147_v56 = vsub.f32 1.5, %v1146_v54 }
 0x8e7   :  { %v1148_v57 = vmul.f32 %v3571_v52, %v1147_v56 }
 0x8e9   :  { %v1152_v59 = vsel %vm1151_vm6, %v3571_v52, %v1148_v57 }
 0x8ea   :  { %3513 = vpush %v1152_v59 }
 0x91b   :  { %s3514_s6 = spop %3513 }
 0x91c   :  { %s4562_s6 = smov (!%p1141_p1, %s3514_s6), 0.0 }
 0x91d   :  { %v1155_v60 = vstv %s4562_s6 }
 0x91e   :  { %v1156_v55 = vmul.f32 %v1155_v60, %v1129_v41 }
 0x920   :  { %1157 = vst.msk [vmem:[%s4557_s2 + $0x2] sm:$0x1] %vm849_vm1, %v1156_v55  ;;  %3376 = vmatmul.msk.f32.vlgmr.msra.gmra.mxu2 %vm845_vm0, %v1156_v55 }
 0x927   :  { %v1181_v62 = vld [vmem:[%s4557_s2] sm:$0xff] }
 0x928   :  { %3378 = vmatpush.xpose.msk.msra.mxu1 %vm845_vm0, %v1181_v62  ;;  %1230 = vmatpush.msrb.mxu3 %v1181_v62 }
 0x929   :  { %3382 = vmatpush.xpose.msk.msra.mxu0 %vm845_vm0, %v1181_v62 }
 0x92a   :  { %1322 = vmatpush.msra.mxu3 %v4075_v49 }
 0x92c   :  { %1276 = vmatpush.msrb.mxu1 %v4062_v38  ;;  %1323 = vmatpush.msra.mxu3 %v4080_v8 }
 0x92d   :  { %3386 = vmatpush.xpose.msk.msrb.mxu0 %vm845_vm0, %v4062_v38 }
 0x92e   :  { %1277 = vmatpush.msrb.mxu1 %v1181_v62  ;;  %1324 = vmatpush.msra.mxu3 %v4084_v58 }
 0x930   :  { %1325 = vmatpush.msra.mxu3 %v4090_v61 }
 0x932   :  { %1326 = vmatpush.msra.mxu3 %v4095_v63 }
 0x934   :  { %1327 = vmatpush.msra.mxu3 %v4098_v1 }
 0x936   :  { %1328 = vmatpush.msra.mxu3 %v4101_v53 }
 0x938   :  { %1329 = vmatpush.msra.mxu3 %v4104_v2 }
 0x9a3   :  { %v1178_v0 = vpop.f32.mrf.mxu2 }
 0x9a4   :  { %3379 = vmatmul.msk.f32.vlgmr.msra.gmra.mxu1 %vm845_vm0, %v1178_v0 }
 0x9a5   :  { %3390 = vmatpush.xpose.msk.msra.mxu1 %vm845_vm0, %v4062_v38 }
 0xa21   :  { %v1209_v31 = vpop.f32.mrf.mxu1 }
 0xa22   :  { %3380 = vmatmul.msk.f32.vlgmr.msrb.gmra.mxu3 %vm905_vm2, %v1209_v31 }
 0xa23   :  { %1535 = vmatpush.msrb.mxu3 %v4062_v38 }
 0xaa5   :  { %v1232_v5 = vpop.f32.mrf.mxu3 }
 0xaa6   :  { %v1235_v6 = vsub.f32 %v1178_v0, %v1232_v5 }
 0xaa8   :  { %3383 = vmatmul.msk.f32.vlgmr.msra.gmra.mxu0 %vm845_vm0, %v1235_v6 }
 0xb25   :  { %v1256_v9 = vpop.f32.mrf.mxu0 }
 0xb26   :  { %3384 = vmatmul.msk.f32.vlgmr.msrb.gmra.mxu1 %vm905_vm2, %v1256_v9 }
 0xba3   :  { %v1279_v10 = vpop.f32.mrf.mxu1 }
 0xba4   :  { %v1282_v12 = vsub.f32 %v1235_v6, %v1279_v10 }
 0xba6   :  { %v1283_v3 = vmul.f32 %v1282_v12, %v1282_v12 }
 0xba8   :  { %v1284_v13 = vsel %vm849_vm1, %v1283_v3, 0.0 }
 0xba9   :  { %1285 = vadd.xlane.f32.xlu1 %v1284_v13 }
 0xc1c   :  { %v1286_v14 = vpop.xlane.xlu1 %1285 }
 0xc1d   :  { %v1287_v17 = vrot.slane %v1286_v14, 4 }
 0xc1f   :  { %v1288_v18 = vadd.f32 %v1287_v17, %v1286_v14 }
 0xc21   :  { %v1289_v19 = vrot.slane %v1288_v18, 2 }
 0xc23   :  { %v1290_v20 = vadd.f32 %v1289_v19, %v1288_v18 }
 0xc25   :  { %v1291_v21 = vrot.slane %v1290_v20, 1 }
 0xc27   :  { %v1292_v22 = vadd.f32 %v1291_v21, %v1290_v20 }
 0xc29   :  { %3515 = vpush %v1292_v22 }
 0xc5a   :  { %s3516_s11 = spop %3515 }
 0xc5b   :  { %v1295_v23 = vstv %s3516_s11  ;;  %p1294_p2 = scmp.gt.f32.partialorder %s3516_s11, 1e-30 }
 0xc5c   :  { %3572 = vrsqrt.f32 %v1295_v23  ;;  %vm1302_vm11 = vweird.f32 %v1295_v23 }
 0xc62   :  { %v3573_v25 = vpop.eup %3572 }
 0xc63   :  { %v1297_v26 = vmul.f32 %v3573_v25, %v1295_v23  ;;  %vm1303_vm7 = vweird.f32 %v3573_v25 }
 0xc64   :  { %vm1304_vm8 = vmor %vm1302_vm11, %vm1303_vm7 }
 0xc65   :  { %v1298_v28 = vmul.f32 %v3573_v25, %v1297_v26 }
 0xc67   :  { %v1299_v29 = vmul.f32 0.5, %v1298_v28 }
 0xc69   :  { %v1300_v30 = vsub.f32 1.5, %v1299_v29 }
 0xc6b   :  { %v1301_v4 = vmul.f32 %v3573_v25, %v1300_v30 }
 0xc6d   :  { %v1305_v11 = vsel %vm1304_vm8, %v3573_v25, %v1301_v4 }
 0xc6e   :  { %3517 = vpush %v1305_v11 }
 0xc9f   :  { %s3518_s12 = spop %3517 }
 0xca0   :  { %s4564_s12 = smov (!%p1294_p2, %s3518_s12), 0.0 }
 0xca1   :  { %v1308_v27 = vstv %s4564_s12 }
 0xca2   :  { %v1309_v32 = vmul.f32 %v1308_v27, %v1282_v12 }
 0xca4   :  { %1310 = vst.msk [vmem:[%s4557_s2 + $0x3] sm:$0x1] %vm849_vm1, %v1309_v32  ;;  %3385 = vmatmul.msk.f32.vlgmr.msra.gmra.mxu3 %vm845_vm0, %v1309_v32 }
 0xcab   :  { %v1334_v33 = vld [vmem:[%s4557_s2] sm:$0xff] }
 0xcac   :  { %3387 = vmatpush.xpose.msk.msrb.mxu0 %vm845_vm0, %v1334_v33  ;;  %1383 = vmatpush.msrb.mxu2 %v1334_v33 }
 0xcad   :  { %3391 = vmatpush.xpose.msk.msra.mxu1 %vm845_vm0, %v1334_v33 }
 0xcae   :  { %1475 = vmatpush.msra.mxu2 %v4075_v49 }
 0xcb0   :  { %1429 = vmatpush.msra.mxu0 %v4062_v38  ;;  %1476 = vmatpush.msra.mxu2 %v4080_v8 }
 0xcb1   :  { %3395 = vmatpush.xpose.msk.msrb.mxu1 %vm845_vm0, %v4062_v38 }
 0xcb2   :  { %1430 = vmatpush.msra.mxu0 %v1334_v33  ;;  %1477 = vmatpush.msra.mxu2 %v4084_v58 }
 0xcb4   :  { %1478 = vmatpush.msra.mxu2 %v4090_v61 }
 0xcb6   :  { %1479 = vmatpush.msra.mxu2 %v4095_v63 }
 0xcb8   :  { %1480 = vmatpush.msra.mxu2 %v4098_v1 }
 0xcba   :  { %1481 = vmatpush.msra.mxu2 %v4101_v53 }
 0xcbc   :  { %1482 = vmatpush.msra.mxu2 %v4104_v2 }
 0xd27   :  { %v1331_v34 = vpop.f32.mrf.mxu3 }
 0xd28   :  { %3388 = vmatmul.msk.f32.vlgmr.msrb.gmra.mxu0 %vm845_vm0, %v1331_v34 }
 0xd29   :  { %3399 = vmatpush.xpose.msk.msrb.mxu0 %vm845_vm0, %v4062_v38 }
 0xda5   :  { %v1362_v35 = vpop.f32.mrf.mxu0 }
 0xda6   :  { %3389 = vmatmul.msk.f32.vlgmr.msrb.gmra.mxu2 %vm905_vm2, %v1362_v35 }
 0xda7   :  { %1688 = vmatpush.msrb.mxu2 %v4062_v38 }
 0xe29   :  { %v1385_v36 = vpop.f32.mrf.mxu2 }
 0xe2a   :  { %v1388_v15 = vsub.f32 %v1331_v34, %v1385_v36 }
 0xe2c   :  { %3392 = vmatmul.msk.f32.vlgmr.msra.gmra.mxu1 %vm845_vm0, %v1388_v15 }
 0xea9   :  { %v1409_v39 = vpop.f32.mrf.mxu1 }
 0xeaa   :  { %3393 = vmatmul.msk.f32.vlgmr.msra.gmra.mxu0 %vm905_vm2, %v1409_v39 }
 0xf27   :  { %v1432_v24 = vpop.f32.mrf.mxu0 }
 0xf28   :  { %v1435_v37 = vsub.f32 %v1388_v15, %v1432_v24 }
 0xf2a   :  { %v1436_v41 = vmul.f32 %v1435_v37, %v1435_v37 }
 0xf2c   :  { %v1437_v7 = vsel %vm849_vm1, %v1436_v41, 0.0 }
 0xf2d   :  { %1438 = vadd.xlane.f32.xlu1 %v1437_v7 }
 0xfa0   :  { %v1439_v42 = vpop.xlane.xlu1 %1438 }
 0xfa1   :  { %v1440_v43 = vrot.slane %v1439_v42, 4 }
 0xfa3   :  { %v1441_v44 = vadd.f32 %v1440_v43, %v1439_v42 }
 0xfa5   :  { %v1442_v45 = vrot.slane %v1441_v44, 2 }
 0xfa7   :  { %v1443_v46 = vadd.f32 %v1442_v45, %v1441_v44 }
 0xfa9   :  { %v1444_v47 = vrot.slane %v1443_v46, 1 }
 0xfab   :  { %v1445_v48 = vadd.f32 %v1444_v47, %v1443_v46 }
 0xfad   :  { %3519 = vpush %v1445_v48 }
 0xfde   :  { %s3520_s16 = spop %3519 }
 0xfdf   :  { %v1448_v50 = vstv %s3520_s16  ;;  %p1447_p3 = scmp.gt.f32.partialorder %s3520_s16, 1e-30 }
 0xfe0   :  { %3574 = vrsqrt.f32 %v1448_v50  ;;  %vm1455_vm13 = vweird.f32 %v1448_v50 }
 0xfe6   :  { %v3575_v51 = vpop.eup %3574 }
 0xfe7   :  { %v1450_v52 = vmul.f32 %v3575_v51, %v1448_v50  ;;  %vm1456_vm12 = vweird.f32 %v3575_v51 }
 0xfe8   :  { %vm1457_vm14 = vmor %vm1455_vm13, %vm1456_vm12 }
 0xfe9   :  { %v1451_v16 = vmul.f32 %v3575_v51, %v1450_v52 }
 0xfeb   :  { %v1452_v40 = vmul.f32 0.5, %v1451_v16 }
 0xfed   :  { %v1453_v54 = vsub.f32 1.5, %v1452_v40 }
 0xfef   :  { %v1454_v56 = vmul.f32 %v3575_v51, %v1453_v54 }
 0xff1   :  { %v1458_v57 = vsel %vm1457_vm14, %v3575_v51, %v1454_v56 }
 0xff2   :  { %3521 = vpush %v1458_v57 }
0x1023   :  { %s3522_s17 = spop %3521 }
0x1024   :  { %s4566_s17 = smov (!%p1447_p3, %s3522_s17), 0.0 }
0x1025   :  { %v1461_v59 = vstv %s4566_s17 }
0x1026   :  { %v1462_v60 = vmul.f32 %v1461_v59, %v1435_v37 }
0x1028   :  { %1463 = vst.msk [vmem:[%s4557_s2 + $0x4] sm:$0x1] %vm849_vm1, %v1462_v60  ;;  %3394 = vmatmul.msk.f32.vlgmr.msra.gmra.mxu2 %vm845_vm0, %v1462_v60 }
0x102f   :  { %v1487_v55 = vld [vmem:[%s4557_s2] sm:$0xff] }
0x1030   :  { %3396 = vmatpush.xpose.msk.msrb.mxu1 %vm845_vm0, %v1487_v55  ;;  %1536 = vmatpush.msrb.mxu3 %v1487_v55 }
0x1031   :  { %3400 = vmatpush.xpose.msk.msrb.mxu0 %vm845_vm0, %v1487_v55 }
0x1032   :  { %1628 = vmatpush.msra.mxu3 %v4075_v49 }
0x1034   :  { %1582 = vmatpush.msra.mxu1 %v4062_v38  ;;  %1629 = vmatpush.msra.mxu3 %v4080_v8 }
0x1035   :  { %3404 = vmatpush.xpose.msk.msra.mxu0 %vm845_vm0, %v4062_v38 }
0x1036   :  { %1583 = vmatpush.msra.mxu1 %v1487_v55  ;;  %1630 = vmatpush.msra.mxu3 %v4084_v58 }
0x1038   :  { %1631 = vmatpush.msra.mxu3 %v4090_v61 }
0x103a   :  { %1632 = vmatpush.msra.mxu3 %v4095_v63 }
0x103c   :  { %1633 = vmatpush.msra.mxu3 %v4098_v1 }
0x103e   :  { %1634 = vmatpush.msra.mxu3 %v4101_v53 }
0x1040   :  { %1635 = vmatpush.msra.mxu3 %v4104_v2 }
0x10ab   :  { %v1484_v62 = vpop.f32.mrf.mxu2 }
0x10ac   :  { %3397 = vmatmul.msk.f32.vlgmr.msrb.gmra.mxu1 %vm845_vm0, %v1484_v62 }
0x10ad   :  { %3408 = vmatpush.xpose.msk.msrb.mxu1 %vm845_vm0, %v4062_v38 }
0x1129   :  { %v1515_v0 = vpop.f32.mrf.mxu1 }
0x112a   :  { %3398 = vmatmul.msk.f32.vlgmr.msrb.gmra.mxu3 %vm905_vm2, %v1515_v0 }
0x112b   :  { %1841 = vmatpush.msrb.mxu3 %v4062_v38 }
0x11ad   :  { %v1538_v31 = vpop.f32.mrf.mxu3 }
0x11ae   :  { %v1541_v5 = vsub.f32 %v1484_v62, %v1538_v31 }
0x11b0   :  { %3401 = vmatmul.msk.f32.vlgmr.msrb.gmra.mxu0 %vm845_vm0, %v1541_v5 }
0x122d   :  { %v1562_v6 = vpop.f32.mrf.mxu0 }
0x122e   :  { %3402 = vmatmul.msk.f32.vlgmr.msra.gmra.mxu1 %vm905_vm2, %v1562_v6 }
0x12ab   :  { %v1585_v9 = vpop.f32.mrf.mxu1 }
0x12ac   :  { %v1588_v10 = vsub.f32 %v1541_v5, %v1585_v9 }
0x12ae   :  { %v1589_v12 = vmul.f32 %v1588_v10, %v1588_v10 }
0x12b0   :  { %v1590_v3 = vsel %vm849_vm1, %v1589_v12, 0.0 }
0x12b1   :  { %1591 = vadd.xlane.f32.xlu2 %v1590_v3 }
0x1324   :  { %v1592_v13 = vpop.xlane.xlu2 %1591 }
0x1325   :  { %v1593_v14 = vrot.slane %v1592_v13, 4 }
0x1327   :  { %v1594_v17 = vadd.f32 %v1593_v14, %v1592_v13 }
0x1329   :  { %v1595_v18 = vrot.slane %v1594_v17, 2 }
0x132b   :  { %v1596_v19 = vadd.f32 %v1595_v18, %v1594_v17 }
0x132d   :  { %v1597_v20 = vrot.slane %v1596_v19, 1 }
0x132f   :  { %v1598_v21 = vadd.f32 %v1597_v20, %v1596_v19 }
0x1331   :  { %3523 = vpush %v1598_v21 }
0x1362   :  { %s3524_s22 = spop %3523 }
0x1363   :  { %v1601_v22 = vstv %s3524_s22  ;;  %p1600_p4 = scmp.gt.f32.partialorder %s3524_s22, 1e-30 }
0x1364   :  { %3576 = vrsqrt.f32 %v1601_v22  ;;  %vm1608_vm3 = vweird.f32 %v1601_v22 }
0x136a   :  { %v3577_v23 = vpop.eup %3576 }
0x136b   :  { %v1603_v25 = vmul.f32 %v3577_v23, %v1601_v22  ;;  %vm1609_vm15 = vweird.f32 %v3577_v23 }
0x136c   :  { %vm1610_vm4 = vmor %vm1608_vm3, %vm1609_vm15 }
0x136d   :  { %v1604_v26 = vmul.f32 %v3577_v23, %v1603_v25 }
0x136f   :  { %v1605_v28 = vmul.f32 0.5, %v1604_v26 }
0x1371   :  { %v1606_v29 = vsub.f32 1.5, %v1605_v28 }
0x1373   :  { %v1607_v30 = vmul.f32 %v3577_v23, %v1606_v29 }
0x1375   :  { %v1611_v4 = vsel %vm1610_vm4, %v3577_v23, %v1607_v30 }
0x1376   :  { %3525 = vpush %v1611_v4 }
0x13a7   :  { %s3526_s23 = spop %3525 }
0x13a8   :  { %s4568_s23 = smov (!%p1600_p4, %s3526_s23), 0.0 }
0x13a9   :  { %v1614_v11 = vstv %s4568_s23 }
0x13aa   :  { %v1615_v27 = vmul.f32 %v1614_v11, %v1588_v10 }
0x13ac   :  { %1616 = vst.msk [vmem:[%s4557_s2 + $0x5] sm:$0x1] %vm849_vm1, %v1615_v27  ;;  %3403 = vmatmul.msk.f32.vlgmr.msra.gmra.mxu3 %vm845_vm0, %v1615_v27 }
0x13b3   :  { %v1640_v32 = vld [vmem:[%s4557_s2] sm:$0xff] }
0x13b4   :  { %3405 = vmatpush.xpose.msk.msra.mxu0 %vm845_vm0, %v1640_v32  ;;  %1689 = vmatpush.msrb.mxu2 %v1640_v32 }
0x13b5   :  { %3409 = vmatpush.xpose.msk.msrb.mxu1 %vm845_vm0, %v1640_v32 }
0x13b6   :  { %1781 = vmatpush.msra.mxu2 %v4075_v49 }
0x13b8   :  { %1735 = vmatpush.msrb.mxu0 %v4062_v38  ;;  %1782 = vmatpush.msra.mxu2 %v4080_v8 }
0x13b9   :  { %3413 = vmatpush.xpose.msk.msra.mxu1 %vm845_vm0, %v4062_v38 }
0x13ba   :  { %1736 = vmatpush.msrb.mxu0 %v1640_v32  ;;  %1783 = vmatpush.msra.mxu2 %v4084_v58 }
0x13bc   :  { %1784 = vmatpush.msra.mxu2 %v4090_v61 }
0x13be   :  { %1785 = vmatpush.msra.mxu2 %v4095_v63 }
0x13c0   :  { %1786 = vmatpush.msra.mxu2 %v4098_v1 }
0x13c2   :  { %1787 = vmatpush.msra.mxu2 %v4101_v53 }
0x13c4   :  { %1788 = vmatpush.msra.mxu2 %v4104_v2 }
0x142f   :  { %v1637_v33 = vpop.f32.mrf.mxu3 }
0x1430   :  { %3406 = vmatmul.msk.f32.vlgmr.msra.gmra.mxu0 %vm845_vm0, %v1637_v33 }
0x1431   :  { %3417 = vmatpush.xpose.msk.msra.mxu0 %vm845_vm0, %v4062_v38 }
0x14ad   :  { %v1668_v34 = vpop.f32.mrf.mxu0 }
0x14ae   :  { %3407 = vmatmul.msk.f32.vlgmr.msrb.gmra.mxu2 %vm905_vm2, %v1668_v34 }
0x14af   :  { %1994 = vmatpush.msrb.mxu2 %v4062_v38 }
0x1531   :  { %v1691_v35 = vpop.f32.mrf.mxu2 }
0x1532   :  { %v1694_v36 = vsub.f32 %v1637_v33, %v1691_v35 }
0x1534   :  { %3410 = vmatmul.msk.f32.vlgmr.msrb.gmra.mxu1 %vm845_vm0, %v1694_v36 }
0x15b1   :  { %v1715_v15 = vpop.f32.mrf.mxu1 }
0x15b2   :  { %3411 = vmatmul.msk.f32.vlgmr.msrb.gmra.mxu0 %vm905_vm2, %v1715_v15 }
0x162f   :  { %v1738_v39 = vpop.f32.mrf.mxu0 }
0x1630   :  { %v1741_v24 = vsub.f32 %v1694_v36, %v1738_v39 }
0x1632   :  { %v1742_v37 = vmul.f32 %v1741_v24, %v1741_v24 }
0x1634   :  { %v1743_v41 = vsel %vm849_vm1, %v1742_v37, 0.0 }
0x1635   :  { %1744 = vadd.xlane.f32.xlu2 %v1743_v41 }
0x16a8   :  { %v1745_v7 = vpop.xlane.xlu2 %1744 }
0x16a9   :  { %v1746_v42 = vrot.slane %v1745_v7, 4 }
0x16ab   :  { %v1747_v43 = vadd.f32 %v1746_v42, %v1745_v7 }
0x16ad   :  { %v1748_v44 = vrot.slane %v1747_v43, 2 }
0x16af   :  { %v1749_v45 = vadd.f32 %v1748_v44, %v1747_v43 }
0x16b1   :  { %v1750_v46 = vrot.slane %v1749_v45, 1 }
0x16b3   :  { %v1751_v47 = vadd.f32 %v1750_v46, %v1749_v45 }
0x16b5   :  { %3527 = vpush %v1751_v47 }
0x16e6   :  { %s3528_s27 = spop %3527 }
0x16e7   :  { %v1754_v48 = vstv %s3528_s27  ;;  %p1753_p5 = scmp.gt.f32.partialorder %s3528_s27, 1e-30 }
0x16e8   :  { %3578 = vrsqrt.f32 %v1754_v48  ;;  %vm1761_vm9 = vweird.f32 %v1754_v48 }
0x16ee   :  { %v3579_v50 = vpop.eup %3578 }
0x16ef   :  { %v1756_v51 = vmul.f32 %v3579_v50, %v1754_v48  ;;  %vm1762_vm5 = vweird.f32 %v3579_v50 }
0x16f0   :  { %vm1763_vm10 = vmor %vm1761_vm9, %vm1762_vm5 }
0x16f1   :  { %v1757_v52 = vmul.f32 %v3579_v50, %v1756_v51 }
0x16f3   :  { %v1758_v16 = vmul.f32 0.5, %v1757_v52 }
0x16f5   :  { %v1759_v40 = vsub.f32 1.5, %v1758_v16 }
0x16f7   :  { %v1760_v54 = vmul.f32 %v3579_v50, %v1759_v40 }
0x16f9   :  { %v1764_v56 = vsel %vm1763_vm10, %v3579_v50, %v1760_v54 }
0x16fa   :  { %3529 = vpush %v1764_v56 }
0x172b   :  { %s3530_s28 = spop %3529 }
0x172c   :  { %s4570_s28 = smov (!%p1753_p5, %s3530_s28), 0.0 }
0x172d   :  { %v1767_v57 = vstv %s4570_s28 }
0x172e   :  { %v1768_v59 = vmul.f32 %v1767_v57, %v1741_v24 }
0x1730   :  { %1769 = vst.msk [vmem:[%s4557_s2 + $0x6] sm:$0x1] %vm849_vm1, %v1768_v59  ;;  %3412 = vmatmul.msk.f32.vlgmr.msra.gmra.mxu2 %vm845_vm0, %v1768_v59 }
0x1737   :  { %v1793_v60 = vld [vmem:[%s4557_s2] sm:$0xff] }
0x1738   :  { %3414 = vmatpush.xpose.msk.msra.mxu1 %vm845_vm0, %v1793_v60  ;;  %1842 = vmatpush.msrb.mxu3 %v1793_v60 }
0x1739   :  { %3418 = vmatpush.xpose.msk.msra.mxu0 %vm845_vm0, %v1793_v60 }
0x173a   :  { %1934 = vmatpush.msra.mxu3 %v4075_v49 }
0x173c   :  { %1888 = vmatpush.msrb.mxu1 %v4062_v38  ;;  %1935 = vmatpush.msra.mxu3 %v4080_v8 }
0x173d   :  { %3422 = vmatpush.xpose.msk.msrb.mxu0 %vm845_vm0, %v4062_v38 }
0x173e   :  { %1889 = vmatpush.msrb.mxu1 %v1793_v60  ;;  %1936 = vmatpush.msra.mxu3 %v4084_v58 }
0x1740   :  { %1937 = vmatpush.msra.mxu3 %v4090_v61 }
0x1742   :  { %1938 = vmatpush.msra.mxu3 %v4095_v63 }
0x1744   :  { %1939 = vmatpush.msra.mxu3 %v4098_v1 }
0x1746   :  { %1940 = vmatpush.msra.mxu3 %v4101_v53 }
0x1748   :  { %1941 = vmatpush.msra.mxu3 %v4104_v2 }
0x17b3   :  { %v1790_v55 = vpop.f32.mrf.mxu2 }
0x17b4   :  { %3415 = vmatmul.msk.f32.vlgmr.msra.gmra.mxu1 %vm845_vm0, %v1790_v55 }
0x17b5   :  { %3426 = vmatpush.xpose.msk.msra.mxu1 %vm845_vm0, %v4062_v38 }
0x1831   :  { %v1821_v62 = vpop.f32.mrf.mxu1 }
0x1832   :  { %3416 = vmatmul.msk.f32.vlgmr.msrb.gmra.mxu3 %vm905_vm2, %v1821_v62 }
0x18b5   :  { %v1844_v0 = vpop.f32.mrf.mxu3 }
0x18b6   :  { %v1847_v31 = vsub.f32 %v1790_v55, %v1844_v0 }
0x18b8   :  { %3419 = vmatmul.msk.f32.vlgmr.msra.gmra.mxu0 %vm845_vm0, %v1847_v31 }
0x1935   :  { %v1868_v5 = vpop.f32.mrf.mxu0 }
0x1936   :  { %3420 = vmatmul.msk.f32.vlgmr.msrb.gmra.mxu1 %vm905_vm2, %v1868_v5 }
0x19b3   :  { %v1891_v6 = vpop.f32.mrf.mxu1 }
0x19b4   :  { %v1894_v9 = vsub.f32 %v1847_v31, %v1891_v6 }
0x19b6   :  { %v1895_v10 = vmul.f32 %v1894_v9, %v1894_v9 }
0x19b8   :  { %v1896_v12 = vsel %vm849_vm1, %v1895_v10, 0.0 }
0x19b9   :  { %1897 = vadd.xlane.f32.xlu0 %v1896_v12 }
0x1a2c   :  { %v1898_v3 = vpop.xlane.xlu0 %1897 }
0x1a2d   :  { %v1899_v13 = vrot.slane %v1898_v3, 4 }
0x1a2f   :  { %v1900_v14 = vadd.f32 %v1899_v13, %v1898_v3 }
0x1a31   :  { %v1901_v17 = vrot.slane %v1900_v14, 2 }
0x1a33   :  { %v1902_v18 = vadd.f32 %v1901_v17, %v1900_v14 }
0x1a35   :  { %v1903_v19 = vrot.slane %v1902_v18, 1 }
0x1a37   :  { %v1904_v20 = vadd.f32 %v1903_v19, %v1902_v18 }
0x1a39   :  { %3531 = vpush %v1904_v20 }
0x1a6a   :  { %s3532_s6 = spop %3531 }
0x1a6b   :  { %v1907_v21 = vstv %s3532_s6  ;;  %p1906_p6 = scmp.gt.f32.partialorder %s3532_s6, 1e-30 }
0x1a6c   :  { %3580 = vrsqrt.f32 %v1907_v21  ;;  %vm1914_vm7 = vweird.f32 %v1907_v21 }
0x1a72   :  { %v3581_v22 = vpop.eup %3580 }
0x1a73   :  { %v1909_v23 = vmul.f32 %v3581_v22, %v1907_v21  ;;  %vm1915_vm6 = vweird.f32 %v3581_v22 }
0x1a74   :  { %vm1916_vm11 = vmor %vm1914_vm7, %vm1915_vm6 }
0x1a75   :  { %v1910_v25 = vmul.f32 %v3581_v22, %v1909_v23 }
0x1a77   :  { %v1911_v26 = vmul.f32 0.5, %v1910_v25 }
0x1a79   :  { %v1912_v28 = vsub.f32 1.5, %v1911_v26 }
0x1a7b   :  { %v1913_v29 = vmul.f32 %v3581_v22, %v1912_v28 }
0x1a7d   :  { %v1917_v30 = vsel %vm1916_vm11, %v3581_v22, %v1913_v29 }
0x1a7e   :  { %3533 = vpush %v1917_v30 }
0x1aaf   :  { %s3534_s7 = spop %3533 }
0x1ab0   :  { %s4572_s7 = smov (!%p1906_p6, %s3534_s7), 0.0 }
0x1ab1   :  { %v1920_v4 = vstv %s4572_s7 }
0x1ab2   :  { %v1921_v11 = vmul.f32 %v1920_v4, %v1894_v9 }
0x1ab4   :  { %1922 = vst.msk [vmem:[%s4557_s2 + $0x7] sm:$0x1] %vm849_vm1, %v1921_v11  ;;  %3421 = vmatmul.msk.f32.vlgmr.msra.gmra.mxu3 %vm845_vm0, %v1921_v11 }
0x1abb   :  { %v4307_v27 = vld [vmem:[%s4557_s2] sm:$0xff] }
0x1abc   :  { %3423 = vmatpush.xpose.msk.msrb.mxu0 %vm845_vm0, %v4307_v27  ;;  %1995 = vmatpush.msrb.mxu2 %v4307_v27 }
0x1abd   :  { %3427 = vmatpush.xpose.msk.msra.mxu1 %vm845_vm0, %v4307_v27 }
0x1abe   :  { %2087 = vmatpush.msra.mxu2 %v4075_v49 }
0x1ac0   :  { %2041 = vmatpush.msra.mxu0 %v4062_v38  ;;  %2088 = vmatpush.msra.mxu2 %v4080_v8 }
0x1ac2   :  { %2042 = vmatpush.msra.mxu0 %v4307_v27  ;;  %2089 = vmatpush.msra.mxu2 %v4084_v58 }
0x1ac4   :  { %2090 = vmatpush.msra.mxu2 %v4090_v61 }
0x1ac6   :  { %2091 = vmatpush.msra.mxu2 %v4095_v63 }
0x1ac8   :  { %2092 = vmatpush.msra.mxu2 %v4098_v1 }
0x1aca   :  { %2093 = vmatpush.msra.mxu2 %v4101_v53 }
0x1acc   :  { %2094 = vmatpush.msra.mxu2 %v4104_v2 }
0x1b37   :  { %v1943_v32 = vpop.f32.mrf.mxu3 }
0x1b38   :  { %3424 = vmatmul.msk.f32.vlgmr.msrb.gmra.mxu0 %vm845_vm0, %v1943_v32 }
0x1bb5   :  { %v1974_v38 = vpop.f32.mrf.mxu0 }
0x1bb6   :  { %3425 = vmatmul.msk.f32.vlgmr.msrb.gmra.mxu2 %vm905_vm2, %v1974_v38 }
0x1c39   :  { %v1997_v33 = vpop.f32.mrf.mxu2 }
0x1c3a   :  { %v2000_v34 = vsub.f32 %v1943_v32, %v1997_v33 }
0x1c3c   :  { %3428 = vmatmul.msk.f32.vlgmr.msra.gmra.mxu1 %vm845_vm0, %v2000_v34 }
0x1cb9   :  { %v2021_v35 = vpop.f32.mrf.mxu1 }
0x1cba   :  { %3429 = vmatmul.msk.f32.vlgmr.msra.gmra.mxu0 %vm905_vm2, %v2021_v35 }
0x1d37   :  { %v2044_v36 = vpop.f32.mrf.mxu0 }
0x1d38   :  { %v2047_v15 = vsub.f32 %v2000_v34, %v2044_v36 }
0x1d3a   :  { %v2048_v39 = vmul.f32 %v2047_v15, %v2047_v15 }
0x1d3c   :  { %v2049_v24 = vsel %vm849_vm1, %v2048_v39, 0.0 }
0x1d3d   :  { %2050 = vadd.xlane.f32.xlu1 %v2049_v24 }
0x1db0   :  { %v2051_v37 = vpop.xlane.xlu1 %2050 }
0x1db1   :  { %v2052_v41 = vrot.slane %v2051_v37, 4 }
0x1db3   :  { %v2053_v7 = vadd.f32 %v2052_v41, %v2051_v37 }
0x1db5   :  { %v2054_v42 = vrot.slane %v2053_v7, 2 }
0x1db7   :  { %v2055_v43 = vadd.f32 %v2054_v42, %v2053_v7 }
0x1db9   :  { %v2056_v44 = vrot.slane %v2055_v43, 1 }
0x1dbb   :  { %v2057_v45 = vadd.f32 %v2056_v44, %v2055_v43 }
0x1dbd   :  { %3535 = vpush %v2057_v45 }
0x1dee   :  { %s3536_s12 = spop %3535 }
0x1def   :  { %v2060_v46 = vstv %s3536_s12  ;;  %p2059_p7 = scmp.gt.f32.partialorder %s3536_s12, 1e-30 }
0x1df0   :  { %3582 = vrsqrt.f32 %v2060_v46  ;;  %vm2067_vm12 = vweird.f32 %v2060_v46 }
0x1df6   :  { %v3583_v47 = vpop.eup %3582 }
0x1df7   :  { %v2062_v48 = vmul.f32 %v3583_v47, %v2060_v46  ;;  %vm2068_vm8 = vweird.f32 %v3583_v47 }
0x1df8   :  { %vm2069_vm13 = vmor %vm2067_vm12, %vm2068_vm8 }
0x1df9   :  { %v2063_v50 = vmul.f32 %v3583_v47, %v2062_v48 }
0x1dfb   :  { %v2064_v51 = vmul.f32 0.5, %v2063_v50 }
0x1dfd   :  { %v2065_v52 = vsub.f32 1.5, %v2064_v51 }
0x1dff   :  { %v2066_v16 = vmul.f32 %v3583_v47, %v2065_v52 }
0x1e01   :  { %v2070_v40 = vsel %vm2069_vm13, %v3583_v47, %v2066_v16 }
0x1e02   :  { %3537 = vpush %v2070_v40 }
0x1e33   :  { %s3538_s13 = spop %3537 }
0x1e34   :  { %s4574_s13 = smov (!%p2059_p7, %s3538_s13), 0.0 }
0x1e35   :  { %v2073_v54 = vstv %s4574_s13 }
0x1e36   :  { %v2074_v56 = vmul.f32 %v2073_v54, %v2047_v15 }
0x1e38   :  { %2075 = vst.msk [vmem:[%s4557_s2 + $0x8] sm:$0x1] %vm849_vm1, %v2074_v56  ;;  %3430 = vmatmul.msk.f32.vlgmr.msra.gmra.mxu2 %vm845_vm0, %v2074_v56 }
0x1e3f   :  { %v2100_v57 = vld [vmem:[%s4557_s2 + $0x8] sm:$0xff] }
0x1e40   :  { %3431 = vmatpush.xpose.msk.msrb.mxu1 %vm845_vm0, %v2100_v57  ;;  %2147 = vmatpush.msrb.mxu3 %v2100_v57 }
0x1e41   :  { %3435 = vmatpush.xpose.msk.msrb.mxu0 %vm845_vm0, %v2100_v57 }
0x1e42   :  { %2148 = vmatpush.msrb.mxu3 %v4307_v27 }
0x1e44   :  { %2240 = vmatpush.msra.mxu3 %v4075_v49  ;;  %3432 = vmatpush.xpose.msk.msrb.mxu1 %vm845_vm0, %v4307_v27 }
0x1e45   :  { %3436 = vmatpush.xpose.msk.msrb.mxu0 %vm845_vm0, %v4307_v27 }
0x1e46   :  { %2241 = vmatpush.msra.mxu3 %v4080_v8 }
0x1e48   :  { %2194 = vmatpush.msra.mxu1 %v2100_v57  ;;  %2242 = vmatpush.msra.mxu3 %v4084_v58 }
0x1e4a   :  { %2195 = vmatpush.msra.mxu1 %v4307_v27  ;;  %2243 = vmatpush.msra.mxu3 %v4090_v61 }
0x1e4c   :  { %2244 = vmatpush.msra.mxu3 %v4095_v63 }
0x1e4e   :  { %2245 = vmatpush.msra.mxu3 %v4098_v1 }
0x1e50   :  { %2246 = vmatpush.msra.mxu3 %v4101_v53 }
0x1e52   :  { %2247 = vmatpush.msra.mxu3 %v4104_v2 }
0x1ebb   :  { %v2096_v59 = vpop.f32.mrf.mxu2 }
0x1ebc   :  { %3433 = vmatmul.msk.f32.vlgmr.msrb.gmra.mxu1 %vm845_vm0, %v2096_v59 }
0x1f39   :  { %v2127_v60 = vpop.f32.mrf.mxu1 }
0x1f3a   :  { %3434 = vmatmul.msk.f32.vlgmr.msrb.gmra.mxu3 %vm905_vm2, %v2127_v60 }
0x1fbd   :  { %v2150_v55 = vpop.f32.mrf.mxu3 }
0x1fbe   :  { %v2153_v62 = vsub.f32 %v2096_v59, %v2150_v55 }
0x1fc0   :  { %3437 = vmatmul.msk.f32.vlgmr.msrb.gmra.mxu0 %vm845_vm0, %v2153_v62 }
0x203d   :  { %v2174_v0 = vpop.f32.mrf.mxu0 }
0x203e   :  { %3438 = vmatmul.msk.f32.vlgmr.msra.gmra.mxu1 %vm905_vm2, %v2174_v0 }
0x20bb   :  { %v2197_v31 = vpop.f32.mrf.mxu1 }
0x20bc   :  { %v2200_v5 = vsub.f32 %v2153_v62, %v2197_v31 }
0x20be   :  { %v2201_v6 = vmul.f32 %v2200_v5, %v2200_v5 }
0x20c0   :  { %v2202_v9 = vsel %vm849_vm1, %v2201_v6, 0.0 }
0x20c1   :  { %2203 = vadd.xlane.f32.xlu2 %v2202_v9 }
0x2134   :  { %v2204_v10 = vpop.xlane.xlu2 %2203 }
0x2135   :  { %v2205_v12 = vrot.slane %v2204_v10, 4 }
0x2137   :  { %v2206_v3 = vadd.f32 %v2205_v12, %v2204_v10 }
0x2139   :  { %v2207_v13 = vrot.slane %v2206_v3, 2 }
0x213b   :  { %v2208_v14 = vadd.f32 %v2207_v13, %v2206_v3 }
0x213d   :  { %v2209_v17 = vrot.slane %v2208_v14, 1 }
0x213f   :  { %v2210_v18 = vadd.f32 %v2209_v17, %v2208_v14 }
0x2141   :  { %3539 = vpush %v2210_v18 }
0x2172   :  { %s3540_s17 = spop %3539 }
0x2173   :  { %v2213_v19 = vstv %s3540_s17  ;;  %p2212_p8 = scmp.gt.f32.partialorder %s3540_s17, 1e-30 }
0x2174   :  { %3584 = vrsqrt.f32 %v2213_v19  ;;  %vm2220_vm15 = vweird.f32 %v2213_v19 }
0x217a   :  { %v3585_v20 = vpop.eup %3584 }
0x217b   :  { %v2215_v21 = vmul.f32 %v3585_v20, %v2213_v19  ;;  %vm2221_vm14 = vweird.f32 %v3585_v20 }
0x217c   :  { %vm2222_vm3 = vmor %vm2220_vm15, %vm2221_vm14 }
0x217d   :  { %v2216_v22 = vmul.f32 %v3585_v20, %v2215_v21 }
0x217f   :  { %v2217_v23 = vmul.f32 0.5, %v2216_v22 }
0x2181   :  { %v2218_v25 = vsub.f32 1.5, %v2217_v23 }
0x2183   :  { %v2219_v26 = vmul.f32 %v3585_v20, %v2218_v25 }
0x2185   :  { %v2223_v28 = vsel %vm2222_vm3, %v3585_v20, %v2219_v26 }
0x2186   :  { %3541 = vpush %v2223_v28 }
0x21b7   :  { %s3542_s18 = spop %3541 }
0x21b8   :  { %s4576_s18 = smov (!%p2212_p8, %s3542_s18), 0.0 }
0x21b9   :  { %v2226_v29 = vstv %s4576_s18 }
0x21ba   :  { %v2227_v30 = vmul.f32 %v2226_v29, %v2200_v5 }
0x21bc   :  { %2228 = vst.msk [vmem:[%s4557_s2 + $0x9] sm:$0x1] %vm849_vm1, %v2227_v30  ;;  %3439 = vmatmul.msk.f32.vlgmr.msra.gmra.mxu3 %vm845_vm0, %v2227_v30 }
0x21c3   :  { %v2253_v4 = vld [vmem:[%s4557_s2 + $0x8] sm:$0xff] }
0x21c4   :  { %3440 = vmatpush.xpose.msk.msra.mxu0 %vm845_vm0, %v2253_v4  ;;  %2300 = vmatpush.msrb.mxu2 %v2253_v4 }
0x21c5   :  { %3444 = vmatpush.xpose.msk.msrb.mxu1 %vm845_vm0, %v2253_v4 }
0x21c6   :  { %2301 = vmatpush.msrb.mxu2 %v4307_v27 }
0x21c8   :  { %2393 = vmatpush.msra.mxu2 %v4075_v49  ;;  %3441 = vmatpush.xpose.msk.msra.mxu0 %vm845_vm0, %v4307_v27 }
0x21c9   :  { %3445 = vmatpush.xpose.msk.msrb.mxu1 %vm845_vm0, %v4307_v27 }
0x21ca   :  { %2394 = vmatpush.msra.mxu2 %v4080_v8 }
0x21cc   :  { %2347 = vmatpush.msrb.mxu0 %v2253_v4  ;;  %2395 = vmatpush.msra.mxu2 %v4084_v58 }
0x21ce   :  { %2348 = vmatpush.msrb.mxu0 %v4307_v27  ;;  %2396 = vmatpush.msra.mxu2 %v4090_v61 }
0x21d0   :  { %2397 = vmatpush.msra.mxu2 %v4095_v63 }
0x21d2   :  { %2398 = vmatpush.msra.mxu2 %v4098_v1 }
0x21d4   :  { %2399 = vmatpush.msra.mxu2 %v4101_v53 }
0x21d6   :  { %2400 = vmatpush.msra.mxu2 %v4104_v2 }
0x223f   :  { %v2249_v11 = vpop.f32.mrf.mxu3 }
0x2240   :  { %3442 = vmatmul.msk.f32.vlgmr.msra.gmra.mxu0 %vm845_vm0, %v2249_v11 }
0x22bd   :  { %v2280_v32 = vpop.f32.mrf.mxu0 }
0x22be   :  { %3443 = vmatmul.msk.f32.vlgmr.msrb.gmra.mxu2 %vm905_vm2, %v2280_v32 }
0x2341   :  { %v2303_v38 = vpop.f32.mrf.mxu2 }
0x2342   :  { %v2306_v33 = vsub.f32 %v2249_v11, %v2303_v38 }
0x2344   :  { %3446 = vmatmul.msk.f32.vlgmr.msrb.gmra.mxu1 %vm845_vm0, %v2306_v33 }
0x23c1   :  { %v2327_v34 = vpop.f32.mrf.mxu1 }
0x23c2   :  { %3447 = vmatmul.msk.f32.vlgmr.msrb.gmra.mxu0 %vm905_vm2, %v2327_v34 }
0x243f   :  { %v2350_v35 = vpop.f32.mrf.mxu0 }
0x2440   :  { %v2353_v36 = vsub.f32 %v2306_v33, %v2350_v35 }
0x2442   :  { %v2354_v15 = vmul.f32 %v2353_v36, %v2353_v36 }
0x2444   :  { %v2355_v39 = vsel %vm849_vm1, %v2354_v15, 0.0 }
0x2445   :  { %2356 = vadd.xlane.f32.xlu0 %v2355_v39 }
0x24b8   :  { %v2357_v24 = vpop.xlane.xlu0 %2356 }
0x24b9   :  { %v2358_v37 = vrot.slane %v2357_v24, 4 }
0x24bb   :  { %v2359_v41 = vadd.f32 %v2358_v37, %v2357_v24 }
0x24bd   :  { %v2360_v7 = vrot.slane %v2359_v41, 2 }
0x24bf   :  { %v2361_v42 = vadd.f32 %v2360_v7, %v2359_v41 }
0x24c1   :  { %v2362_v43 = vrot.slane %v2361_v42, 1 }
0x24c3   :  { %v2363_v44 = vadd.f32 %v2362_v43, %v2361_v42 }
0x24c5   :  { %3543 = vpush %v2363_v44 }
0x24f6   :  { %s3544_s23 = spop %3543 }
0x24f7   :  { %v2366_v45 = vstv %s3544_s23  ;;  %p2365_p9 = scmp.gt.f32.partialorder %s3544_s23, 1e-30 }
0x24f8   :  { %3586 = vrsqrt.f32 %v2366_v45  ;;  %vm2373_vm5 = vweird.f32 %v2366_v45 }
0x24fe   :  { %v3587_v46 = vpop.eup %3586 }
0x24ff   :  { %v2368_v47 = vmul.f32 %v3587_v46, %v2366_v45  ;;  %vm2374_vm4 = vweird.f32 %v3587_v46 }
0x2500   :  { %vm2375_vm9 = vmor %vm2373_vm5, %vm2374_vm4 }
0x2501   :  { %v2369_v48 = vmul.f32 %v3587_v46, %v2368_v47 }
0x2503   :  { %v2370_v50 = vmul.f32 0.5, %v2369_v48 }
0x2505   :  { %v2371_v51 = vsub.f32 1.5, %v2370_v50 }
0x2507   :  { %v2372_v52 = vmul.f32 %v3587_v46, %v2371_v51 }
0x2509   :  { %v2376_v16 = vsel %vm2375_vm9, %v3587_v46, %v2372_v52 }
0x250a   :  { %3545 = vpush %v2376_v16 }
0x253b   :  { %s3546_s24 = spop %3545 }
0x253c   :  { %s4578_s24 = smov (!%p2365_p9, %s3546_s24), 0.0 }
0x253d   :  { %v2379_v40 = vstv %s4578_s24 }
0x253e   :  { %v2380_v54 = vmul.f32 %v2379_v40, %v2353_v36 }
0x2540   :  { %2381 = vst.msk [vmem:[%s4557_s2 + $0xa] sm:$0x1] %vm849_vm1, %v2380_v54  ;;  %3448 = vmatmul.msk.f32.vlgmr.msra.gmra.mxu2 %vm845_vm0, %v2380_v54 }
0x2547   :  { %v2406_v56 = vld [vmem:[%s4557_s2 + $0x8] sm:$0xff] }
0x2548   :  { %3449 = vmatpush.xpose.msk.msra.mxu1 %vm845_vm0, %v2406_v56  ;;  %2453 = vmatpush.msrb.mxu3 %v2406_v56 }
0x2549   :  { %3453 = vmatpush.xpose.msk.msra.mxu0 %vm845_vm0, %v2406_v56 }
0x254a   :  { %2454 = vmatpush.msrb.mxu3 %v4307_v27 }
0x254c   :  { %2546 = vmatpush.msra.mxu3 %v4075_v49  ;;  %3450 = vmatpush.xpose.msk.msra.mxu1 %vm845_vm0, %v4307_v27 }
0x254d   :  { %3454 = vmatpush.xpose.msk.msra.mxu0 %vm845_vm0, %v4307_v27 }
0x254e   :  { %2547 = vmatpush.msra.mxu3 %v4080_v8 }
0x2550   :  { %2500 = vmatpush.msrb.mxu1 %v2406_v56  ;;  %2548 = vmatpush.msra.mxu3 %v4084_v58 }
0x2552   :  { %2501 = vmatpush.msrb.mxu1 %v4307_v27  ;;  %2549 = vmatpush.msra.mxu3 %v4090_v61 }
0x2554   :  { %2550 = vmatpush.msra.mxu3 %v4095_v63 }
0x2556   :  { %2551 = vmatpush.msra.mxu3 %v4098_v1 }
0x2558   :  { %2552 = vmatpush.msra.mxu3 %v4101_v53 }
0x255a   :  { %2553 = vmatpush.msra.mxu3 %v4104_v2 }
0x25c3   :  { %v2402_v57 = vpop.f32.mrf.mxu2 }
0x25c4   :  { %3451 = vmatmul.msk.f32.vlgmr.msra.gmra.mxu1 %vm845_vm0, %v2402_v57 }
0x2641   :  { %v2433_v59 = vpop.f32.mrf.mxu1 }
0x2642   :  { %3452 = vmatmul.msk.f32.vlgmr.msrb.gmra.mxu3 %vm905_vm2, %v2433_v59 }
0x26c5   :  { %v2456_v60 = vpop.f32.mrf.mxu3 }
0x26c6   :  { %v2459_v55 = vsub.f32 %v2402_v57, %v2456_v60 }
0x26c8   :  { %3455 = vmatmul.msk.f32.vlgmr.msra.gmra.mxu0 %vm845_vm0, %v2459_v55 }
0x2745   :  { %v2480_v62 = vpop.f32.mrf.mxu0 }
0x2746   :  { %3456 = vmatmul.msk.f32.vlgmr.msrb.gmra.mxu1 %vm905_vm2, %v2480_v62 }
0x27c3   :  { %v2503_v0 = vpop.f32.mrf.mxu1 }
0x27c4   :  { %v2506_v31 = vsub.f32 %v2459_v55, %v2503_v0 }
0x27c6   :  { %v2507_v5 = vmul.f32 %v2506_v31, %v2506_v31 }
0x27c8   :  { %v2508_v6 = vsel %vm849_vm1, %v2507_v5, 0.0 }
0x27c9   :  { %2509 = vadd.xlane.f32.xlu1 %v2508_v6 }
0x283c   :  { %v2510_v9 = vpop.xlane.xlu1 %2509 }
0x283d   :  { %v2511_v10 = vrot.slane %v2510_v9, 4 }
0x283f   :  { %v2512_v12 = vadd.f32 %v2511_v10, %v2510_v9 }
0x2841   :  { %v2513_v3 = vrot.slane %v2512_v12, 2 }
0x2843   :  { %v2514_v13 = vadd.f32 %v2513_v3, %v2512_v12 }
0x2845   :  { %v2515_v14 = vrot.slane %v2514_v13, 1 }
0x2847   :  { %v2516_v17 = vadd.f32 %v2515_v14, %v2514_v13 }
0x2849   :  { %3547 = vpush %v2516_v17 }
0x287a   :  { %s3548_s28 = spop %3547 }
0x287b   :  { %v2519_v18 = vstv %s3548_s28  ;;  %p2518_p10 = scmp.gt.f32.partialorder %s3548_s28, 1e-30 }
0x287c   :  { %3588 = vrsqrt.f32 %v2519_v18  ;;  %vm2526_vm6 = vweird.f32 %v2519_v18 }
0x2882   :  { %v3589_v19 = vpop.eup %3588 }
0x2883   :  { %v2521_v20 = vmul.f32 %v3589_v19, %v2519_v18  ;;  %vm2527_vm10 = vweird.f32 %v3589_v19 }
0x2884   :  { %vm2528_vm7 = vmor %vm2526_vm6, %vm2527_vm10 }
0x2885   :  { %v2522_v21 = vmul.f32 %v3589_v19, %v2521_v20 }
0x2887   :  { %v2523_v22 = vmul.f32 0.5, %v2522_v21 }
0x2889   :  { %v2524_v23 = vsub.f32 1.5, %v2523_v22 }
0x288b   :  { %v2525_v25 = vmul.f32 %v3589_v19, %v2524_v23 }
0x288d   :  { %v2529_v26 = vsel %vm2528_vm7, %v3589_v19, %v2525_v25 }
0x288e   :  { %3549 = vpush %v2529_v26 }
0x28bf   :  { %s3550_s29 = spop %3549 }
0x28c0   :  { %s4580_s29 = smov (!%p2518_p10, %s3550_s29), 0.0 }
0x28c1   :  { %v2532_v28 = vstv %s4580_s29 }
0x28c2   :  { %v2533_v29 = vmul.f32 %v2532_v28, %v2506_v31 }
0x28c4   :  { %2534 = vst.msk [vmem:[%s4557_s2 + $0xb] sm:$0x1] %vm849_vm1, %v2533_v29  ;;  %3457 = vmatmul.msk.f32.vlgmr.msra.gmra.mxu3 %vm845_vm0, %v2533_v29 }
0x28cb   :  { %v2559_v30 = vld [vmem:[%s4557_s2 + $0x8] sm:$0xff] }
0x28cc   :  { %3458 = vmatpush.xpose.msk.msrb.mxu0 %vm845_vm0, %v2559_v30  ;;  %2606 = vmatpush.msrb.mxu2 %v2559_v30 }
0x28cd   :  { %3462 = vmatpush.xpose.msk.msra.mxu1 %vm845_vm0, %v2559_v30 }
0x28ce   :  { %2607 = vmatpush.msrb.mxu2 %v4307_v27 }
0x28d0   :  { %2699 = vmatpush.msra.mxu2 %v4075_v49  ;;  %3459 = vmatpush.xpose.msk.msrb.mxu0 %vm845_vm0, %v4307_v27 }
0x28d1   :  { %3463 = vmatpush.xpose.msk.msra.mxu1 %vm845_vm0, %v4307_v27 }
0x28d2   :  { %2700 = vmatpush.msra.mxu2 %v4080_v8 }
0x28d4   :  { %2653 = vmatpush.msra.mxu0 %v2559_v30  ;;  %2701 = vmatpush.msra.mxu2 %v4084_v58 }
0x28d6   :  { %2654 = vmatpush.msra.mxu0 %v4307_v27  ;;  %2702 = vmatpush.msra.mxu2 %v4090_v61 }
0x28d8   :  { %2703 = vmatpush.msra.mxu2 %v4095_v63 }
0x28da   :  { %2704 = vmatpush.msra.mxu2 %v4098_v1 }
0x28dc   :  { %2705 = vmatpush.msra.mxu2 %v4101_v53 }
0x28de   :  { %2706 = vmatpush.msra.mxu2 %v4104_v2 }
0x2947   :  { %v2555_v4 = vpop.f32.mrf.mxu3 }
0x2948   :  { %3460 = vmatmul.msk.f32.vlgmr.msrb.gmra.mxu0 %vm845_vm0, %v2555_v4 }
0x29c5   :  { %v2586_v11 = vpop.f32.mrf.mxu0 }
0x29c6   :  { %3461 = vmatmul.msk.f32.vlgmr.msrb.gmra.mxu2 %vm905_vm2, %v2586_v11 }
0x2a49   :  { %v2609_v32 = vpop.f32.mrf.mxu2 }
0x2a4a   :  { %v2612_v38 = vsub.f32 %v2555_v4, %v2609_v32 }
0x2a4c   :  { %3464 = vmatmul.msk.f32.vlgmr.msra.gmra.mxu1 %vm845_vm0, %v2612_v38 }
0x2ac9   :  { %v2633_v33 = vpop.f32.mrf.mxu1 }
0x2aca   :  { %3465 = vmatmul.msk.f32.vlgmr.msra.gmra.mxu0 %vm905_vm2, %v2633_v33 }
0x2b47   :  { %v2656_v34 = vpop.f32.mrf.mxu0 }
0x2b48   :  { %v2659_v35 = vsub.f32 %v2612_v38, %v2656_v34 }
0x2b4a   :  { %v2660_v36 = vmul.f32 %v2659_v35, %v2659_v35 }
0x2b4c   :  { %v2661_v15 = vsel %vm849_vm1, %v2660_v36, 0.0 }
0x2b4d   :  { %2662 = vadd.xlane.f32.xlu2 %v2661_v15 }
0x2bc0   :  { %v2663_v39 = vpop.xlane.xlu2 %2662 }
0x2bc1   :  { %v2664_v24 = vrot.slane %v2663_v39, 4 }
0x2bc3   :  { %v2665_v37 = vadd.f32 %v2664_v24, %v2663_v39 }
0x2bc5   :  { %v2666_v41 = vrot.slane %v2665_v37, 2 }
0x2bc7   :  { %v2667_v7 = vadd.f32 %v2666_v41, %v2665_v37 }
0x2bc9   :  { %v2668_v42 = vrot.slane %v2667_v7, 1 }
0x2bcb   :  { %v2669_v43 = vadd.f32 %v2668_v42, %v2667_v7 }
0x2bcd   :  { %3551 = vpush %v2669_v43 }
0x2bfe   :  { %s3552_s7 = spop %3551 }
0x2bff   :  { %v2672_v44 = vstv %s3552_s7  ;;  %p2671_p11 = scmp.gt.f32.partialorder %s3552_s7, 1e-30 }
0x2c00   :  { %3590 = vrsqrt.f32 %v2672_v44  ;;  %vm2679_vm8 = vweird.f32 %v2672_v44 }
0x2c06   :  { %v3591_v45 = vpop.eup %3590 }
0x2c07   :  { %v2674_v46 = vmul.f32 %v3591_v45, %v2672_v44  ;;  %vm2680_vm11 = vweird.f32 %v3591_v45 }
0x2c08   :  { %vm2681_vm12 = vmor %vm2679_vm8, %vm2680_vm11 }
0x2c09   :  { %v2675_v47 = vmul.f32 %v3591_v45, %v2674_v46 }
0x2c0b   :  { %v2676_v48 = vmul.f32 0.5, %v2675_v47 }
0x2c0d   :  { %v2677_v50 = vsub.f32 1.5, %v2676_v48 }
0x2c0f   :  { %v2678_v51 = vmul.f32 %v3591_v45, %v2677_v50 }
0x2c11   :  { %v2682_v52 = vsel %vm2681_vm12, %v3591_v45, %v2678_v51 }
0x2c12   :  { %3553 = vpush %v2682_v52 }
0x2c43   :  { %s3554_s8 = spop %3553 }
0x2c44   :  { %s4582_s8 = smov (!%p2671_p11, %s3554_s8), 0.0 }
0x2c45   :  { %v2685_v16 = vstv %s4582_s8 }
0x2c46   :  { %v2686_v40 = vmul.f32 %v2685_v16, %v2659_v35 }
0x2c48   :  { %2687 = vst.msk [vmem:[%s4557_s2 + $0xc] sm:$0x1] %vm849_vm1, %v2686_v40  ;;  %3466 = vmatmul.msk.f32.vlgmr.msra.gmra.mxu2 %vm845_vm0, %v2686_v40 }
0x2c4f   :  { %v2712_v54 = vld [vmem:[%s4557_s2 + $0x8] sm:$0xff] }
0x2c50   :  { %3467 = vmatpush.xpose.msk.msrb.mxu1 %vm845_vm0, %v2712_v54  ;;  %2759 = vmatpush.msrb.mxu3 %v2712_v54 }
0x2c51   :  { %3471 = vmatpush.xpose.msk.msrb.mxu0 %vm845_vm0, %v2712_v54 }
0x2c52   :  { %2760 = vmatpush.msrb.mxu3 %v4307_v27 }
0x2c54   :  { %2852 = vmatpush.msra.mxu3 %v4075_v49  ;;  %3468 = vmatpush.xpose.msk.msrb.mxu1 %vm845_vm0, %v4307_v27 }
0x2c55   :  { %3472 = vmatpush.xpose.msk.msrb.mxu0 %vm845_vm0, %v4307_v27 }
0x2c56   :  { %2853 = vmatpush.msra.mxu3 %v4080_v8 }
0x2c58   :  { %2806 = vmatpush.msra.mxu1 %v2712_v54  ;;  %2854 = vmatpush.msra.mxu3 %v4084_v58 }
0x2c5a   :  { %2807 = vmatpush.msra.mxu1 %v4307_v27  ;;  %2855 = vmatpush.msra.mxu3 %v4090_v61 }
0x2c5c   :  { %2856 = vmatpush.msra.mxu3 %v4095_v63 }
0x2c5e   :  { %2857 = vmatpush.msra.mxu3 %v4098_v1 }
0x2c60   :  { %2858 = vmatpush.msra.mxu3 %v4101_v53 }
0x2c62   :  { %2859 = vmatpush.msra.mxu3 %v4104_v2 }
0x2ccb   :  { %v2708_v56 = vpop.f32.mrf.mxu2 }
0x2ccc   :  { %3469 = vmatmul.msk.f32.vlgmr.msrb.gmra.mxu1 %vm845_vm0, %v2708_v56 }
0x2d49   :  { %v2739_v57 = vpop.f32.mrf.mxu1 }
0x2d4a   :  { %3470 = vmatmul.msk.f32.vlgmr.msrb.gmra.mxu3 %vm905_vm2, %v2739_v57 }
0x2dcd   :  { %v2762_v59 = vpop.f32.mrf.mxu3 }
0x2dce   :  { %v2765_v60 = vsub.f32 %v2708_v56, %v2762_v59 }
0x2dd0   :  { %3473 = vmatmul.msk.f32.vlgmr.msrb.gmra.mxu0 %vm845_vm0, %v2765_v60 }
0x2e4d   :  { %v2786_v55 = vpop.f32.mrf.mxu0 }
0x2e4e   :  { %3474 = vmatmul.msk.f32.vlgmr.msra.gmra.mxu1 %vm905_vm2, %v2786_v55 }
0x2ecb   :  { %v2809_v62 = vpop.f32.mrf.mxu1 }
0x2ecc   :  { %v2812_v0 = vsub.f32 %v2765_v60, %v2809_v62 }
0x2ece   :  { %v2813_v31 = vmul.f32 %v2812_v0, %v2812_v0 }
0x2ed0   :  { %v2814_v5 = vsel %vm849_vm1, %v2813_v31, 0.0 }
0x2ed1   :  { %2815 = vadd.xlane.f32.xlu0 %v2814_v5 }
0x2f44   :  { %v2816_v6 = vpop.xlane.xlu0 %2815 }
0x2f45   :  { %v2817_v9 = vrot.slane %v2816_v6, 4 }
0x2f47   :  { %v2818_v10 = vadd.f32 %v2817_v9, %v2816_v6 }
0x2f49   :  { %v2819_v12 = vrot.slane %v2818_v10, 2 }
0x2f4b   :  { %v2820_v3 = vadd.f32 %v2819_v12, %v2818_v10 }
0x2f4d   :  { %v2821_v13 = vrot.slane %v2820_v3, 1 }
0x2f4f   :  { %v2822_v14 = vadd.f32 %v2821_v13, %v2820_v3 }
0x2f51   :  { %3555 = vpush %v2822_v14 }
0x2f82   :  { %s3556_s13 = spop %3555 }
0x2f83   :  { %v2825_v17 = vstv %s3556_s13  ;;  %p2824_p12 = scmp.gt.f32.partialorder %s3556_s13, 1e-30 }
0x2f84   :  { %3592 = vrsqrt.f32 %v2825_v17  ;;  %vm2832_vm14 = vweird.f32 %v2825_v17 }
0x2f8a   :  { %v3593_v18 = vpop.eup %3592 }
0x2f8b   :  { %v2827_v19 = vmul.f32 %v3593_v18, %v2825_v17  ;;  %vm2833_vm13 = vweird.f32 %v3593_v18 }
0x2f8c   :  { %vm2834_vm15 = vmor %vm2832_vm14, %vm2833_vm13 }
0x2f8d   :  { %v2828_v20 = vmul.f32 %v3593_v18, %v2827_v19 }
0x2f8f   :  { %v2829_v21 = vmul.f32 0.5, %v2828_v20 }
0x2f91   :  { %v2830_v22 = vsub.f32 1.5, %v2829_v21 }
0x2f93   :  { %v2831_v23 = vmul.f32 %v3593_v18, %v2830_v22 }
0x2f95   :  { %v2835_v25 = vsel %vm2834_vm15, %v3593_v18, %v2831_v23 }
0x2f96   :  { %3557 = vpush %v2835_v25 }
0x2fc7   :  { %s3558_s14 = spop %3557 }
0x2fc8   :  { %s4584_s14 = smov (!%p2824_p12, %s3558_s14), 0.0 }
0x2fc9   :  { %v2838_v26 = vstv %s4584_s14 }
0x2fca   :  { %v2839_v28 = vmul.f32 %v2838_v26, %v2812_v0 }
0x2fcc   :  { %2840 = vst.msk [vmem:[%s4557_s2 + $0xd] sm:$0x1] %vm849_vm1, %v2839_v28  ;;  %3475 = vmatmul.msk.f32.vlgmr.msra.gmra.mxu3 %vm845_vm0, %v2839_v28 }
0x2fd3   :  { %v2865_v29 = vld [vmem:[%s4557_s2 + $0x8] sm:$0xff] }
0x2fd4   :  { %3476 = vmatpush.xpose.msk.msra.mxu0 %vm845_vm0, %v2865_v29  ;;  %2912 = vmatpush.msrb.mxu2 %v2865_v29 }
0x2fd5   :  { %3480 = vmatpush.xpose.msk.msrb.mxu1 %vm845_vm0, %v2865_v29 }
0x2fd6   :  { %2913 = vmatpush.msrb.mxu2 %v4307_v27 }
0x2fd8   :  { %3005 = vmatpush.msra.mxu2 %v4075_v49  ;;  %3477 = vmatpush.xpose.msk.msra.mxu0 %vm845_vm0, %v4307_v27 }
0x2fd9   :  { %3481 = vmatpush.xpose.msk.msrb.mxu1 %vm845_vm0, %v4307_v27 }
0x2fda   :  { %3006 = vmatpush.msra.mxu2 %v4080_v8 }
0x2fdc   :  { %2959 = vmatpush.msrb.mxu0 %v2865_v29  ;;  %3007 = vmatpush.msra.mxu2 %v4084_v58 }
0x2fde   :  { %2960 = vmatpush.msrb.mxu0 %v4307_v27  ;;  %3008 = vmatpush.msra.mxu2 %v4090_v61 }
0x2fe0   :  { %3009 = vmatpush.msra.mxu2 %v4095_v63 }
0x2fe2   :  { %3010 = vmatpush.msra.mxu2 %v4098_v1 }
0x2fe4   :  { %3011 = vmatpush.msra.mxu2 %v4101_v53 }
0x2fe6   :  { %3012 = vmatpush.msra.mxu2 %v4104_v2 }
0x304f   :  { %v2861_v30 = vpop.f32.mrf.mxu3 }
0x3050   :  { %3478 = vmatmul.msk.f32.vlgmr.msra.gmra.mxu0 %vm845_vm0, %v2861_v30 }
0x30cd   :  { %v2892_v4 = vpop.f32.mrf.mxu0 }
0x30ce   :  { %3479 = vmatmul.msk.f32.vlgmr.msrb.gmra.mxu2 %vm905_vm2, %v2892_v4 }
0x3151   :  { %v2915_v11 = vpop.f32.mrf.mxu2 }
0x3152   :  { %v2918_v32 = vsub.f32 %v2861_v30, %v2915_v11 }
0x3154   :  { %3482 = vmatmul.msk.f32.vlgmr.msrb.gmra.mxu1 %vm845_vm0, %v2918_v32 }
0x31d1   :  { %v2939_v38 = vpop.f32.mrf.mxu1 }
0x31d2   :  { %3483 = vmatmul.msk.f32.vlgmr.msrb.gmra.mxu0 %vm905_vm2, %v2939_v38 }
0x324f   :  { %v2962_v33 = vpop.f32.mrf.mxu0 }
0x3250   :  { %v2965_v34 = vsub.f32 %v2918_v32, %v2962_v33 }
0x3252   :  { %v2966_v35 = vmul.f32 %v2965_v34, %v2965_v34 }
0x3254   :  { %v2967_v36 = vsel %vm849_vm1, %v2966_v35, 0.0 }
0x3255   :  { %2968 = vadd.xlane.f32.xlu1 %v2967_v36 }
0x32c8   :  { %v2969_v15 = vpop.xlane.xlu1 %2968 }
0x32c9   :  { %v2970_v39 = vrot.slane %v2969_v15, 4 }
0x32cb   :  { %v2971_v24 = vadd.f32 %v2970_v39, %v2969_v15 }
0x32cd   :  { %v2972_v37 = vrot.slane %v2971_v24, 2 }
0x32cf   :  { %v2973_v41 = vadd.f32 %v2972_v37, %v2971_v24 }
0x32d1   :  { %v2974_v7 = vrot.slane %v2973_v41, 1 }
0x32d3   :  { %v2975_v42 = vadd.f32 %v2974_v7, %v2973_v41 }
0x32d5   :  { %3559 = vpush %v2975_v42 }
0x3306   :  { %s3560_s18 = spop %3559 }
0x3307   :  { %v2978_v43 = vstv %s3560_s18  ;;  %p2977_p13 = scmp.gt.f32.partialorder %s3560_s18, 1e-30 }
0x3308   :  { %3594 = vrsqrt.f32 %v2978_v43  ;;  %vm2985_vm4 = vweird.f32 %v2978_v43 }
0x330e   :  { %v3595_v44 = vpop.eup %3594 }
0x330f   :  { %v2980_v45 = vmul.f32 %v3595_v44, %v2978_v43  ;;  %vm2986_vm3 = vweird.f32 %v3595_v44 }
0x3310   :  { %vm2987_vm5 = vmor %vm2985_vm4, %vm2986_vm3 }
0x3311   :  { %v2981_v46 = vmul.f32 %v3595_v44, %v2980_v45 }
0x3313   :  { %v2982_v47 = vmul.f32 0.5, %v2981_v46 }
0x3315   :  { %v2983_v48 = vsub.f32 1.5, %v2982_v47 }
0x3317   :  { %v2984_v50 = vmul.f32 %v3595_v44, %v2983_v48 }
0x3319   :  { %v2988_v51 = vsel %vm2987_vm5, %v3595_v44, %v2984_v50 }
0x331a   :  { %3561 = vpush %v2988_v51 }
0x334b   :  { %s3562_s19 = spop %3561 }
0x334c   :  { %s4586_s19 = smov (!%p2977_p13, %s3562_s19), 0.0 }
0x334d   :  { %v2991_v52 = vstv %s4586_s19 }
0x334e   :  { %v2992_v16 = vmul.f32 %v2991_v52, %v2965_v34 }
0x3350   :  { %2993 = vst.msk [vmem:[%s4557_s2 + $0xe] sm:$0x1] %vm849_vm1, %v2992_v16  ;;  %3484 = vmatmul.msk.f32.vlgmr.msra.gmra.mxu2 %vm845_vm0, %v2992_v16 }
0x3357   :  { %v3018_v40 = vld [vmem:[%s4557_s2 + $0x8] sm:$0xff] }
0x3358   :  { %3485 = vmatpush.xpose.msk.msra.mxu1 %vm845_vm0, %v3018_v40  ;;  %3065 = vmatpush.msrb.mxu3 %v3018_v40 }
0x3359   :  { %3489 = vmatpush.xpose.msk.msra.mxu0 %vm845_vm0, %v3018_v40 }
0x335a   :  { %3066 = vmatpush.msrb.mxu3 %v4307_v27 }
0x335c   :  { %3163 = vmatpush.msra.mxu3 %v4075_v49  ;;  %3486 = vmatpush.xpose.msk.msra.mxu1 %vm845_vm0, %v4307_v27 }
0x335d   :  { %3490 = vmatpush.xpose.msk.msra.mxu0 %vm845_vm0, %v4307_v27 }
0x335e   :  { %3164 = vmatpush.msra.mxu3 %v4080_v8 }
0x3360   :  { %3112 = vmatpush.msrb.mxu1 %v3018_v40  ;;  %3165 = vmatpush.msra.mxu3 %v4084_v58 }
0x3362   :  { %3113 = vmatpush.msrb.mxu1 %v4307_v27  ;;  %3166 = vmatpush.msra.mxu3 %v4090_v61 }
0x3364   :  { %3167 = vmatpush.msra.mxu3 %v4095_v63 }
0x3366   :  { %3168 = vmatpush.msra.mxu3 %v4098_v1 }
0x3368   :  { %3169 = vmatpush.msra.mxu3 %v4101_v53 }
0x336a   :  { %3170 = vmatpush.msra.mxu3 %v4104_v2 }
0x33d3   :  { %v3014_v49 = vpop.f32.mrf.mxu2 }
0x33d4   :  { %3487 = vmatmul.msk.f32.vlgmr.msra.gmra.mxu1 %vm845_vm0, %v3014_v49 }
0x3451   :  { %v3045_v54 = vpop.f32.mrf.mxu1 }
0x3452   :  { %3488 = vmatmul.msk.f32.vlgmr.msrb.gmra.mxu3 %vm905_vm2, %v3045_v54 }
0x345a   :  { %3493 = vmatmul.msk.f32.vlgmr.msra.gmra.mxu3 %vm845_vm0, %v4307_v27 }
0x34d5   :  { %v3068_v8 = vpop.f32.mrf.mxu3 }
0x34d6   :  { %v3071_v58 = vsub.f32 %v3014_v49, %v3068_v8 }
0x34d8   :  { %3491 = vmatmul.msk.f32.vlgmr.msra.gmra.mxu0 %vm845_vm0, %v3071_v58 }
0x34dd   :  { %v3172_v19 = vpop.f32.mrf.mxu3 }
0x3555   :  { %v3092_v61 = vpop.f32.mrf.mxu0 }
0x3556   :  { %3492 = vmatmul.msk.f32.vlgmr.msrb.gmra.mxu1 %vm905_vm2, %v3092_v61 }
0x35d3   :  { %v3115_v63 = vpop.f32.mrf.mxu1 }
0x35d4   :  { %v3118_v1 = vsub.f32 %v3071_v58, %v3115_v63 }
0x35d6   :  { %v3119_v53 = vmul.f32 %v3118_v1, %v3118_v1 }
0x35d8   :  { %v3120_v2 = vsel %vm849_vm1, %v3119_v53, 0.0 }
0x35d9   :  { %3121 = vadd.xlane.f32.xlu2 %v3120_v2 }
0x364c   :  { %v3122_v56 = vpop.xlane.xlu2 %3121 }
0x364d   :  { %v3123_v57 = vrot.slane %v3122_v56, 4 }
0x364f   :  { %v3124_v59 = vadd.f32 %v3123_v57, %v3122_v56 }
0x3651   :  { %v3125_v60 = vrot.slane %v3124_v59, 2 }
0x3653   :  { %v3126_v55 = vadd.f32 %v3125_v60, %v3124_v59 }
0x3655   :  { %v3127_v62 = vrot.slane %v3126_v55, 1 }
0x3657   :  { %v3128_v0 = vadd.f32 %v3127_v62, %v3126_v55 }
0x3659   :  { %3563 = vpush %v3128_v0 }
0x368a   :  { %s3564_s24 = spop %3563 }
0x368b   :  { %v3131_v31 = vstv %s3564_s24  ;;  %p3130_p0 = scmp.gt.f32.partialorder %s3564_s24, 1e-30 }
0x368c   :  { %3596 = vrsqrt.f32 %v3131_v31  ;;  %vm3138_vm10 = vweird.f32 %v3131_v31 }
0x3692   :  { %v3597_v5 = vpop.eup %3596 }
0x3693   :  { %v3133_v6 = vmul.f32 %v3597_v5, %v3131_v31  ;;  %vm3139_vm9 = vweird.f32 %v3597_v5 }
0x3694   :  { %vm3140_vm6 = vmor %vm3138_vm10, %vm3139_vm9 }
0x3695   :  { %v3134_v9 = vmul.f32 %v3597_v5, %v3133_v6 }
0x3697   :  { %v3135_v10 = vmul.f32 0.5, %v3134_v9 }
0x3699   :  { %v3136_v12 = vsub.f32 1.5, %v3135_v10 }
0x369b   :  { %v3137_v3 = vmul.f32 %v3597_v5, %v3136_v12 }
0x369d   :  { %v3141_v13 = vsel %vm3140_vm6, %v3597_v5, %v3137_v3 }
0x369e   :  { %3565 = vpush %v3141_v13 }
0x36cf   :  { %s3566_s1 = spop %3565 }
0x36d0   :  { %s4588_s1 = smov (!%p3130_p0, %s3566_s1), 0.0 }
0x36d1   :  { %v3144_v14 = vstv %s4588_s1 }
0x36d2   :  { %v3145_v17 = vmul.f32 %v3144_v14, %v3118_v1 }
0x36d4   :  { %3146 = vst.msk [vmem:[%s4557_s2 + $0xf] sm:$0x1] %vm849_vm1, %v3145_v17 }
0x36db   :  { %v3148_v18 = vld [vmem:[%s4557_s2 + $0x8] sm:$0xff] }
0x36dc   :  { %3494 = vmatmul.msk.f32.gmra.mxu3 %vm845_vm0, %v3148_v18  ;;  %3495 = vmatpush.xpose.msk.msrb.mxu0 %vm845_vm0, %v3148_v18 }
0x36e0   :  { %3496 = vmatpush.xpose.msk.msrb.mxu0 %vm845_vm0, %v4307_v27 }
0x36e3   :  { %3497 = vmatmul.msk.f32.vlgmr.msrb.gmra.mxu0 %vm845_vm0, %v3172_v19 }
0x375f   :  { %v3175_v20 = vpop.f32.mrf.mxu3 }
0x3760   :  { %v3201_v21 = vpop.f32.mrf.mxu0  ;;  %3498 = vmatmul.msk.f32.gmra.mxu0 %vm845_vm0, %v3175_v20 }
0x3761   :  { %3207 = vst.msk [vmem:[%s4558_s3] sm:$0xff] %vm905_vm2, %v3201_v21 }
0x37dd   :  { %v3204_v22 = vpop.f32.mrf.mxu0 }
0x37de   :  { %3208 = vst.msk [vmem:[%s4558_s3 + $0x8] sm:$0xff] %vm905_vm2, %v3204_v22 }

</bundles_post_ra>
